<compile_context>
chip_gen: v7x
topology: tpu7x:2x2x1
jax: 0.10.0
libtpu: 0.0.40
codegen_flags: <defaults>
</compile_context>

<pallas_src>
import jax
import jax.numpy as jnp
from jax import lax
from jax.experimental import pallas as pl
from jax.experimental.pallas import tpu as pltpu

GN_EPS = 1e-5
NUM_GROUPS = 8


# ----------------------------- Pallas kernel -------------------------------

def _conv3x3_gn_relu(x, pad_ref, w, gamma, beta, mix):
    """conv3x3(pad=1, no bias) -> GroupNorm(8) -> ReLU for one sample.

    x:       (H, W, C) f32 value
    pad_ref: (H+2, W+2, C) f32 VMEM scratch (zero-padded staging buffer)
    w:       (9*C, Cout) bf16 im2col weight matrix
    gamma, beta: (1, Cout) f32 ; mix: (Cout, Cout) f32 group-indicator matrix
    returns  (H*W, Cout) f32
    """
    H, W, C = x.shape
    cpg = w.shape[1] // NUM_GROUPS

    # In-kernel zero padding (padding=1) into a VMEM scratch: no extra HBM
    # traffic / XLA pad op.  Interior is fully overwritten each call.
    pad_ref[...] = jnp.zeros_like(pad_ref)
    pad_ref[pl.ds(1, H), pl.ds(1, W), :] = x

    # im2col: 9 shifted windows concatenated along the channel (lane) axis ->
    # one MXU matmul with contraction dim 9*C instead of nine K=C matmuls.
    # Cast to bf16 per-window so the concat itself moves half the bytes.
    cols = [pad_ref[pl.ds(dy, H), pl.ds(dx, W), :].astype(jnp.bfloat16)
            for dy in range(3) for dx in range(3)]
    patches = jnp.concatenate(cols, axis=-1).reshape(H * W, 9 * C)
    y = jnp.dot(patches, w, preferred_element_type=jnp.float32)   # (H*W, Cout)

    # GroupNorm(8), all groups at once (f32).  `s @ mix` broadcasts each
    # group's reduction back to all of its channels, so everything stays a
    # lane-dense (H*W, Cout) tile -- no per-group loop or masked stores.
    cnt = jnp.float32(H * W * cpg)
    mean = jnp.dot(jnp.sum(y, axis=0, keepdims=True), mix,
                   preferred_element_type=jnp.float32) / cnt       # (1, Cout)
    yc = y - mean
    var = jnp.dot(jnp.sum(yc * yc, axis=0, keepdims=True), mix,
                  preferred_element_type=jnp.float32) / cnt        # (1, Cout)
    yn = yc * lax.rsqrt(var + GN_EPS)
    return jnp.maximum(yn * gamma + beta, 0.0)                     # (H*W, Cout)


def down_kernel(x_ref, w1_ref, g1_ref, b1_ref, mix1_ref,
                w2_ref, g2_ref, b2_ref, mix2_ref, o_ref,
                pad1_ref, pad2_ref):
    # x_ref: (1, H, W, Cin) f32       o_ref: (1, H//2, W//2, Cout) f32
    _, H, W, Cin = x_ref.shape
    Hp, Wp = H // 2, W // 2
    Cmid = w1_ref.shape[1]
    Cout = w2_ref.shape[1]

    # ---- MaxPool2d(2): layout-friendly reshape + max (no stride-2 slicing)
    x = x_ref[0]                                                  # (H, W, Cin)
    xw = jnp.max(x.reshape(H, Wp, 2, Cin), axis=2)                # pool along W
    xh = xw.reshape(Hp, 2, Wp, Cin)
    pooled = jnp.maximum(xh[:, 0], xh[:, 1])                      # (Hp, Wp, Cin)

    # ---- DoubleConv
    y1 = _conv3x3_gn_relu(pooled, pad1_ref, w1_ref[...],
                          g1_ref[...], b1_ref[...], mix1_ref[...])
    y2 = _conv3x3_gn_relu(y1.reshape(Hp, Wp, Cmid), pad2_ref, w2_ref[...],
                          g2_ref[...], b2_ref[...], mix2_ref[...])

    # Dropout2d(p=0.0) is nn.Identity in the reference -> nothing to do.
    # Single full-tile store.
    o_ref[...] = y2.reshape(1, Hp, Wp, Cout).astype(o_ref.dtype)


# ------------------------------ JAX wrappers -------------------------------

def _group_mix(c):
    g = jnp.arange(c) // (c // NUM_GROUPS)
    return (g[:, None] == g[None, :]).astype(jnp.float32)         # (c, c)


def prepare_down_params(params):
    """One-time parameter re-layout (hoisted out of the forward pass).

    PyTorch conv weights (Cout, Cin, 3, 3) -> im2col matrices (9*Cin, Cout)
    in bf16; gamma/beta -> (1, C) f32; plus the GroupNorm group-mixing masks.
    """
    def prep_w(w_oihw):
        cout, cin = w_oihw.shape[0], w_oihw.shape[1]
        assert cout % NUM_GROUPS == 0, "GroupNorm(8) needs channels % 8 == 0"
        return (jnp.transpose(w_oihw, (2, 3, 1, 0))       # (kh, kw, cin, cout)
                .reshape(9 * cin, cout).astype(jnp.bfloat16))
    return dict(
        w1=prep_w(params["w1"]),
        g1=params["g1"].reshape(1, -1).astype(jnp.float32),
        b1=params["b1"].reshape(1, -1).astype(jnp.float32),
        mix1=_group_mix(params["w1"].shape[0]),
        w2=prep_w(params["w2"]),
        g2=params["g2"].reshape(1, -1).astype(jnp.float32),
        b2=params["b2"].reshape(1, -1).astype(jnp.float32),
        mix2=_group_mix(params["w2"].shape[0]),
    )


@jax.jit
def down_forward(x_nchw, prep):
    """Down.forward: MaxPool2d(2) -> DoubleConv.  NCHW in / NCHW out."""
    N, Cin, H, W = x_nchw.shape
    assert H % 2 == 0 and W % 2 == 0, "MaxPool2d(2) kernel assumes even H, W"
    Hp, Wp = H // 2, W // 2
    Cmid = prep["w1"].shape[1]
    Cout = prep["w2"].shape[1]

    x = jnp.transpose(x_nchw, (0, 2, 3, 1))                       # NCHW -> NHWC

    def full(a):   # whole-array block, grid-invariant (DMA'd once)
        return pl.BlockSpec(a.shape, lambda n: (0,) * a.ndim)

    # Grid over the batch dim ("parallel" -> both TensorCores on v7x).  At
    # larger spatial sizes this grid would additionally tile H row-blocks
    # with a 1-row halo to respect the 64 MiB VMEM of v7x.
    y = pl.pallas_call(
        down_kernel,
        out_shape=jax.ShapeDtypeStruct((N, Hp, Wp, Cout), x_nchw.dtype),
        grid=(N,),
        in_specs=[
            pl.BlockSpec((1, H, W, Cin), lambda n: (n, 0, 0, 0)),
            full(prep["w1"]), full(prep["g1"]), full(prep["b1"]),
            full(prep["mix1"]),
            full(prep["w2"]), full(prep["g2"]), full(prep["b2"]),
            full(prep["mix2"]),
        ],
        out_specs=pl.BlockSpec((1, Hp, Wp, Cout), lambda n: (n, 0, 0, 0)),
        scratch_shapes=[
            pltpu.VMEM((Hp + 2, Wp + 2, Cin), jnp.float32),
            pltpu.VMEM((Hp + 2, Wp + 2, Cmid), jnp.float32),
        ],
        compiler_params=pltpu.CompilerParams(
            dimension_semantics=("parallel",),
            vmem_limit_bytes=32 * 1024 * 1024),
    )(x, prep["w1"], prep["g1"], prep["b1"], prep["mix1"],
      prep["w2"], prep["g2"], prep["b2"], prep["mix2"])

    return jnp.transpose(y, (0, 3, 1, 2))                         # NHWC -> NCHW


# --------------------------- pure-JAX reference ----------------------------

def _ref_conv_gn_relu(x, w, gamma, beta, matmul_dtype):
    y = lax.conv_general_dilated(
        x.astype(matmul_dtype), w.astype(matmul_dtype), (1, 1),
        ((1, 1), (1, 1)), dimension_numbers=("NCHW", "OIHW", "NCHW"),
        preferred_element_type=jnp.float32)
    N, C, H, W = y.shape
    cpg = C // NUM_GROUPS
    yg = y.reshape(N, NUM_GROUPS, cpg, H, W)
    mean = yg.mean(axis=(2, 3, 4), keepdims=True)
    var = ((yg - mean) ** 2).mean(axis=(2, 3, 4), keepdims=True)
    yn = ((yg - mean) * lax.rsqrt(var + GN_EPS)).reshape(N, C, H, W)
    yn = yn * gamma.reshape(1, C, 1, 1) + beta.reshape(1, C, 1, 1)
    return jnp.maximum(yn, 0.0)


def ref_down(x_nchw, params, matmul_dtype=jnp.float32):
    x = lax.reduce_window(x_nchw, -jnp.inf, lax.max,
                          (1, 1, 2, 2), (1, 1, 2, 2), "VALID")
    x = _ref_conv_gn_relu(x, params["w1"], params["g1"], params["b1"],
                          matmul_dtype)
    x = _ref_conv_gn_relu(x, params["w2"], params["g2"], params["b2"],
                          matmul_dtype)
    return x


# ----------------------------------- main -----------------------------------

if __name__ == "__main__":
    in_channels, out_channels = 8, 16          # divisible by 8 (GroupNorm(8))
    N, H, W = 2, 16, 16

    key = jax.random.PRNGKey(0)
    k_x, k_w1, k_w2, k_g1, k_b1, k_g2, k_b2 = jax.random.split(key, 7)

    x = jax.random.normal(k_x, (N, in_channels, H, W), jnp.float32)
    params = dict(
        w1=0.1 * jax.random.normal(k_w1, (out_channels, in_channels, 3, 3), jnp.float32),
        g1=1.0 + 0.1 * jax.random.normal(k_g1, (out_channels,), jnp.float32),
        b1=0.1 * jax.random.normal(k_b1, (out_channels,), jnp.float32),
        w2=0.1 * jax.random.normal(k_w2, (out_channels, out_channels, 3, 3), jnp.float32),
        g2=1.0 + 0.1 * jax.random.normal(k_g2, (out_channels,), jnp.float32),
        b2=0.1 * jax.random.normal(k_b2, (out_channels,), jnp.float32),
    )

    prep = prepare_down_params(params)         # one-time weight re-layout
    out = jax.block_until_ready(down_forward(x, prep))
    assert out.shape == (N, out_channels, H // 2, W // 2), out.shape

    # Precision-matched reference (bf16 matmul operands, f32 accum / GN).
    ref_bf16 = jax.block_until_ready(ref_down(x, params, jnp.bfloat16))
    assert jnp.allclose(out, ref_bf16, rtol=1e-3, atol=1e-3), \
        float(jnp.max(jnp.abs(out - ref_bf16)))

    # Full-f32 reference (original PyTorch semantics); bf16 MXU operands only
    # perturb the GroupNorm-ed output at the ~1e-2 level.
    ref_f32 = jax.block_until_ready(ref_down(x, params, jnp.float32))
    assert jnp.allclose(out, ref_f32, rtol=5e-2, atol=5e-2), \
        float(jnp.max(jnp.abs(out - ref_f32)))

    print("KERNEL_OK")
</pallas_src>

<mosaic_0001>
module attributes {stable_mosaic.version = 11 : i64} {
  func.func @down_kernel(%arg0: i32, %arg1: memref<1x16x16x8xf32, #tpu.memory_space<vmem>>, %arg2: memref<72x16xbf16, #tpu.memory_space<vmem>>, %arg3: memref<1x16xf32, #tpu.memory_space<vmem>>, %arg4: memref<1x16xf32, #tpu.memory_space<vmem>>, %arg5: memref<16x16xf32, #tpu.memory_space<vmem>>, %arg6: memref<144x16xbf16, #tpu.memory_space<vmem>>, %arg7: memref<1x16xf32, #tpu.memory_space<vmem>>, %arg8: memref<1x16xf32, #tpu.memory_space<vmem>>, %arg9: memref<16x16xf32, #tpu.memory_space<vmem>>, %arg10: memref<1x8x8x16xf32, #tpu.memory_space<vmem>>, %arg11: memref<10x10x8xf32, #tpu.memory_space<vmem>>, %arg12: memref<10x10x16xf32, #tpu.memory_space<vmem>>) attributes {dimension_semantics = [#tpu.dimension_semantics<parallel>], iteration_bounds = array<i64: 2>, scalar_prefetch = 0 : i64, scratch_operands = 2 : i64, tpu.core_type = #tpu.core_type<tc>, window_params = [{transform_indices = @transform_0, window_bounds = array<i64: 1, 16, 16, 8>}, {pipeline_mode = #tpu.pipeline_mode<synchronous>, transform_indices = @transform_1, window_bounds = array<i64: 72, 16>}, {pipeline_mode = #tpu.pipeline_mode<synchronous>, transform_indices = @transform_2, window_bounds = array<i64: 1, 16>}, {pipeline_mode = #tpu.pipeline_mode<synchronous>, transform_indices = @transform_3, window_bounds = array<i64: 1, 16>}, {pipeline_mode = #tpu.pipeline_mode<synchronous>, transform_indices = @transform_4, window_bounds = array<i64: 16, 16>}, {pipeline_mode = #tpu.pipeline_mode<synchronous>, transform_indices = @transform_5, window_bounds = array<i64: 144, 16>}, {pipeline_mode = #tpu.pipeline_mode<synchronous>, transform_indices = @transform_6, window_bounds = array<i64: 1, 16>}, {pipeline_mode = #tpu.pipeline_mode<synchronous>, transform_indices = @transform_7, window_bounds = array<i64: 1, 16>}, {pipeline_mode = #tpu.pipeline_mode<synchronous>, transform_indices = @transform_8, window_bounds = array<i64: 16, 16>}, {transform_indices = @transform_9, window_bounds = array<i64: 1, 8, 8, 16>}]} {
    %c0 = arith.constant 0 : index
    %c0_0 = arith.constant 0 : index
    %c0_1 = arith.constant 0 : index
    %c0_2 = arith.constant 0 : index
    %0 = vector.load %arg1[%c0, %c0_0, %c0_1, %c0_2] : memref<1x16x16x8xf32, #tpu.memory_space<vmem>>, vector<1x16x16x8xf32>
    %1 = vector.shape_cast %0 : vector<1x16x16x8xf32> to vector<16x16x8xf32>
    %2 = vector.shape_cast %1 : vector<16x16x8xf32> to vector<16x8x2x8xf32>
    %cst = arith.constant dense<0xFF800000> : vector<16x8x8xf32>
    %3 = vector.multi_reduction <maximumf>, %2, %cst [2] : vector<16x8x2x8xf32> to vector<16x8x8xf32>
    %4 = vector.shape_cast %3 : vector<16x8x8xf32> to vector<8x2x8x8xf32>
    %5 = vector.extract_strided_slice %4 {offsets = [0, 0, 0, 0], sizes = [8, 1, 8, 8], strides = [1, 1, 1, 1]} : vector<8x2x8x8xf32> to vector<8x1x8x8xf32>
    %6 = vector.shape_cast %5 : vector<8x1x8x8xf32> to vector<8x8x8xf32>
    %7 = vector.extract_strided_slice %4 {offsets = [0, 1, 0, 0], sizes = [8, 1, 8, 8], strides = [1, 1, 1, 1]} : vector<8x2x8x8xf32> to vector<8x1x8x8xf32>
    %8 = vector.shape_cast %7 : vector<8x1x8x8xf32> to vector<8x8x8xf32>
    %9 = arith.maximumf %6, %8 : vector<8x8x8xf32>
    %c0_3 = arith.constant 0 : index
    %c0_4 = arith.constant 0 : index
    %10 = vector.load %arg2[%c0_3, %c0_4] : memref<72x16xbf16, #tpu.memory_space<vmem>>, vector<72x16xbf16>
    %c0_5 = arith.constant 0 : index
    %c0_6 = arith.constant 0 : index
    %11 = vector.load %arg3[%c0_5, %c0_6] : memref<1x16xf32, #tpu.memory_space<vmem>>, vector<1x16xf32>
    %c0_7 = arith.constant 0 : index
    %c0_8 = arith.constant 0 : index
    %12 = vector.load %arg4[%c0_7, %c0_8] : memref<1x16xf32, #tpu.memory_space<vmem>>, vector<1x16xf32>
    %c0_9 = arith.constant 0 : index
    %c0_10 = arith.constant 0 : index
    %13 = vector.load %arg5[%c0_9, %c0_10] : memref<16x16xf32, #tpu.memory_space<vmem>>, vector<16x16xf32>
    %cst_11 = arith.constant 0.000000e+00 : f32
    %14 = vector.broadcast %cst_11 : f32 to vector<10x10x8xf32>
    %c0_12 = arith.constant 0 : index
    %c0_13 = arith.constant 0 : index
    %c0_14 = arith.constant 0 : index
    %15 = vector.load %arg11[%c0_12, %c0_13, %c0_14] : memref<10x10x8xf32, #tpu.memory_space<vmem>>, vector<10x10x8xf32>
    tpu.vector_store %arg11[%c0_12, %c0_13, %c0_14], %14 {strides = array<i32>} : memref<10x10x8xf32, #tpu.memory_space<vmem>>, vector<10x10x8xf32>,
    %c1 = arith.constant 1 : index
    %c1_15 = arith.constant 1 : index
    %c0_16 = arith.constant 0 : index
    %16 = vector.load %arg11[%c1, %c1_15, %c0_16] : memref<10x10x8xf32, #tpu.memory_space<vmem>>, vector<8x8x8xf32>
    tpu.vector_store %arg11[%c1, %c1_15, %c0_16], %9 {strides = array<i32>} : memref<10x10x8xf32, #tpu.memory_space<vmem>>, vector<8x8x8xf32>,
    %c0_17 = arith.constant 0 : index
    %c0_18 = arith.constant 0 : index
    %c0_19 = arith.constant 0 : index
    %17 = vector.load %arg11[%c0_17, %c0_18, %c0_19] : memref<10x10x8xf32, #tpu.memory_space<vmem>>, vector<8x8x8xf32>
    %18 = arith.truncf %17 : vector<8x8x8xf32> to vector<8x8x8xbf16>
    %c0_20 = arith.constant 0 : index
    %c1_21 = arith.constant 1 : index
    %c0_22 = arith.constant 0 : index
    %19 = vector.load %arg11[%c0_20, %c1_21, %c0_22] : memref<10x10x8xf32, #tpu.memory_space<vmem>>, vector<8x8x8xf32>
    %20 = arith.truncf %19 : vector<8x8x8xf32> to vector<8x8x8xbf16>
    %c0_23 = arith.constant 0 : index
    %c2 = arith.constant 2 : index
    %c0_24 = arith.constant 0 : index
    %21 = vector.load %arg11[%c0_23, %c2, %c0_24] : memref<10x10x8xf32, #tpu.memory_space<vmem>>, vector<8x8x8xf32>
    %22 = arith.truncf %21 : vector<8x8x8xf32> to vector<8x8x8xbf16>
    %c1_25 = arith.constant 1 : index
    %c0_26 = arith.constant 0 : index
    %c0_27 = arith.constant 0 : index
    %23 = vector.load %arg11[%c1_25, %c0_26, %c0_27] : memref<10x10x8xf32, #tpu.memory_space<vmem>>, vector<8x8x8xf32>
    %24 = arith.truncf %23 : vector<8x8x8xf32> to vector<8x8x8xbf16>
    %c1_28 = arith.constant 1 : index
    %c1_29 = arith.constant 1 : index
    %c0_30 = arith.constant 0 : index
    %25 = vector.load %arg11[%c1_28, %c1_29, %c0_30] : memref<10x10x8xf32, #tpu.memory_space<vmem>>, vector<8x8x8xf32>
    %26 = arith.truncf %25 : vector<8x8x8xf32> to vector<8x8x8xbf16>
    %c1_31 = arith.constant 1 : index
    %c2_32 = arith.constant 2 : index
    %c0_33 = arith.constant 0 : index
    %27 = vector.load %arg11[%c1_31, %c2_32, %c0_33] : memref<10x10x8xf32, #tpu.memory_space<vmem>>, vector<8x8x8xf32>
    %28 = arith.truncf %27 : vector<8x8x8xf32> to vector<8x8x8xbf16>
    %c2_34 = arith.constant 2 : index
    %c0_35 = arith.constant 0 : index
    %c0_36 = arith.constant 0 : index
    %29 = vector.load %arg11[%c2_34, %c0_35, %c0_36] : memref<10x10x8xf32, #tpu.memory_space<vmem>>, vector<8x8x8xf32>
    %30 = arith.truncf %29 : vector<8x8x8xf32> to vector<8x8x8xbf16>
    %c2_37 = arith.constant 2 : index
    %c1_38 = arith.constant 1 : index
    %c0_39 = arith.constant 0 : index
    %31 = vector.load %arg11[%c2_37, %c1_38, %c0_39] : memref<10x10x8xf32, #tpu.memory_space<vmem>>, vector<8x8x8xf32>
    %32 = arith.truncf %31 : vector<8x8x8xf32> to vector<8x8x8xbf16>
    %c2_40 = arith.constant 2 : index
    %c2_41 = arith.constant 2 : index
    %c0_42 = arith.constant 0 : index
    %33 = vector.load %arg11[%c2_40, %c2_41, %c0_42] : memref<10x10x8xf32, #tpu.memory_space<vmem>>, vector<8x8x8xf32>
    %34 = arith.truncf %33 : vector<8x8x8xf32> to vector<8x8x8xbf16>
    %35 = tpu.concatenate %18, %20, %22, %24, %26, %28, %30, %32, %34 in 2 : vector<8x8x8xbf16>, vector<8x8x8xbf16>, vector<8x8x8xbf16>, vector<8x8x8xbf16>, vector<8x8x8xbf16>, vector<8x8x8xbf16>, vector<8x8x8xbf16>, vector<8x8x8xbf16>, vector<8x8x8xbf16> -> vector<8x8x72xbf16>
    %36 = vector.shape_cast %35 : vector<8x8x72xbf16> to vector<64x72xbf16>
    %cst_43 = arith.constant dense<0.000000e+00> : vector<64x16xf32>
    %37 = tpu.matmul %36, %10, %cst_43 {dimension_numbers = #tpu.dot_dimension_numbers<[1], [0], [0], [1], [0, 0, 1, 1], [], []>} : vector<64x72xbf16>, vector<72x16xbf16>, vector<64x16xf32> -> vector<64x16xf32>
    %cst_44 = arith.constant dense<0.000000e+00> : vector<16xf32>
    %38 = vector.multi_reduction <add>, %37, %cst_44 [0] : vector<64x16xf32> to vector<16xf32>
    %39 = vector.shape_cast %38 : vector<16xf32> to vector<1x16xf32>
    %cst_45 = arith.constant dense<0.000000e+00> : vector<1x16xf32>
    %40 = tpu.matmul %39, %13, %cst_45 {dimension_numbers = #tpu.dot_dimension_numbers<[1], [0], [0], [1], [0, 0, 1, 1], [], []>} : vector<1x16xf32>, vector<16x16xf32>, vector<1x16xf32> -> vector<1x16xf32>
    %cst_46 = arith.constant 1.280000e+02 : f32
    %41 = vector.broadcast %cst_46 : f32 to vector<1x16xf32>
    %42 = arith.divf %40, %41 : vector<1x16xf32>
    %43 = vector.broadcast %42 : vector<1x16xf32> to vector<64x16xf32>
    %44 = arith.subf %37, %43 : vector<64x16xf32>
    %45 = arith.mulf %44, %44 : vector<64x16xf32>
    %cst_47 = arith.constant dense<0.000000e+00> : vector<16xf32>
    %46 = vector.multi_reduction <add>, %45, %cst_47 [0] : vector<64x16xf32> to vector<16xf32>
    %47 = vector.shape_cast %46 : vector<16xf32> to vector<1x16xf32>
    %cst_48 = arith.constant dense<0.000000e+00> : vector<1x16xf32>
    %48 = tpu.matmul %47, %13, %cst_48 {dimension_numbers = #tpu.dot_dimension_numbers<[1], [0], [0], [1], [0, 0, 1, 1], [], []>} : vector<1x16xf32>, vector<16x16xf32>, vector<1x16xf32> -> vector<1x16xf32>
    %cst_49 = arith.constant 1.280000e+02 : f32
    %49 = vector.broadcast %cst_49 : f32 to vector<1x16xf32>
    %50 = arith.divf %48, %49 : vector<1x16xf32>
    %cst_50 = arith.constant 9.99999974E-6 : f32
    %51 = vector.broadcast %cst_50 : f32 to vector<1x16xf32>
    %52 = arith.addf %50, %51 : vector<1x16xf32>
    %53 = math.rsqrt %52 : vector<1x16xf32>
    %54 = vector.broadcast %53 : vector<1x16xf32> to vector<64x16xf32>
    %55 = arith.mulf %44, %54 : vector<64x16xf32>
    %56 = vector.broadcast %11 : vector<1x16xf32> to vector<64x16xf32>
    %57 = arith.mulf %55, %56 : vector<64x16xf32>
    %58 = vector.broadcast %12 : vector<1x16xf32> to vector<64x16xf32>
    %59 = arith.addf %57, %58 : vector<64x16xf32>
    %cst_51 = arith.constant 0.000000e+00 : f32
    %60 = vector.broadcast %cst_51 : f32 to vector<64x16xf32>
    %61 = arith.maximumf %59, %60 : vector<64x16xf32>
    %62 = vector.shape_cast %61 : vector<64x16xf32> to vector<8x8x16xf32>
    %c0_52 = arith.constant 0 : index
    %c0_53 = arith.constant 0 : index
    %63 = vector.load %arg6[%c0_52, %c0_53] : memref<144x16xbf16, #tpu.memory_space<vmem>>, vector<144x16xbf16>
    %c0_54 = arith.constant 0 : index
    %c0_55 = arith.constant 0 : index
    %64 = vector.load %arg7[%c0_54, %c0_55] : memref<1x16xf32, #tpu.memory_space<vmem>>, vector<1x16xf32>
    %c0_56 = arith.constant 0 : index
    %c0_57 = arith.constant 0 : index
    %65 = vector.load %arg8[%c0_56, %c0_57] : memref<1x16xf32, #tpu.memory_space<vmem>>, vector<1x16xf32>
    %c0_58 = arith.constant 0 : index
    %c0_59 = arith.constant 0 : index
    %66 = vector.load %arg9[%c0_58, %c0_59] : memref<16x16xf32, #tpu.memory_space<vmem>>, vector<16x16xf32>
    %cst_60 = arith.constant 0.000000e+00 : f32
    %67 = vector.broadcast %cst_60 : f32 to vector<10x10x16xf32>
    %c0_61 = arith.constant 0 : index
    %c0_62 = arith.constant 0 : index
    %c0_63 = arith.constant 0 : index
    %68 = vector.load %arg12[%c0_61, %c0_62, %c0_63] : memref<10x10x16xf32, #tpu.memory_space<vmem>>, vector<10x10x16xf32>
    tpu.vector_store %arg12[%c0_61, %c0_62, %c0_63], %67 {strides = array<i32>} : memref<10x10x16xf32, #tpu.memory_space<vmem>>, vector<10x10x16xf32>,
    %c1_64 = arith.constant 1 : index
    %c1_65 = arith.constant 1 : index
    %c0_66 = arith.constant 0 : index
    %69 = vector.load %arg12[%c1_64, %c1_65, %c0_66] : memref<10x10x16xf32, #tpu.memory_space<vmem>>, vector<8x8x16xf32>
    tpu.vector_store %arg12[%c1_64, %c1_65, %c0_66], %62 {strides = array<i32>} : memref<10x10x16xf32, #tpu.memory_space<vmem>>, vector<8x8x16xf32>,
    %c0_67 = arith.constant 0 : index
    %c0_68 = arith.constant 0 : index
    %c0_69 = arith.constant 0 : index
    %70 = vector.load %arg12[%c0_67, %c0_68, %c0_69] : memref<10x10x16xf32, #tpu.memory_space<vmem>>, vector<8x8x16xf32>
    %71 = arith.truncf %70 : vector<8x8x16xf32> to vector<8x8x16xbf16>
    %c0_70 = arith.constant 0 : index
    %c1_71 = arith.constant 1 : index
    %c0_72 = arith.constant 0 : index
    %72 = vector.load %arg12[%c0_70, %c1_71, %c0_72] : memref<10x10x16xf32, #tpu.memory_space<vmem>>, vector<8x8x16xf32>
    %73 = arith.truncf %72 : vector<8x8x16xf32> to vector<8x8x16xbf16>
    %c0_73 = arith.constant 0 : index
    %c2_74 = arith.constant 2 : index
    %c0_75 = arith.constant 0 : index
    %74 = vector.load %arg12[%c0_73, %c2_74, %c0_75] : memref<10x10x16xf32, #tpu.memory_space<vmem>>, vector<8x8x16xf32>
    %75 = arith.truncf %74 : vector<8x8x16xf32> to vector<8x8x16xbf16>
    %c1_76 = arith.constant 1 : index
    %c0_77 = arith.constant 0 : index
    %c0_78 = arith.constant 0 : index
    %76 = vector.load %arg12[%c1_76, %c0_77, %c0_78] : memref<10x10x16xf32, #tpu.memory_space<vmem>>, vector<8x8x16xf32>
    %77 = arith.truncf %76 : vector<8x8x16xf32> to vector<8x8x16xbf16>
    %c1_79 = arith.constant 1 : index
    %c1_80 = arith.constant 1 : index
    %c0_81 = arith.constant 0 : index
    %78 = vector.load %arg12[%c1_79, %c1_80, %c0_81] : memref<10x10x16xf32, #tpu.memory_space<vmem>>, vector<8x8x16xf32>
    %79 = arith.truncf %78 : vector<8x8x16xf32> to vector<8x8x16xbf16>
    %c1_82 = arith.constant 1 : index
    %c2_83 = arith.constant 2 : index
    %c0_84 = arith.constant 0 : index
    %80 = vector.load %arg12[%c1_82, %c2_83, %c0_84] : memref<10x10x16xf32, #tpu.memory_space<vmem>>, vector<8x8x16xf32>
    %81 = arith.truncf %80 : vector<8x8x16xf32> to vector<8x8x16xbf16>
    %c2_85 = arith.constant 2 : index
    %c0_86 = arith.constant 0 : index
    %c0_87 = arith.constant 0 : index
    %82 = vector.load %arg12[%c2_85, %c0_86, %c0_87] : memref<10x10x16xf32, #tpu.memory_space<vmem>>, vector<8x8x16xf32>
    %83 = arith.truncf %82 : vector<8x8x16xf32> to vector<8x8x16xbf16>
    %c2_88 = arith.constant 2 : index
    %c1_89 = arith.constant 1 : index
    %c0_90 = arith.constant 0 : index
    %84 = vector.load %arg12[%c2_88, %c1_89, %c0_90] : memref<10x10x16xf32, #tpu.memory_space<vmem>>, vector<8x8x16xf32>
    %85 = arith.truncf %84 : vector<8x8x16xf32> to vector<8x8x16xbf16>
    %c2_91 = arith.constant 2 : index
    %c2_92 = arith.constant 2 : index
    %c0_93 = arith.constant 0 : index
    %86 = vector.load %arg12[%c2_91, %c2_92, %c0_93] : memref<10x10x16xf32, #tpu.memory_space<vmem>>, vector<8x8x16xf32>
    %87 = arith.truncf %86 : vector<8x8x16xf32> to vector<8x8x16xbf16>
    %88 = tpu.concatenate %71, %73, %75, %77, %79, %81, %83, %85, %87 in 2 : vector<8x8x16xbf16>, vector<8x8x16xbf16>, vector<8x8x16xbf16>, vector<8x8x16xbf16>, vector<8x8x16xbf16>, vector<8x8x16xbf16>, vector<8x8x16xbf16>, vector<8x8x16xbf16>, vector<8x8x16xbf16> -> vector<8x8x144xbf16>
    %89 = vector.shape_cast %88 : vector<8x8x144xbf16> to vector<64x144xbf16>
    %cst_94 = arith.constant dense<0.000000e+00> : vector<64x16xf32>
    %90 = tpu.matmul %89, %63, %cst_94 {dimension_numbers = #tpu.dot_dimension_numbers<[1], [0], [0], [1], [0, 0, 1, 1], [], []>} : vector<64x144xbf16>, vector<144x16xbf16>, vector<64x16xf32> -> vector<64x16xf32>
    %cst_95 = arith.constant dense<0.000000e+00> : vector<16xf32>
    %91 = vector.multi_reduction <add>, %90, %cst_95 [0] : vector<64x16xf32> to vector<16xf32>
    %92 = vector.shape_cast %91 : vector<16xf32> to vector<1x16xf32>
    %cst_96 = arith.constant dense<0.000000e+00> : vector<1x16xf32>
    %93 = tpu.matmul %92, %66, %cst_96 {dimension_numbers = #tpu.dot_dimension_numbers<[1], [0], [0], [1], [0, 0, 1, 1], [], []>} : vector<1x16xf32>, vector<16x16xf32>, vector<1x16xf32> -> vector<1x16xf32>
    %cst_97 = arith.constant 1.280000e+02 : f32
    %94 = vector.broadcast %cst_97 : f32 to vector<1x16xf32>
    %95 = arith.divf %93, %94 : vector<1x16xf32>
    %96 = vector.broadcast %95 : vector<1x16xf32> to vector<64x16xf32>
    %97 = arith.subf %90, %96 : vector<64x16xf32>
    %98 = arith.mulf %97, %97 : vector<64x16xf32>
    %cst_98 = arith.constant dense<0.000000e+00> : vector<16xf32>
    %99 = vector.multi_reduction <add>, %98, %cst_98 [0] : vector<64x16xf32> to vector<16xf32>
    %100 = vector.shape_cast %99 : vector<16xf32> to vector<1x16xf32>
    %cst_99 = arith.constant dense<0.000000e+00> : vector<1x16xf32>
    %101 = tpu.matmul %100, %66, %cst_99 {dimension_numbers = #tpu.dot_dimension_numbers<[1], [0], [0], [1], [0, 0, 1, 1], [], []>} : vector<1x16xf32>, vector<16x16xf32>, vector<1x16xf32> -> vector<1x16xf32>
    %cst_100 = arith.constant 1.280000e+02 : f32
    %102 = vector.broadcast %cst_100 : f32 to vector<1x16xf32>
    %103 = arith.divf %101, %102 : vector<1x16xf32>
    %cst_101 = arith.constant 9.99999974E-6 : f32
    %104 = vector.broadcast %cst_101 : f32 to vector<1x16xf32>
    %105 = arith.addf %103, %104 : vector<1x16xf32>
    %106 = math.rsqrt %105 : vector<1x16xf32>
    %107 = vector.broadcast %106 : vector<1x16xf32> to vector<64x16xf32>
    %108 = arith.mulf %97, %107 : vector<64x16xf32>
    %109 = vector.broadcast %64 : vector<1x16xf32> to vector<64x16xf32>
    %110 = arith.mulf %108, %109 : vector<64x16xf32>
    %111 = vector.broadcast %65 : vector<1x16xf32> to vector<64x16xf32>
    %112 = arith.addf %110, %111 : vector<64x16xf32>
    %cst_102 = arith.constant 0.000000e+00 : f32
    %113 = vector.broadcast %cst_102 : f32 to vector<64x16xf32>
    %114 = arith.maximumf %112, %113 : vector<64x16xf32>
    %115 = vector.shape_cast %114 : vector<64x16xf32> to vector<1x8x8x16xf32>
    %c0_103 = arith.constant 0 : index
    %c0_104 = arith.constant 0 : index
    %c0_105 = arith.constant 0 : index
    %c0_106 = arith.constant 0 : index
    %116 = vector.load %arg10[%c0_103, %c0_104, %c0_105, %c0_106] : memref<1x8x8x16xf32, #tpu.memory_space<vmem>>, vector<1x8x8x16xf32>
    tpu.vector_store %arg10[%c0_103, %c0_104, %c0_105, %c0_106], %115 {strides = array<i32>} : memref<1x8x8x16xf32, #tpu.memory_space<vmem>>, vector<1x8x8x16xf32>,
    return
  }
  func.func @transform_0(%arg0: i32) -> (i32, i32, i32, i32) {
    %c0_i32 = arith.constant 0 : i32
    %c0_i32_0 = arith.constant 0 : i32
    %c0_i32_1 = arith.constant 0 : i32
    %c0_i32_2 = arith.constant 0 : i32
    return %arg0, %c0_i32, %c0_i32_0, %c0_i32_1 : i32, i32, i32, i32
  }
  func.func @transform_1(%arg0: i32) -> (i32, i32) {
    %c0_i32 = arith.constant 0 : i32
    %c0_i32_0 = arith.constant 0 : i32
    %c0_i32_1 = arith.constant 0 : i32
    return %c0_i32, %c0_i32_0 : i32, i32
  }
  func.func @transform_2(%arg0: i32) -> (i32, i32) {
    %c0_i32 = arith.constant 0 : i32
    %c0_i32_0 = arith.constant 0 : i32
    %c0_i32_1 = arith.constant 0 : i32
    return %c0_i32, %c0_i32_0 : i32, i32
  }
  func.func @transform_3(%arg0: i32) -> (i32, i32) {
    %c0_i32 = arith.constant 0 : i32
    %c0_i32_0 = arith.constant 0 : i32
    %c0_i32_1 = arith.constant 0 : i32
    return %c0_i32, %c0_i32_0 : i32, i32
  }
  func.func @transform_4(%arg0: i32) -> (i32, i32) {
    %c0_i32 = arith.constant 0 : i32
    %c0_i32_0 = arith.constant 0 : i32
    %c0_i32_1 = arith.constant 0 : i32
    return %c0_i32, %c0_i32_0 : i32, i32
  }
  func.func @transform_5(%arg0: i32) -> (i32, i32) {
    %c0_i32 = arith.constant 0 : i32
    %c0_i32_0 = arith.constant 0 : i32
    %c0_i32_1 = arith.constant 0 : i32
    return %c0_i32, %c0_i32_0 : i32, i32
  }
  func.func @transform_6(%arg0: i32) -> (i32, i32) {
    %c0_i32 = arith.constant 0 : i32
    %c0_i32_0 = arith.constant 0 : i32
    %c0_i32_1 = arith.constant 0 : i32
    return %c0_i32, %c0_i32_0 : i32, i32
  }
  func.func @transform_7(%arg0: i32) -> (i32, i32) {
    %c0_i32 = arith.constant 0 : i32
    %c0_i32_0 = arith.constant 0 : i32
    %c0_i32_1 = arith.constant 0 : i32
    return %c0_i32, %c0_i32_0 : i32, i32
  }
  func.func @transform_8(%arg0: i32) -> (i32, i32) {
    %c0_i32 = arith.constant 0 : i32
    %c0_i32_0 = arith.constant 0 : i32
    %c0_i32_1 = arith.constant 0 : i32
    return %c0_i32, %c0_i32_0 : i32, i32
  }
  func.func @transform_9(%arg0: i32) -> (i32, i32, i32, i32) {
    %c0_i32 = arith.constant 0 : i32
    %c0_i32_0 = arith.constant 0 : i32
    %c0_i32_1 = arith.constant 0 : i32
    %c0_i32_2 = arith.constant 0 : i32
    return %arg0, %c0_i32, %c0_i32_0, %c0_i32_1 : i32, i32, i32, i32
  }
}

</mosaic_0001>

<bundles_post_ra>
// kernel: down_forward.1
= control target key start
LH: loop header
LB: loop body
LE: loop exit
PB: predicated region body
PF: predicated region fallthrough
CT: control target
= control target key end

     0   :  { %14 = vsyncpa [#allocation5], 0  ;;  %s6027_s0 = inlined_call_operand.vmem [shape: f32[2,16,16,8], index: 0, kind: input, shape index: {}]   ;;  %s6028_s1 = inlined_call_operand.vmem [shape: bf16[72,16], index: 1, kind: input, shape index: {}]   ;;  %s6029_s2 = inlined_call_operand.vmem [shape: f32[1,16], index: 2, kind: input, shape index: {}]   ;;  %s6030_s3 = inlined_call_operand.vmem [shape: f32[1,16], index: 3, kind: input, shape index: {}]   ;;  %s6031_s4 = inlined_call_operand.vmem [shape: f32[16,16], index: 4, kind: input, shape index: {}]   ;;  %s6032_s5 = inlined_call_operand.vmem [shape: bf16[144,16], index: 5, kind: input, shape index: {}]   ;;  %s6033_s6 = inlined_call_operand.vmem [shape: f32[1,16], index: 6, kind: input, shape index: {}]   ;;  %s6034_s7 = inlined_call_operand.vmem [shape: f32[1,16], index: 7, kind: input, shape index: {}]   ;;  %s6035_s8 = inlined_call_operand.vmem [shape: f32[16,16], index: 8, kind: input, shape index: {}]   ;;  %s6036_s9 = inlined_call_operand.hbm [shape: f32[2,8,8,16], index: 9, kind: output, shape index: {}]  }
   0x1   :  { %16 = vsyncpa [#allocation5 + $0x1], 0  ;;  %s4462_s30 = smov 0   ;;  %s4464_s10 = smov 0  }
   0x2   :  { %s4466_s11 = smov 0   ;;  %s4468_s12 = smov 0  }
   0x3 LB: > { %s4483_s13 = sadd.s32 4294967295, %s4392_s12   ;;  %s4084_s14 = sadd.s32 4294967294, %s4392_s12   ;;  %s4392_s12 = sphi %s4468_s12, %s6045_s12   ;;  %s4388_s11 = sphi %s4466_s11, %s6044_s11   ;;  %s4384_s10 = sphi %s4464_s10, %s6043_s10   ;;  %s4380_s30 = sphi %s4462_s30, %s6042_s30  }
   0x4   : > { %s4487_s15 = sadd.s32 1, %s4392_s12   ;;  %s223_s16 = sadd.s32 1, %s4388_s11 }
   0x5   : > { %s220_s17 = ssub.s32 %s4392_s12, %s4487_s15  ;;  %p233_p0 = scmp.ne.s32.totalorder %s4388_s11, %s4384_s10 }
   0x6   : > { %p221_p1 = scmp.eq.s32.totalorder %s220_s17, 0  ;;  %p234_p2 = scmp.eq.s32.totalorder %s4483_s13, 1 }
   0x7   : > { %p239_p3 = scmp.ne.s32.totalorder %s4384_s10, %s4380_s30  ;;  %p240_p4 = scmp.eq.s32.totalorder %s4084_s14, 1 }
   0x8   : > { %s4498_s18 = scalar_select %p221_p1, %s4388_s11, %s223_s16  }
   0x9   : > { %p4500_p5 = por %p234_p2, %p233_p0  ;;  %p4504_p6 = por %p240_p4, %p239_p3 }
   0xa   : > { %p4087_p7 = scmp.ge.s32.totalorder %s4392_s12, 1  ;;  %p290_p8 = scmp.lt.s32.totalorder %s4392_s12, 3 }
   0xc   : > { %p291_p9 = pnand %p4087_p7, %p290_p8 }
   0xd   : > { %vm1068_vm0 = vcmask (!%p291_p9), 58368   ;;  %vm2042_vm1 = vcmask (!%p291_p9), 64512   ;;  %v400_v0 = vlaneseq (!%p291_p9)  ;;  %v4394_v1 = vmov (!%p291_p9), 0.0   ;;  %p326_p10 = scmp.lt.s32.totalorder (!%p291_p9), %s4483_s13, 1  ;;  %s4396_s26 = smov (!%p291_p9), 8  }
   0xe   : > { %294 = sbr.rel (%p291_p9) target bundleno = 2182 (0x886), region = 56  ;;  %2043 = vst.msk [vmem:[#allocation2] sm:$0xff] (!%p291_p9), %vm2042_vm1, %v4394_v1  ;;  %2045 = vst.msk [vmem:[#allocation2 + $0x10] sm:$0xff] (!%p291_p9), %vm2042_vm1, %v4394_v1  ;;  %v4395_v2 = vmov (!%p291_p9), 1983009808   ;;  %s4397_s27 = smov (!%p291_p9), 16  }
   0xf   : > { %2044 = vst.msk [vmem:[#allocation2 + $0x8] sm:$0x3] (!%p291_p9), %vm1068_vm0, %v4394_v1  ;;  %2046 = vst.msk [vmem:[#allocation2 + $0x18] sm:$0x3] (!%p291_p9), %vm1068_vm0, %v4394_v1  ;;  %v398_v3 = vunpack.c.l.s4 (!%p291_p9), %v4395_v2  ;;  %v4551_v4 = vshrl.u32 (!%p291_p9), %v400_v0, 7  ;;  %vm2127_vm2 = vcmask (!%p291_p9), 1041409  }
  0x10   : > { %2047 = vst.msk [vmem:[#allocation2 + $0x20] sm:$0xff] (!%p291_p9), %vm2042_vm1, %v4394_v1  ;;  %2049 = vst.msk [vmem:[#allocation2 + $0x30] sm:$0xff] (!%p291_p9), %vm2042_vm1, %v4394_v1  ;;  %vm2129_vm3 = vcmask (!%p291_p9), 1042434   ;;  %vm2131_vm4 = vcmask (!%p291_p9), 1043459   ;;  %vm2133_vm5 = vcmask (!%p291_p9), 1044484   ;;  %vm2135_vm6 = vcmask (!%p291_p9), 1045509  }
  0x11   : > { %2048 = vst.msk [vmem:[#allocation2 + $0x28] sm:$0x3] (!%p291_p9), %vm1068_vm0, %v4394_v1  ;;  %2050 = vst.msk [vmem:[#allocation2 + $0x38] sm:$0x3] (!%p291_p9), %vm1068_vm0, %v4394_v1  ;;  %v399_v5 = vunpack.c.0.s8 (!%p291_p9), %v398_v3  ;;  %vm2137_vm7 = vcmask (!%p291_p9), 1046534   ;;  %vm2139_vm8 = vcmask (!%p291_p9), 1047559  }
  0x12   : > { %2051 = vst.msk [vmem:[#allocation2 + $0x40] sm:$0xff] (!%p291_p9), %vm2042_vm1, %v4394_v1  ;;  %2053 = vst.msk [vmem:[#allocation2 + $0x50] sm:$0xff] (!%p291_p9), %vm2042_vm1, %v4394_v1  ;;  %s4398_s28 = smov (!%p291_p9), 24   ;;  %s4399_s29 = smov (!%p291_p9), 32   ;;  %vm2568_vm9 = vcmask (!%p291_p9), 130048   ;;  %vm2747_vm10 = vcmask (!%p291_p9), 1043456  }
  0x13   : > { %2052 = vst.msk [vmem:[#allocation2 + $0x48] sm:$0x3] (!%p291_p9), %vm1068_vm0, %v4394_v1  ;;  %2054 = vst.msk [vmem:[#allocation2 + $0x58] sm:$0x3] (!%p291_p9), %vm1068_vm0, %v4394_v1  ;;  %v4560_v6 = vsub.s32 (!%p291_p9), %v399_v5, %v4551_v4  ;;  %s4400_s14 = smov (!%p291_p9), 40   ;;  %s4401_s16 = smov (!%p291_p9), 48  }
  0x14   : > { %2055 = vst.msk [vmem:[#allocation2 + $0x60] sm:$0xff] (!%p291_p9), %vm2042_vm1, %v4394_v1  ;;  %2057 = vst.msk [vmem:[#allocation2 + $0x70] sm:$0xff] (!%p291_p9), %vm2042_vm1, %v4394_v1  ;;  %s4402_s17 = smov (!%p291_p9), 56   ;;  %vm2585_vm11 = vcmask (!%p291_p9), 195584   ;;  %vm2602_vm12 = vcmask (!%p291_p9), 261120   ;;  %vm2619_vm13 = vcmask (!%p291_p9), 326656  }
  0x15   : > { %2056 = vst.msk [vmem:[#allocation2 + $0x68] sm:$0x3] %vm1068_vm0, %v4394_v1  ;;  %2058 = vst.msk [vmem:[#allocation2 + $0x78] sm:$0x3] %vm1068_vm0, %v4394_v1  ;;  %s327_s21 = scalar_select %p326_p10, %s4483_s13, 1  ;;  %vm2636_vm14 = vcmask 392192  }
  0x16   : > { %2059 = vst.msk [vmem:[#allocation2 + $0x80] sm:$0xff] %vm2042_vm1, %v4394_v1  ;;  %2061 = vst.msk [vmem:[#allocation2 + $0x90] sm:$0xff] %vm2042_vm1, %v4394_v1  ;;  %v2223_v10 = vld [vmem:[#allocation2 + $0x1] sm:$0xff]  ;;  %vm2653_vm15 = vcmask 457728   ;;  %s4406_s24 = smov 96   ;;  %s4409_s23 = smov 112  }
  0x17   : > { %2060 = vst.msk [vmem:[#allocation2 + $0x88] sm:$0x3] %vm1068_vm0, %v4394_v1  ;;  %2062 = vst.msk [vmem:[#allocation2 + $0x98] sm:$0x3] %vm1068_vm0, %v4394_v1  ;;  %s4138_s22 = sshll.u32 %s327_s21, 8  ;;  %v2239_v11 = vld [vmem:[#allocation2 + $0x2] sm:$0xff]  ;;  %v2231_v17 = vpack.c.bf16 %v2223_v10, %v2223_v10 }
  0x18   : > { %s4557_s25 = scalar_lea.vmem %s6027_s0, %s4138_s22  ;;  %v2247_v18 = vpack.c.bf16 %v2239_v11, %v2239_v11  ;;  %s6037_s21 = smov 64   ;;  %3099 = vst.msk [vmem:[#allocation3] sm:$0xff] %vm2568_vm9, %v4394_v1  ;;  %3102 = vst.msk [vmem:[#allocation3 + $0x10] sm:$0xff] %vm2568_vm9, %v4394_v1 }
  0x19   : > { %v336_v7 = vld [vmem:[%s4557_s25 + $0x20] sm:$0xff]  ;;  %v337_v8 = vld [vmem:[%s4557_s25 + $0x28] sm:$0xff]  ;;  %v338_v9 = vld [vmem:[%s4557_s25 + $0x30] sm:$0xff]  ;;  %2360 = vrot.lane.b32.xlu0 %v2231_v17, %s4396_s26  ;;  %3104 = vst.msk [vmem:[#allocation3 + $0x20] sm:$0xff] %vm2568_vm9, %v4394_v1 }
  0x1a   : > { %v339_v12 = vld [vmem:[%s4557_s25 + $0x38] sm:$0xff]  ;;  %v464_v13 = vcombine.high %v336_v7, %v336_v7  ;;  %v471_v14 = vrot.slane %v336_v7, %v4560_v6  ;;  %v481_v15 = vcombine.high %v337_v8, %v337_v8  ;;  %v488_v16 = vrot.slane %v337_v8, %v4560_v6  ;;  %3106 = vst.msk [vmem:[#allocation3 + $0x30] sm:$0xff] %vm2568_vm9, %v4394_v1 }
  0x1b   : > { %v498_v19 = vcombine.high %v338_v9, %v338_v9  ;;  %v4569_v20 = vrot.slane %v338_v9, %v4560_v6  ;;  %v515_v27 = vcombine.high %v339_v12, %v339_v12  ;;  %v4580_v28 = vrot.slane %v339_v12, %v4560_v6  ;;  %3108 = vst.msk [vmem:[#allocation3 + $0x40] sm:$0xff] %vm2568_vm9, %v4394_v1 }
  0x1c   : > { %v478_v21 = vrot.slane %v464_v13, %v4560_v6  ;;  %v479_v22 = vcombine.high %v471_v14, %v471_v14  ;;  %v495_v23 = vrot.slane %v481_v15, %v4560_v6  ;;  %v496_v24 = vcombine.high %v488_v16, %v488_v16  ;;  %3110 = vst.msk [vmem:[#allocation3 + $0x50] sm:$0xff] %vm2568_vm9, %v4394_v1 }
  0x1d   : > { %v4575_v25 = vrot.slane %v498_v19, %v4560_v6  ;;  %v513_v26 = vcombine.high %v4569_v20, %v4569_v20  ;;  %v1181_v31 = vsel %vm1068_vm0, %v471_v14, -inf  ;;  %v4587_v34 = vrot.slane %v515_v27, %v4560_v6  ;;  %2384 = vrot.lane.b32.xlu0 %v2247_v18, %s4397_s27  ;;  %3112 = vst.msk [vmem:[#allocation3 + $0x60] sm:$0xff] %vm2568_vm9, %v4394_v1 }
  0x1e   : > { %v480_v29 = vcombine.high %v478_v21, %v478_v21  ;;  %v497_v30 = vcombine.high %v495_v23, %v495_v23  ;;  %v1188_v32 = vsel %vm1068_vm0, %v479_v22, -inf  ;;  %v530_v35 = vcombine.high %v4580_v28, %v4580_v28  ;;  %3114 = vst.msk [vmem:[#allocation3 + $0x70] sm:$0xff] %vm2568_vm9, %v4394_v1  ;;  %3116 = vst.msk [vmem:[#allocation3 + $0x80] sm:$0xff] %vm2568_vm9, %v4394_v1 }
  0x1f   : > { %v514_v33 = vcombine.high %v4575_v25, %v4575_v25  ;;  %v1182_v36 = vrot.slane %v1181_v31, 4  ;;  %v1189_v37 = vrot.slane %v1188_v32, 4  ;;  %v1195_v38 = vsel %vm1068_vm0, %v478_v21, -inf  ;;  %3118 = vst.msk [vmem:[#allocation3 + $0x90] sm:$0xff] %vm2568_vm9, %v4394_v1 }
  0x20   : > { %v1202_v39 = vsel %vm1068_vm0, %v480_v29, -inf  ;;  %v1209_v40 = vsel %vm1068_vm0, %v488_v16, -inf  ;;  %v531_v41 = vcombine.high %v4587_v34, %v4587_v34  ;;  %v1196_v43 = vrot.slane %v1195_v38, 4 }
  0x21   : > { %v1183_v42 = vmax.f32 %v1181_v31, %v1182_v36  ;;  %v1203_v44 = vrot.slane %v1202_v39, 4  ;;  %v1190_v45 = vmax.f32 %v1188_v32, %v1189_v37  ;;  %v1210_v46 = vrot.slane %v1209_v40, 4 }
  0x22   : > { %v1216_v47 = vsel %vm1068_vm0, %v496_v24, -inf  ;;  %v1223_v48 = vsel %vm1068_vm0, %v495_v23, -inf  ;;  %v1197_v50 = vmax.f32 %v1195_v38, %v1196_v43  ;;  %v1230_v56 = vsel %vm1068_vm0, %v497_v30, -inf }
  0x23   : > { %v1184_v49 = vrot.slane %v1183_v42, 2  ;;  %v1204_v51 = vmax.f32 %v1202_v39, %v1203_v44  ;;  %v1217_v52 = vrot.slane %v1216_v47, 4  ;;  %v1191_v53 = vrot.slane %v1190_v45, 2 }
  0x24   : > { %v1211_v54 = vmax.f32 %v1209_v40, %v1210_v46  ;;  %v1224_v55 = vrot.slane %v1223_v48, 4  ;;  %v1198_v58 = vrot.slane %v1197_v50, 2  ;;  %v1231_v0 = vrot.slane %v1230_v56, 4 }
  0x25   : > { %v1185_v57 = vmax.f32 %v1183_v42, %v1184_v49  ;;  %v1205_v59 = vrot.slane %v1204_v51, 2  ;;  %v1218_v60 = vmax.f32 %v1216_v47, %v1217_v52  ;;  %v1192_v61 = vmax.f32 %v1190_v45, %v1191_v53 }
  0x26   : > { %v1212_v62 = vrot.slane %v1211_v54, 2  ;;  %v1225_v63 = vmax.f32 %v1223_v48, %v1224_v55  ;;  %v1199_v3 = vmax.f32 %v1197_v50, %v1198_v58  ;;  %v1232_v11 = vmax.f32 %v1230_v56, %v1231_v0 }
  0x27   : > { %v1186_v2 = vrot.slane %v1185_v57, 1  ;;  %v1206_v5 = vmax.f32 %v1204_v51, %v1205_v59  ;;  %v1219_v7 = vrot.slane %v1218_v60, 2  ;;  %v1193_v8 = vrot.slane %v1192_v61, 1 }
  0x28   : > { %v1213_v9 = vmax.f32 %v1211_v54, %v1212_v62  ;;  %v1226_v10 = vrot.slane %v1225_v63, 2  ;;  %v1200_v13 = vrot.slane %v1199_v3, 1  ;;  %v1233_v19 = vrot.slane %v1232_v11, 2 }
  0x29   : > { %v4600_v12 = vmax.f32 %v1185_v57, %v1186_v2  ;;  %v1207_v14 = vrot.slane %v1206_v5, 1  ;;  %v1220_v15 = vmax.f32 %v1218_v60, %v1219_v7  ;;  %v4602_v16 = vmax.f32 %v1192_v61, %v1193_v8 }
  0x2a   : > { %v1214_v17 = vrot.slane %v1213_v9, 1  ;;  %v1227_v18 = vmax.f32 %v1225_v63, %v1226_v10  ;;  %v4604_v21 = vmax.f32 %v1199_v3, %v1200_v13  ;;  %v1237_v24 = vsel %vm1068_vm0, %v4569_v20, -inf }
  0x2b   : > { %v4606_v22 = vmax.f32 %v1206_v5, %v1207_v14  ;;  %v1221_v23 = vrot.slane %v1220_v15, 1  ;;  %v1234_v30 = vmax.f32 %v1232_v11, %v1233_v19  ;;  %v1238_v31 = vrot.slane %v1237_v24, 4  ;;  %v332_v11 = vld [vmem:[%s4557_s25] sm:$0xff] }
  0x2c   : > { %v4610_v27 = vmax.f32 %v1213_v9, %v1214_v17  ;;  %v1228_v29 = vrot.slane %v1227_v18, 1  ;;  %v1244_v36 = vsel %vm1068_vm0, %v513_v26, -inf  ;;  %v1251_v37 = vsel %vm1068_vm0, %v4575_v25, -inf }
  0x2d   : > { %v4612_v32 = vmax.f32 %v1220_v15, %v1221_v23  ;;  %v1258_v38 = vsel %vm1068_vm0, %v514_v33, -inf  ;;  %v1235_v40 = vrot.slane %v1234_v30, 1  ;;  %v1239_v42 = vmax.f32 %v1237_v24, %v1238_v31 }
  0x2e   : > { %v4621_v39 = vmax.f32 %v1227_v18, %v1228_v29  ;;  %v1245_v43 = vrot.slane %v1244_v36, 4  ;;  %v1252_v44 = vrot.slane %v1251_v37, 4  ;;  %v1259_v45 = vrot.slane %v1258_v38, 4 }
  0x2f   : > { %v1265_v46 = vsel %vm1068_vm0, %v4580_v28, -inf  ;;  %v1272_v20 = vsel %vm1068_vm0, %v530_v35, -inf  ;;  %v4629_v26 = vmax.f32 %v1234_v30, %v1235_v40  ;;  %v1240_v25 = vrot.slane %v1239_v42, 2 }
  0x30   : > { %v1246_v47 = vmax.f32 %v1244_v36, %v1245_v43  ;;  %v1266_v33 = vrot.slane %v1265_v46, 4  ;;  %v1253_v48 = vmax.f32 %v1251_v37, %v1252_v44  ;;  %v1260_v49 = vmax.f32 %v1258_v38, %v1259_v45  ;;  %v333_v43 = vld [vmem:[%s4557_s25 + $0x8] sm:$0xff] }
  0x31   : > { %v1273_v50 = vrot.slane %v1272_v20, 4  ;;  %v1279_v51 = vsel %vm1068_vm0, %v4587_v34, -inf  ;;  %v1241_v52 = vmax.f32 %v1239_v42, %v1240_v25  ;;  %v1286_v57 = vsel %vm1068_vm0, %v531_v41, -inf }
  0x32   : > { %v1247_v53 = vrot.slane %v1246_v47, 2  ;;  %v1267_v54 = vmax.f32 %v1265_v46, %v1266_v33  ;;  %v1280_v55 = vrot.slane %v1279_v51, 4  ;;  %v1254_v28 = vrot.slane %v1253_v48, 2 }
  0x33   : > { %v1261_v56 = vrot.slane %v1260_v49, 2  ;;  %v1274_v35 = vmax.f32 %v1272_v20, %v1273_v50  ;;  %v1242_v58 = vrot.slane %v1241_v52, 1  ;;  %v1287_v2 = vrot.slane %v1286_v57, 4 }
  0x34   : > { %v1248_v59 = vmax.f32 %v1246_v47, %v1247_v53  ;;  %v1268_v60 = vrot.slane %v1267_v54, 2  ;;  %v1281_v61 = vmax.f32 %v1279_v51, %v1280_v55  ;;  %v1255_v62 = vmax.f32 %v1253_v48, %v1254_v28  ;;  %v334_v47 = vld [vmem:[%s4557_s25 + $0x10] sm:$0xff]  ;;  %v335_v48 = vld [vmem:[%s4557_s25 + $0x18] sm:$0xff] }
  0x35   : > { %v1262_v63 = vmax.f32 %v1260_v49, %v1261_v56  ;;  %v1275_v0 = vrot.slane %v1274_v35, 2  ;;  %v1243_v3 = vmax.f32 %v1241_v52, %v1242_v58  ;;  %v1288_v10 = vmax.f32 %v1286_v57, %v1287_v2 }
  0x36   : > { %v1249_v5 = vrot.slane %v1248_v59, 1  ;;  %v1269_v7 = vmax.f32 %v1267_v54, %v1268_v60  ;;  %v1282_v8 = vrot.slane %v1281_v61, 2  ;;  %v1256_v34 = vrot.slane %v1255_v62, 1 }
  0x37   : > { %v1263_v9 = vrot.slane %v1262_v63, 1  ;;  %v1276_v41 = vmax.f32 %v1274_v35, %v1275_v0  ;;  %v1973_v17 = vmax.f32 %v4600_v12, %v1243_v3  ;;  %v1289_v24 = vrot.slane %v1288_v10, 2 }
  0x38   : > { %v1250_v13 = vmax.f32 %v1248_v59, %v1249_v5  ;;  %v1270_v14 = vrot.slane %v1269_v7, 1  ;;  %v1283_v15 = vmax.f32 %v1281_v61, %v1282_v8  ;;  %v1257_v18 = vmax.f32 %v1255_v62, %v1256_v34 }
  0x39   : > { %v1264_v19 = vmax.f32 %v1262_v63, %v1263_v9  ;;  %v1277_v23 = vrot.slane %v1276_v41, 1  ;;  %v396_v36 = vcombine.high %v332_v11, %v332_v11  ;;  %v1290_v38 = vmax.f32 %v1288_v10, %v1289_v24 }
  0x3a   : > { %v1271_v29 = vmax.f32 %v1269_v7, %v1270_v14  ;;  %v1284_v30 = vrot.slane %v1283_v15, 1  ;;  %v1974_v31 = vmax.f32 %v4602_v16, %v1250_v13  ;;  %v1975_v40 = vmax.f32 %v4604_v21, %v1257_v18 }
  0x3b   : > { %v1278_v37 = vmax.f32 %v1276_v41, %v1277_v23  ;;  %v1976_v42 = vmax.f32 %v4606_v22, %v1264_v19  ;;  %v403_v46 = vrot.slane %v332_v11, %v4560_v6  ;;  %v1291_v20 = vrot.slane %v1290_v38, 1 }
  0x3c   : > { %v1285_v12 = vmax.f32 %v1283_v15, %v1284_v30  ;;  %v1977_v44 = vmax.f32 %v4610_v27, %v1271_v29  ;;  %v2141_v45 = vsel %vm2127_vm2, %v1974_v31, %v1973_v17  ;;  %v410_v33 = vrot.slane %v396_v36, %v4560_v6 }
  0x3d   : > { %v1978_v25 = vmax.f32 %v4612_v32, %v1278_v37  ;;  %v2142_v16 = vsel %vm2129_vm3, %v1975_v40, %v2141_v45  ;;  %v411_v49 = vcombine.high %v403_v46, %v403_v46  ;;  %v413_v50 = vcombine.high %v333_v43, %v333_v43 }
  0x3e   : > { %v1979_v21 = vmax.f32 %v4621_v39, %v1285_v12  ;;  %v2143_v22 = vsel %vm2131_vm4, %v1976_v42, %v2142_v16  ;;  %v1292_v27 = vmax.f32 %v1290_v38, %v1291_v20  ;;  %v412_v52 = vcombine.high %v410_v33, %v410_v33 }
  0x3f   : > { %v2144_v51 = vsel %vm2133_vm5, %v1977_v44, %v2143_v22  ;;  %v420_v53 = vrot.slane %v333_v43, %v4560_v6  ;;  %v427_v54 = vrot.slane %v413_v50, %v4560_v6  ;;  %v430_v55 = vcombine.high %v334_v47, %v334_v47 }
  0x40   : > { %v2145_v32 = vsel %vm2135_vm6, %v1978_v25, %v2144_v51  ;;  %v4658_v28 = vrot.slane %v334_v47, %v4560_v6  ;;  %v1980_v39 = vmax.f32 %v4629_v26, %v1292_v27  ;;  %v447_v57 = vcombine.high %v335_v48, %v335_v48 }
  0x41   : > { %v2146_v56 = vsel %vm2137_vm7, %v1979_v21, %v2145_v32  ;;  %v428_v35 = vcombine.high %v420_v53, %v420_v53  ;;  %v429_v58 = vcombine.high %v427_v54, %v427_v54  ;;  %v4663_v59 = vrot.slane %v430_v55, %v4560_v6 }
  0x42   : > { %v445_v60 = vcombine.high %v4658_v28, %v4658_v28  ;;  %v4668_v61 = vrot.slane %v335_v48, %v4560_v6  ;;  %v2147_v62 = vsel %vm2139_vm8, %v1980_v39, %v2146_v56  ;;  %v4672_v63 = vrot.slane %v447_v57, %v4560_v6 }
  0x43   : > { %v1069_v26 = vsel %vm1068_vm0, %v403_v46, -inf  ;;  %v1076_v0 = vsel %vm1068_vm0, %v411_v49, -inf  ;;  %2200 = vst.msk [vmem:[#allocation2 + $0x21] sm:$0xff] %vm2042_vm1, %v2147_v62  ;;  %v446_v2 = vcombine.high %v4663_v59, %v4663_v59  ;;  %v1083_v34 = vsel %vm1068_vm0, %v410_v33, -inf }
  0x44   : > { %v462_v3 = vcombine.high %v4668_v61, %v4668_v61  ;;  %v1070_v5 = vrot.slane %v1069_v26, 4  ;;  %v1077_v7 = vrot.slane %v1076_v0, 4  ;;  %v463_v8 = vcombine.high %v4672_v63, %v4672_v63 }
  0x45   : > { %v1090_v9 = vsel %vm1068_vm0, %v412_v52, -inf  ;;  %v1097_v41 = vsel %vm1068_vm0, %v420_v53, -inf  ;;  %v1084_v13 = vrot.slane %v1083_v34, 4  ;;  %v1104_v17 = vsel %vm1068_vm0, %v428_v35, -inf }
  0x46   : > { %v1071_v10 = vmax.f32 %v1069_v26, %v1070_v5  ;;  %v1078_v11 = vmax.f32 %v1076_v0, %v1077_v7  ;;  %v1091_v14 = vrot.slane %v1090_v9, 4  ;;  %v1098_v15 = vrot.slane %v1097_v41, 4 }
  0x47   : > { %v1111_v18 = vsel %vm1068_vm0, %v427_v54, -inf  ;;  %v1118_v19 = vsel %vm1068_vm0, %v429_v58, -inf  ;;  %v1085_v29 = vmax.f32 %v1083_v34, %v1084_v13  ;;  %v1105_v36 = vrot.slane %v1104_v17, 4 }
  0x48   : > { %v1072_v23 = vrot.slane %v1071_v10, 2  ;;  %v1079_v24 = vrot.slane %v1078_v11, 2  ;;  %v1092_v30 = vmax.f32 %v1090_v9, %v1091_v14  ;;  %v1099_v31 = vmax.f32 %v1097_v41, %v1098_v15 }
  0x49   : > { %v1112_v37 = vrot.slane %v1111_v18, 4  ;;  %v1119_v38 = vrot.slane %v1118_v19, 4  ;;  %v1086_v43 = vrot.slane %v1085_v29, 2  ;;  %v1106_v46 = vmax.f32 %v1104_v17, %v1105_v36 }
  0x4a   : > { %v1073_v40 = vmax.f32 %v1071_v10, %v1072_v23  ;;  %v1080_v42 = vmax.f32 %v1078_v11, %v1079_v24  ;;  %v1093_v12 = vrot.slane %v1092_v30, 2  ;;  %v2225_v44 = vld [vmem:[#allocation2 + $0x21] sm:$0xff]  ;;  %v1100_v45 = vrot.slane %v1099_v31, 2 }
  0x4b   : > { %v1113_v20 = vmax.f32 %v1111_v18, %v1112_v37  ;;  %v1120_v25 = vmax.f32 %v1118_v19, %v1119_v38  ;;  %v4689_v16 = vpack.c.bf16 %v2225_v44, %v2225_v44  ;;  %v1087_v21 = vmax.f32 %v1085_v29, %v1086_v43 }
  0x4c   : > { %v1074_v47 = vrot.slane %v1073_v40, 1  ;;  %v1081_v33 = vrot.slane %v1080_v42, 1  ;;  %v1094_v22 = vmax.f32 %v1092_v30, %v1093_v12  ;;  %v1101_v48 = vmax.f32 %v1099_v31, %v1100_v45 }
  0x4d   : > { %v1107_v49 = vrot.slane %v1106_v46, 2  ;;  %v1114_v50 = vrot.slane %v1113_v20, 2  ;;  %2364 = vrot.lane.b32.xlu1 %v4689_v16, %s4396_s26  ;;  %v1088_v52 = vrot.slane %v1087_v21, 1  ;;  %v1121_v53 = vrot.slane %v1120_v25, 2 }
  0x4e   : > { %v4693_v27 = vmax.f32 %v1073_v40, %v1074_v47  ;;  %v4695_v51 = vmax.f32 %v1080_v42, %v1081_v33  ;;  %v1095_v32 = vrot.slane %v1094_v22, 1  ;;  %v1102_v54 = vrot.slane %v1101_v48, 1 }
  0x4f   : > { %v1108_v55 = vmax.f32 %v1106_v46, %v1107_v49  ;;  %v1115_v39 = vmax.f32 %v1113_v20, %v1114_v50  ;;  %v4697_v56 = vmax.f32 %v1087_v21, %v1088_v52  ;;  %v1122_v35 = vmax.f32 %v1120_v25, %v1121_v53 }
  0x50   : > { %v1125_v57 = vsel %vm1068_vm0, %v4658_v28, -inf  ;;  %v1132_v58 = vsel %vm1068_vm0, %v445_v60, -inf  ;;  %v4702_v62 = vmax.f32 %v1094_v22, %v1095_v32  ;;  %v4704_v26 = vmax.f32 %v1101_v48, %v1102_v54 }
  0x51   : > { %v1109_v0 = vrot.slane %v1108_v55, 1  ;;  %v1116_v5 = vrot.slane %v1115_v39, 1  ;;  %v1123_v7 = vrot.slane %v1122_v35, 1  ;;  %v1126_v34 = vrot.slane %v1125_v57, 4 }
  0x52   : > { %v1133_v9 = vrot.slane %v1132_v58, 4  ;;  %v1139_v41 = vsel %vm1068_vm0, %v4663_v59, -inf  ;;  %v1146_v28 = vsel %vm1068_vm0, %v446_v2, -inf  ;;  %v1153_v19 = vsel %vm1068_vm0, %v4668_v61, -inf }
  0x53   : > { %v4708_v10 = vmax.f32 %v1108_v55, %v1109_v0  ;;  %v4710_v11 = vmax.f32 %v1115_v39, %v1116_v5  ;;  %v1140_v13 = vrot.slane %v1139_v41, 4  ;;  %v4716_v60 = vmax.f32 %v1122_v35, %v1123_v7  ;;  %v340_v55 = vld [vmem:[%s4557_s25 + $0x40] sm:$0xff] }
  0x54   : > { %v1127_v14 = vmax.f32 %v1125_v57, %v1126_v34  ;;  %v1134_v15 = vmax.f32 %v1132_v58, %v1133_v9  ;;  %v1147_v17 = vrot.slane %v1146_v28, 4  ;;  %v1160_v23 = vsel %vm1068_vm0, %v462_v3, -inf }
  0x55   : > { %v1141_v18 = vmax.f32 %v1139_v41, %v1140_v13  ;;  %v1167_v24 = vsel %vm1068_vm0, %v4672_v63, -inf  ;;  %v1154_v30 = vrot.slane %v1153_v19, 4  ;;  %v1161_v36 = vrot.slane %v1160_v23, 4 }
  0x56   : > { %v1128_v59 = vrot.slane %v1127_v14, 2  ;;  %v1135_v29 = vrot.slane %v1134_v15, 2  ;;  %v1148_v2 = vmax.f32 %v1146_v28, %v1147_v17  ;;  %v1168_v37 = vrot.slane %v1167_v24, 4  ;;  %v341_v28 = vld [vmem:[%s4557_s25 + $0x48] sm:$0xff] }
  0x57   : > { %v1142_v31 = vrot.slane %v1141_v18, 2  ;;  %v1174_v38 = vsel %vm1068_vm0, %v463_v8, -inf  ;;  %v1155_v43 = vmax.f32 %v1153_v19, %v1154_v30  ;;  %v1162_v12 = vmax.f32 %v1160_v23, %v1161_v36  ;;  %v342_v23 = vld [vmem:[%s4557_s25 + $0x50] sm:$0xff] }
  0x58   : > { %v1129_v40 = vmax.f32 %v1127_v14, %v1128_v59  ;;  %v1136_v42 = vmax.f32 %v1134_v15, %v1135_v29  ;;  %v1149_v61 = vrot.slane %v1148_v2, 2  ;;  %v1169_v44 = vmax.f32 %v1167_v24, %v1168_v37 }
  0x59   : > { %v1143_v3 = vmax.f32 %v1141_v18, %v1142_v31  ;;  %v1175_v45 = vrot.slane %v1174_v38, 4  ;;  %v1156_v47 = vrot.slane %v1155_v43, 2  ;;  %v1163_v21 = vrot.slane %v1162_v12, 2 }
  0x5a   : > { %v1130_v46 = vrot.slane %v1129_v40, 1  ;;  %v1137_v20 = vrot.slane %v1136_v42, 1  ;;  %v1150_v25 = vmax.f32 %v1148_v2, %v1149_v61  ;;  %v1170_v22 = vrot.slane %v1169_v44, 2  ;;  %v343_v2 = vld [vmem:[%s4557_s25 + $0x58] sm:$0xff] }
  0x5b   : > { %v1144_v33 = vrot.slane %v1143_v3, 1  ;;  %v1176_v48 = vmax.f32 %v1174_v38, %v1175_v45  ;;  %v1157_v50 = vmax.f32 %v1155_v43, %v1156_v47  ;;  %v1164_v53 = vmax.f32 %v1162_v12, %v1163_v21 }
  0x5c   : > { %v1131_v63 = vmax.f32 %v1129_v40, %v1130_v46  ;;  %v1138_v49 = vmax.f32 %v1136_v42, %v1137_v20  ;;  %v1151_v8 = vrot.slane %v1150_v25, 1  ;;  %v1171_v32 = vmax.f32 %v1169_v44, %v1170_v22 }
  0x5d   : > { %v1145_v52 = vmax.f32 %v1143_v3, %v1144_v33  ;;  %v1177_v54 = vrot.slane %v1176_v48, 2  ;;  %v1158_v35 = vrot.slane %v1157_v50, 1  ;;  %v1165_v0 = vrot.slane %v1164_v53, 1 }
  0x5e   : > { %v1152_v39 = vmax.f32 %v1150_v25, %v1151_v8  ;;  %v1965_v57 = vmax.f32 %v4693_v27, %v1131_v63  ;;  %v1966_v58 = vmax.f32 %v4695_v51, %v1138_v49  ;;  %v1172_v5 = vrot.slane %v1171_v32, 1 }
  0x5f   : > { %v1178_v7 = vmax.f32 %v1176_v48, %v1177_v54  ;;  %v1967_v34 = vmax.f32 %v4697_v56, %v1145_v52  ;;  %v1159_v9 = vmax.f32 %v1157_v50, %v1158_v35  ;;  %v532_v14 = vcombine.high %v340_v55, %v340_v55 }
  0x60   : > { %v1968_v41 = vmax.f32 %v4702_v62, %v1152_v39  ;;  %v2128_v13 = vsel %vm2127_vm2, %v1966_v58, %v1965_v57  ;;  %v1166_v15 = vmax.f32 %v1164_v53, %v1165_v0  ;;  %v1173_v17 = vmax.f32 %v1171_v32, %v1172_v5 }
  0x61   : > { %v1179_v18 = vrot.slane %v1178_v7, 1  ;;  %v2130_v27 = vsel %vm2129_vm3, %v1967_v34, %v2128_v13  ;;  %v1969_v51 = vmax.f32 %v4704_v26, %v1159_v9  ;;  %v539_v56 = vrot.slane %v340_v55, %v4560_v6 }
  0x62   : > { %v2132_v19 = vsel %vm2131_vm4, %v1968_v41, %v2130_v27  ;;  %v546_v24 = vrot.slane %v532_v14, %v4560_v6  ;;  %v1970_v59 = vmax.f32 %v4708_v10, %v1166_v15  ;;  %v1971_v29 = vmax.f32 %v4710_v11, %v1173_v17 }
  0x63   : > { %v1180_v62 = vmax.f32 %v1178_v7, %v1179_v18  ;;  %v549_v30 = vcombine.high %v341_v28, %v341_v28  ;;  %v2134_v31 = vsel %vm2133_vm5, %v1969_v51, %v2132_v19  ;;  %v547_v36 = vcombine.high %v539_v56, %v539_v56 }
  0x64   : > { %v548_v37 = vcombine.high %v546_v24, %v546_v24  ;;  %v556_v26 = vrot.slane %v341_v28, %v4560_v6  ;;  %v2136_v40 = vsel %vm2135_vm6, %v1970_v59, %v2134_v31  ;;  %v566_v61 = vcombine.high %v342_v23, %v342_v23 }
  0x65   : > { %v1972_v38 = vmax.f32 %v4716_v60, %v1180_v62  ;;  %v563_v42 = vrot.slane %v549_v30, %v4560_v6  ;;  %v2138_v43 = vsel %vm2137_vm7, %v1971_v29, %v2136_v40  ;;  %v4753_v11 = vrot.slane %v342_v23, %v4560_v6 }
  0x66   : > { %v564_v10 = vcombine.high %v556_v26, %v556_v26  ;;  %v583_v3 = vcombine.high %v343_v2, %v343_v2  ;;  %v4757_v45 = vrot.slane %v566_v61, %v4560_v6  ;;  %v4760_v60 = vrot.slane %v343_v2, %v4560_v6 }
  0x67   : > { %v2140_v12 = vsel %vm2139_vm8, %v1972_v38, %v2138_v43  ;;  %v565_v44 = vcombine.high %v563_v42, %v563_v42  ;;  %v581_v46 = vcombine.high %v4753_v11, %v4753_v11  ;;  %v1293_v25 = vsel %vm1068_vm0, %v539_v56, -inf }
  0x68   : > { %2199 = vst.msk [vmem:[#allocation2 + $0x11] sm:$0xff] %vm2042_vm1, %v2140_v12  ;;  %v4766_v20 = vrot.slane %v583_v3, %v4560_v6  ;;  %v1300_v47 = vsel %vm1068_vm0, %v547_v36, -inf  ;;  %v582_v33 = vcombine.high %v4757_v45, %v4757_v45  ;;  %v598_v21 = vcombine.high %v4760_v60, %v4760_v60 }
  0x69   : > { %v1294_v22 = vrot.slane %v1293_v25, 4  ;;  %v1301_v48 = vrot.slane %v1300_v47, 4  ;;  %v1307_v49 = vsel %vm1068_vm0, %v546_v24, -inf  ;;  %v1314_v8 = vsel %vm1068_vm0, %v548_v37, -inf }
  0x6a   : > { %v599_v63 = vcombine.high %v4766_v20, %v4766_v20  ;;  %v1321_v50 = vsel %vm1068_vm0, %v556_v26, -inf  ;;  %v1308_v32 = vrot.slane %v1307_v49, 4  ;;  %v1315_v54 = vrot.slane %v1314_v8, 4 }
  0x6b   : > { %v1295_v52 = vmax.f32 %v1293_v25, %v1294_v22  ;;  %v1302_v53 = vmax.f32 %v1300_v47, %v1301_v48  ;;  %v1322_v55 = vrot.slane %v1321_v50, 4  ;;  %v1328_v39 = vsel %vm1068_vm0, %v564_v10, -inf }
  0x6c   : > { %v1335_v35 = vsel %vm1068_vm0, %v563_v42, -inf  ;;  %v1342_v57 = vsel %vm1068_vm0, %v565_v44, -inf  ;;  %v1309_v5 = vmax.f32 %v1307_v49, %v1308_v32  ;;  %v1316_v7 = vmax.f32 %v1314_v8, %v1315_v54 }
  0x6d   : > { %v1296_v58 = vrot.slane %v1295_v52, 2  ;;  %v1303_v0 = vrot.slane %v1302_v53, 2  ;;  %v1323_v34 = vmax.f32 %v1321_v50, %v1322_v55  ;;  %v1329_v9 = vrot.slane %v1328_v39, 4 }
  0x6e   : > { %v1336_v41 = vrot.slane %v1335_v35, 4  ;;  %v1343_v13 = vrot.slane %v1342_v57, 4  ;;  %v1310_v17 = vrot.slane %v1309_v5, 2  ;;  %v1317_v18 = vrot.slane %v1316_v7, 2 }
  0x6f   : > { %v2224_v28 = vld [vmem:[#allocation2 + $0x11] sm:$0xff]  ;;  %v1297_v14 = vmax.f32 %v1295_v52, %v1296_v58  ;;  %v1304_v15 = vmax.f32 %v1302_v53, %v1303_v0  ;;  %v1324_v51 = vrot.slane %v1323_v34, 2  ;;  %v1330_v19 = vmax.f32 %v1328_v39, %v1329_v9 }
  0x70   : > { %v4782_v27 = vpack.c.bf16 %v2224_v28, %v2224_v28  ;;  %v1337_v23 = vmax.f32 %v1335_v35, %v1336_v41  ;;  %v1311_v62 = vmax.f32 %v1309_v5, %v1310_v17  ;;  %v1318_v59 = vmax.f32 %v1316_v7, %v1317_v18 }
  0x71   : > { %v1298_v56 = vrot.slane %v1297_v14, 1  ;;  %v1305_v24 = vrot.slane %v1304_v15, 1  ;;  %v1325_v29 = vmax.f32 %v1323_v34, %v1324_v51  ;;  %v1331_v2 = vrot.slane %v1330_v19, 2 }
  0x72   : > { %2362 = vrot.lane.b32.xlu0 %v4782_v27, %s4396_s26  ;;  %v1338_v30 = vrot.slane %v1337_v23, 2  ;;  %v1344_v31 = vmax.f32 %v1342_v57, %v1343_v13  ;;  %v1312_v26 = vrot.slane %v1311_v62, 1  ;;  %v1319_v38 = vrot.slane %v1318_v59, 1 }
  0x73   : > { %v4786_v36 = vmax.f32 %v1297_v14, %v1298_v56  ;;  %v4788_v37 = vmax.f32 %v1304_v15, %v1305_v24  ;;  %v1326_v40 = vrot.slane %v1325_v29, 1  ;;  %v1332_v42 = vmax.f32 %v1330_v19, %v1331_v2 }
  0x74   : > { %v1339_v61 = vmax.f32 %v1337_v23, %v1338_v30  ;;  %v1345_v43 = vrot.slane %v1344_v31, 2  ;;  %v4790_v10 = vmax.f32 %v1311_v62, %v1312_v26  ;;  %v4792_v3 = vmax.f32 %v1318_v59, %v1319_v38 }
  0x75   : > { %v1349_v12 = vsel %vm1068_vm0, %v4753_v11, -inf  ;;  %v1356_v44 = vsel %vm1068_vm0, %v581_v46, -inf  ;;  %v4797_v25 = vmax.f32 %v1325_v29, %v1326_v40  ;;  %v1333_v47 = vrot.slane %v1332_v42, 1 }
  0x76   : > { %v1340_v22 = vrot.slane %v1339_v61, 1  ;;  %v1346_v48 = vmax.f32 %v1344_v31, %v1345_v43  ;;  %v1350_v49 = vrot.slane %v1349_v12, 4  ;;  %v1357_v8 = vrot.slane %v1356_v44, 4  ;;  %v2241_v43 = vld [vmem:[#allocation2 + $0x22] sm:$0xff] }
  0x77   : > { %v1363_v50 = vsel %vm1068_vm0, %v4757_v45, -inf  ;;  %v1370_v52 = vsel %vm1068_vm0, %v582_v33, -inf  ;;  %v4802_v53 = vmax.f32 %v1332_v42, %v1333_v47  ;;  %v1377_v35 = vsel %vm1068_vm0, %v4760_v60, -inf }
  0x78   : > { %v4804_v32 = vmax.f32 %v1339_v61, %v1340_v22  ;;  %v1347_v54 = vrot.slane %v1346_v48, 1  ;;  %v1364_v11 = vrot.slane %v1363_v50, 4  ;;  %v1351_v55 = vmax.f32 %v1349_v12, %v1350_v49 }
  0x79   : > { %v1358_v46 = vmax.f32 %v1356_v44, %v1357_v8  ;;  %v1371_v39 = vrot.slane %v1370_v52, 4  ;;  %v1378_v0 = vrot.slane %v1377_v35, 4  ;;  %v1384_v45 = vsel %vm1068_vm0, %v598_v21, -inf }
  0x7a   : > { %v4808_v57 = vmax.f32 %v1346_v48, %v1347_v54  ;;  %v1365_v58 = vmax.f32 %v1363_v50, %v1364_v11  ;;  %v1352_v33 = vrot.slane %v1351_v55, 2  ;;  %v1385_v34 = vrot.slane %v1384_v45, 4  ;;  %v2255_v54 = vld [vmem:[#allocation2 + $0x10] sm:$0xff] }
  0x7b   : > { %v1359_v5 = vrot.slane %v1358_v46, 2  ;;  %v1372_v7 = vmax.f32 %v1370_v52, %v1371_v39  ;;  %v1379_v41 = vmax.f32 %v1377_v35, %v1378_v0  ;;  %v1391_v13 = vsel %vm1068_vm0, %v4766_v20, -inf  ;;  %v2240_v52 = vld [vmem:[#allocation2 + $0x12] sm:$0xff] }
  0x7c   : > { %v1366_v9 = vrot.slane %v1365_v58, 2  ;;  %v1398_v28 = vsel %vm1068_vm0, %v599_v63, -inf  ;;  %v1353_v14 = vmax.f32 %v1351_v55, %v1352_v33  ;;  %v1386_v60 = vmax.f32 %v1384_v45, %v1385_v34  ;;  %v344_v45 = vld [vmem:[%s4557_s25 + $0x60] sm:$0xff]  ;;  %v346_v34 = vld [vmem:[%s4557_s25 + $0x70] sm:$0xff] }
  0x7d   : > { %v1360_v15 = vmax.f32 %v1358_v46, %v1359_v5  ;;  %v1373_v17 = vrot.slane %v1372_v7, 2  ;;  %v1380_v21 = vrot.slane %v1379_v41, 2  ;;  %v1392_v51 = vrot.slane %v1391_v13, 4 }
  0x7e   : > { %v1367_v18 = vmax.f32 %v1365_v58, %v1366_v9  ;;  %v1399_v19 = vrot.slane %v1398_v28, 4  ;;  %v1354_v23 = vrot.slane %v1353_v14, 1  ;;  %v1387_v62 = vrot.slane %v1386_v60, 2 }
  0x7f   : > { %v1361_v56 = vrot.slane %v1360_v15, 1  ;;  %v1374_v24 = vmax.f32 %v1372_v7, %v1373_v17  ;;  %v1381_v29 = vmax.f32 %v1379_v41, %v1380_v21  ;;  %v1393_v2 = vmax.f32 %v1391_v13, %v1392_v51 }
  0x80   : > { %v1368_v59 = vrot.slane %v1367_v18, 1  ;;  %v1400_v30 = vmax.f32 %v1398_v28, %v1399_v19  ;;  %v1355_v31 = vmax.f32 %v1353_v14, %v1354_v23  ;;  %v1388_v63 = vmax.f32 %v1386_v60, %v1387_v62  ;;  %v347_v14 = vld [vmem:[%s4557_s25 + $0x78] sm:$0xff] }
  0x81   : > { %v1362_v20 = vmax.f32 %v1360_v15, %v1361_v56  ;;  %v1375_v26 = vrot.slane %v1374_v24, 1  ;;  %v1382_v40 = vrot.slane %v1381_v29, 1  ;;  %v1394_v42 = vrot.slane %v1393_v2, 2 }
  0x82   : > { %v1369_v38 = vmax.f32 %v1367_v18, %v1368_v59  ;;  %v1401_v61 = vrot.slane %v1400_v30, 2  ;;  %v1389_v44 = vrot.slane %v1388_v63, 1  ;;  %v1981_v47 = vmax.f32 %v4786_v36, %v1355_v31  ;;  %v2256_v36 = vld [vmem:[#allocation2 + $0x20] sm:$0xff] }
  0x83   : > { %v1376_v12 = vmax.f32 %v1374_v24, %v1375_v26  ;;  %v1982_v22 = vmax.f32 %v4788_v37, %v1362_v20  ;;  %v1383_v48 = vmax.f32 %v1381_v29, %v1382_v40  ;;  %v1395_v49 = vmax.f32 %v1393_v2, %v1394_v42 }
  0x84   : > { %v1402_v8 = vmax.f32 %v1400_v30, %v1401_v61  ;;  %v1983_v50 = vmax.f32 %v4790_v10, %v1369_v38  ;;  %v1390_v11 = vmax.f32 %v1388_v63, %v1389_v44  ;;  %v4825_v39 = vpack.c.bf16 %v2241_v43, %v2241_v43  ;;  %v345_v10 = vld [vmem:[%s4557_s25 + $0x68] sm:$0xff] }
  0x85   : > { %v1984_v55 = vmax.f32 %v4792_v3, %v1376_v12  ;;  %v2148_v46 = vsel %vm2127_vm2, %v1982_v22, %v1981_v47  ;;  %v1396_v35 = vrot.slane %v1395_v49, 1  ;;  %v1985_v58 = vmax.f32 %v4797_v25, %v1383_v48 }
  0x86   : > { %v1403_v37 = vrot.slane %v1402_v8, 1  ;;  %v2149_v0 = vsel %vm2129_vm3, %v1983_v50, %v2148_v46  ;;  %v1986_v33 = vmax.f32 %v4802_v53, %v1390_v11  ;;  %2388 = vrot.lane.b32.xlu0 %v4825_v39, %s4397_s27  ;;  %v4835_v3 = vpack.c.bf16 %v2240_v52, %v2240_v52 }
  0x87   : > { %v2150_v5 = vsel %vm2131_vm4, %v1984_v55, %v2149_v0  ;;  %v2263_v7 = vpack.c.bf16 %v2255_v54, %v2255_v54  ;;  %v1397_v9 = vmax.f32 %v1395_v49, %v1396_v35  ;;  %v4839_v25 = vpack.c.bf16 %v2256_v36, %v2256_v36 }
  0x88   : > { %v1404_v41 = vmax.f32 %v1402_v8, %v1403_v37  ;;  %v2151_v13 = vsel %vm2133_vm5, %v1985_v58, %v2150_v5  ;;  %v600_v15 = vcombine.high %v344_v45, %v344_v45  ;;  %v607_v53 = vrot.slane %v344_v45, %v4560_v6 }
  0x89   : > { %v2152_v28 = vsel %vm2135_vm6, %v1986_v33, %v2151_v13  ;;  %v617_v17 = vcombine.high %v345_v10, %v345_v10  ;;  %v1987_v60 = vmax.f32 %v4804_v32, %v1397_v9  ;;  %v624_v21 = vrot.slane %v345_v10, %v4560_v6 }
  0x8a   : > { %v1988_v18 = vmax.f32 %v4808_v57, %v1404_v41  ;;  %v634_v51 = vcombine.high %v346_v34, %v346_v34  ;;  %2408 = vrot.lane.b32.xlu0 %v2263_v7, %s4398_s28  ;;  %v614_v19 = vrot.slane %v600_v15, %v4560_v6  ;;  %v615_v23 = vcombine.high %v607_v53, %v607_v53 }
  0x8b   : > { %v631_v56 = vrot.slane %v617_v17, %v4560_v6  ;;  %v4851_v24 = vrot.slane %v346_v34, %v4560_v6  ;;  %v2153_v62 = vsel %vm2137_vm7, %v1987_v60, %v2152_v28  ;;  %v632_v59 = vcombine.high %v624_v21, %v624_v21 }
  0x8c   : > { %v4855_v32 = vrot.slane %v634_v51, %v4560_v6  ;;  %v651_v57 = vcombine.high %v347_v14, %v347_v14  ;;  %v2154_v29 = vsel %vm2139_vm8, %v1988_v18, %v2153_v62  ;;  %v616_v2 = vcombine.high %v614_v19, %v614_v19 }
  0x8d   : > { %v633_v30 = vcombine.high %v631_v56, %v631_v56  ;;  %v649_v31 = vcombine.high %v4851_v24, %v4851_v24  ;;  %2201 = vst.msk [vmem:[#allocation2 + $0x31] sm:$0xff] %vm2042_vm1, %v2154_v29  ;;  %v4864_v26 = vrot.slane %v347_v14, %v4560_v6  ;;  %v1405_v38 = vsel %vm1068_vm0, %v607_v53, -inf }
  0x8e   : > { %v650_v20 = vcombine.high %v4855_v32, %v4855_v32  ;;  %v4867_v63 = vrot.slane %v651_v57, %v4560_v6  ;;  %v1406_v40 = vrot.slane %v1405_v38, 4  ;;  %v1412_v42 = vsel %vm1068_vm0, %v615_v23, -inf }
  0x8f   : > { %v1419_v61 = vsel %vm1068_vm0, %v614_v19, -inf  ;;  %v1426_v43 = vsel %vm1068_vm0, %v616_v2, -inf  ;;  %v666_v12 = vcombine.high %v4864_v26, %v4864_v26  ;;  %v1413_v47 = vrot.slane %v1412_v42, 4 }
  0x90   : > { %v667_v44 = vcombine.high %v4867_v63, %v4867_v63  ;;  %v1420_v22 = vrot.slane %v1419_v61, 4  ;;  %v1407_v48 = vmax.f32 %v1405_v38, %v1406_v40  ;;  %v1427_v49 = vrot.slane %v1426_v43, 4 }
  0x91   : > { %v1433_v8 = vsel %vm1068_vm0, %v624_v21, -inf  ;;  %v1440_v50 = vsel %vm1068_vm0, %v632_v59, -inf  ;;  %v1414_v52 = vmax.f32 %v1412_v42, %v1413_v47  ;;  %v1447_v35 = vsel %vm1068_vm0, %v631_v56, -inf }
  0x92   : > { %v1421_v54 = vmax.f32 %v1419_v61, %v1420_v22  ;;  %v1434_v11 = vrot.slane %v1433_v8, 4  ;;  %v1441_v55 = vrot.slane %v1440_v50, 4  ;;  %v1408_v46 = vrot.slane %v1407_v48, 2 }
  0x93   : > { %v1428_v36 = vmax.f32 %v1426_v43, %v1427_v49  ;;  %v1454_v37 = vsel %vm1068_vm0, %v633_v30, -inf  ;;  %v1415_v58 = vrot.slane %v1414_v52, 2  ;;  %v1448_v41 = vrot.slane %v1447_v35, 4 }
  0x94   : > { %v1422_v0 = vrot.slane %v1421_v54, 2  ;;  %v1435_v45 = vmax.f32 %v1433_v8, %v1434_v11  ;;  %v1442_v10 = vmax.f32 %v1440_v50, %v1441_v55  ;;  %v2226_v33 = vld [vmem:[#allocation2 + $0x31] sm:$0xff]  ;;  %v1409_v34 = vmax.f32 %v1407_v48, %v1408_v46 }
  0x95   : > { %v2242_v5 = vld [vmem:[#allocation2 + $0x32] sm:$0xff]  ;;  %v1429_v9 = vrot.slane %v1428_v36, 2  ;;  %v1455_v13 = vrot.slane %v1454_v37, 4  ;;  %v4881_v28 = vpack.c.bf16 %v2226_v33, %v2226_v33  ;;  %v1416_v53 = vmax.f32 %v1414_v52, %v1415_v58 }
  0x96   : > { %v2257_v7 = vld [vmem:[#allocation2 + $0x30] sm:$0xff]  ;;  %v4883_v14 = vpack.c.bf16 %v2242_v5, %v2242_v5  ;;  %v1410_v17 = vrot.slane %v1409_v34, 1  ;;  %v1423_v60 = vmax.f32 %v1421_v54, %v1422_v0  ;;  %v1436_v21 = vrot.slane %v1435_v45, 2 }
  0x97   : > { %v4885_v15 = vpack.c.bf16 %v2257_v7, %v2257_v7  ;;  %v1430_v18 = vmax.f32 %v1428_v36, %v1429_v9  ;;  %2366 = vrot.lane.b32.xlu1 %v4881_v28, %s4396_s26  ;;  %v1417_v51 = vrot.slane %v1416_v53, 1  ;;  %v1443_v19 = vrot.slane %v1442_v10, 2 }
  0x98   : > { %v1449_v23 = vmax.f32 %v1447_v35, %v1448_v41  ;;  %v1456_v56 = vmax.f32 %v1454_v37, %v1455_v13  ;;  %v4891_v62 = vmax.f32 %v1409_v34, %v1410_v17  ;;  %v1424_v59 = vrot.slane %v1423_v60, 1 }
  0x99   : > { %2412 = vrot.lane.b32.xlu0 %v4885_v15, %s4398_s28  ;;  %v1431_v57 = vrot.slane %v1430_v18, 1  ;;  %v1437_v29 = vmax.f32 %v1435_v45, %v1436_v21  ;;  %v4893_v2 = vmax.f32 %v1416_v53, %v1417_v51  ;;  %v1444_v30 = vmax.f32 %v1442_v10, %v1443_v19 }
  0x9a   : > { %v1450_v38 = vrot.slane %v1449_v23, 2  ;;  %v1457_v40 = vrot.slane %v1456_v56, 2  ;;  %v4895_v42 = vmax.f32 %v1423_v60, %v1424_v59  ;;  %v1461_v47 = vsel %vm1068_vm0, %v4851_v24, -inf }
  0x9b   : > { %v4897_v61 = vmax.f32 %v1430_v18, %v1431_v57  ;;  %v1438_v43 = vrot.slane %v1437_v29, 1  ;;  %2386 = vrot.lane.b32.xlu1 %v4835_v3, %s4397_s27  ;;  %v1445_v22 = vrot.slane %v1444_v30, 1  ;;  %v1462_v8 = vrot.slane %v1461_v47, 4 }
  0x9c   : > { %v1451_v48 = vmax.f32 %v1449_v23, %v1450_v38  ;;  %v1458_v49 = vmax.f32 %v1456_v56, %v1457_v40  ;;  %v1468_v52 = vsel %vm1068_vm0, %v649_v31, -inf  ;;  %v1475_v54 = vsel %vm1068_vm0, %v4855_v32, -inf }
  0x9d   : > { %2432 = vrot.lane.b32.xlu0 %v4782_v27, %s4399_s29  ;;  %v4905_v50 = vmax.f32 %v1437_v29, %v1438_v43  ;;  %v1482_v11 = vsel %vm1068_vm0, %v650_v20, -inf  ;;  %v4917_v27 = vmax.f32 %v1444_v30, %v1445_v22  ;;  %v1463_v36 = vmax.f32 %v1461_v47, %v1462_v8 }
  0x9e   : > { %v1452_v55 = vrot.slane %v1451_v48, 1  ;;  %v1459_v46 = vrot.slane %v1458_v49, 1  ;;  %v1469_v35 = vrot.slane %v1468_v52, 4  ;;  %v1476_v37 = vrot.slane %v1475_v54, 4 }
  0x9f   : > { %v1483_v58 = vrot.slane %v1482_v11, 4  ;;  %v1489_v24 = vsel %vm1068_vm0, %v4864_v26, -inf  ;;  %2390 = vrot.lane.b32.xlu1 %v4883_v14, %s4397_s27  ;;  %v1464_v32 = vrot.slane %v1463_v36, 2  ;;  %v1496_v5 = vsel %vm1068_vm0, %v666_v12, -inf }
  0xa0   : > { %v4923_v31 = vmax.f32 %v1451_v48, %v1452_v55  ;;  %v4925_v0 = vmax.f32 %v1458_v49, %v1459_v46  ;;  %v1490_v20 = vrot.slane %v1489_v24, 4  ;;  %v1470_v45 = vmax.f32 %v1468_v52, %v1469_v35 }
  0xa1   : > { %2436 = vrot.lane.b32.xlu0 %v4881_v28, %s4399_s29  ;;  %v1477_v10 = vmax.f32 %v1475_v54, %v1476_v37  ;;  %v1484_v33 = vmax.f32 %v1482_v11, %v1483_v58  ;;  %v1465_v7 = vmax.f32 %v1463_v36, %v1464_v32  ;;  %v1497_v9 = vrot.slane %v1496_v5, 4  ;;  %v348_v11 = vld [vmem:[%s4557_s25 + $0x80] sm:$0xff]  ;;  %v349_v37 = vld [vmem:[%s4557_s25 + $0x88] sm:$0xff] }
  0xa2   : > { %v1491_v34 = vmax.f32 %v1489_v24, %v1490_v20  ;;  %v1503_v41 = vsel %vm1068_vm0, %v4867_v63, -inf  ;;  %v1471_v13 = vrot.slane %v1470_v45, 2  ;;  %v1510_v26 = vsel %vm1068_vm0, %v667_v44, -inf  ;;  %v4943_v63 = vld [vmem:[#allocation2 + $0x21] sm:$0xff] }
  0xa3   : > { %v1478_v53 = vrot.slane %v1477_v10, 2  ;;  %v1485_v17 = vrot.slane %v1484_v33, 2  ;;  %v1504_v60 = vrot.slane %v1503_v41, 4  ;;  %2410 = vrot.lane.b32.xlu1 %v4839_v25, %s4398_s28  ;;  %v1466_v18 = vrot.slane %v1465_v7, 1 }
  0xa4   : > { %v1492_v21 = vrot.slane %v1491_v34, 2  ;;  %v1498_v51 = vmax.f32 %v1496_v5, %v1497_v9  ;;  %v1472_v12 = vmax.f32 %v1470_v45, %v1471_v13  ;;  %v1511_v30 = vrot.slane %v1510_v26, 4 }
  0xa5   : > { %2456 = vrot.lane.b32.xlu0 %v4835_v3, %s4400_s14  ;;  %v1479_v19 = vmax.f32 %v1477_v10, %v1478_v53  ;;  %v1486_v23 = vmax.f32 %v1484_v33, %v1485_v17  ;;  %v1505_v56 = vmax.f32 %v1503_v41, %v1504_v60  ;;  %v1467_v59 = vmax.f32 %v1465_v7, %v1466_v18  ;;  %v350_v41 = vld [vmem:[%s4557_s25 + $0x90] sm:$0xff] }
  0xa6   : > { %v1493_v57 = vmax.f32 %v1491_v34, %v1492_v21  ;;  %v1499_v29 = vrot.slane %v1498_v51, 2  ;;  %v1473_v38 = vrot.slane %v1472_v12, 1  ;;  %v1512_v48 = vmax.f32 %v1510_v26, %v1511_v30 }
  0xa7   : > { %v1480_v40 = vrot.slane %v1479_v19, 1  ;;  %v1487_v43 = vrot.slane %v1486_v23, 1  ;;  %v1506_v47 = vrot.slane %v1505_v56, 2  ;;  %v1989_v3 = vmax.f32 %v4891_v62, %v1467_v59 }
  0xa8   : > { %v1494_v44 = vrot.slane %v1493_v57, 1  ;;  %v1500_v22 = vmax.f32 %v1498_v51, %v1499_v29  ;;  %v1474_v49 = vmax.f32 %v1472_v12, %v1473_v38  ;;  %v1513_v36 = vrot.slane %v1512_v48, 2 }
  0xa9   : > { %2460 = vrot.lane.b32.xlu0 %v4883_v14, %s4400_s14  ;;  %v1481_v8 = vmax.f32 %v1479_v19, %v1480_v40  ;;  %v1488_v52 = vmax.f32 %v1486_v23, %v1487_v43  ;;  %v1507_v54 = vmax.f32 %v1505_v56, %v1506_v47  ;;  %v2328_v35 = vpack.c.bf16 %v4943_v63, %v4943_v63 }
  0xaa   : > { %v1495_v55 = vmax.f32 %v1493_v57, %v1494_v44  ;;  %v1501_v46 = vrot.slane %v1500_v22, 1  ;;  %v1990_v24 = vmax.f32 %v4893_v2, %v1474_v49  ;;  %v1514_v45 = vmax.f32 %v1512_v48, %v1513_v36 }
  0xab   : > { %v1508_v58 = vrot.slane %v1507_v54, 1  ;;  %v1991_v62 = vmax.f32 %v4895_v42, %v1481_v8  ;;  %v1992_v32 = vmax.f32 %v4897_v61, %v1488_v52  ;;  %v668_v33 = vcombine.high %v348_v11, %v348_v11 }
  0xac   : > { %v1502_v20 = vmax.f32 %v1500_v22, %v1501_v46  ;;  %v1993_v10 = vmax.f32 %v4905_v50, %v1495_v55  ;;  %v2155_v7 = vsel %vm2127_vm2, %v1990_v24, %v1989_v3  ;;  %v675_v2 = vrot.slane %v348_v11, %v4560_v6 }
  0xad   : > { %2480 = vrot.lane.b32.xlu0 %v4839_v25, %s4401_s16  ;;  %v1509_v5 = vmax.f32 %v1507_v54, %v1508_v58  ;;  %v685_v34 = vcombine.high %v349_v37, %v349_v37  ;;  %v1515_v9 = vrot.slane %v1514_v45, 1  ;;  %v2156_v61 = vsel %vm2129_vm3, %v1991_v62, %v2155_v7  ;;  %v351_v25 = vld [vmem:[%s4557_s25 + $0x98] sm:$0xff] }
  0xae   : > { %v1994_v42 = vmax.f32 %v4917_v27, %v1502_v20  ;;  %v682_v13 = vrot.slane %v668_v33, %v4560_v6  ;;  %v2157_v53 = vsel %vm2131_vm4, %v1992_v32, %v2156_v61  ;;  %v683_v17 = vcombine.high %v675_v2, %v675_v2 }
  0xaf   : > { %v1995_v50 = vmax.f32 %v4923_v31, %v1509_v5  ;;  %v692_v60 = vrot.slane %v349_v37, %v4560_v6  ;;  %v1516_v18 = vmax.f32 %v1514_v45, %v1515_v9  ;;  %v2158_v21 = vsel %vm2133_vm5, %v1993_v10, %v2157_v53 }
  0xb0   : > { %v684_v51 = vcombine.high %v682_v13, %v682_v13  ;;  %v699_v26 = vrot.slane %v685_v34, %v4560_v6  ;;  %v2159_v27 = vsel %vm2135_vm6, %v1994_v42, %v2158_v21  ;;  %v702_v19 = vcombine.high %v350_v41, %v350_v41 }
  0xb1   : > { %v700_v12 = vcombine.high %v692_v60, %v692_v60  ;;  %v4972_v23 = vrot.slane %v350_v41, %v4560_v6  ;;  %v1996_v31 = vmax.f32 %v4925_v0, %v1516_v18  ;;  %v2160_v56 = vsel %vm2137_vm7, %v1995_v50, %v2159_v27 }
  0xb2   : > { %v701_v59 = vcombine.high %v699_v26, %v699_v26  ;;  %v719_v57 = vcombine.high %v351_v25, %v351_v25  ;;  %v4977_v29 = vrot.slane %v702_v19, %v4560_v6  ;;  %v4982_v38 = vrot.slane %v351_v25, %v4560_v6 }
  0xb3   : > { %v717_v30 = vcombine.high %v4972_v23, %v4972_v23  ;;  %v1517_v40 = vsel %vm1068_vm0, %v675_v2, -inf  ;;  %v2161_v43 = vsel %vm2139_vm8, %v1996_v31, %v2160_v56  ;;  %v1524_v44 = vsel %vm1068_vm0, %v683_v17, -inf }
  0xb4   : > { %v4987_v47 = vrot.slane %v719_v57, %v4560_v6  ;;  %v1518_v0 = vrot.slane %v1517_v40, 4  ;;  %2202 = vst.msk [vmem:[#allocation2 + $0x41] sm:$0xff] %vm2042_vm1, %v2161_v43  ;;  %v718_v22 = vcombine.high %v4977_v29, %v4977_v29  ;;  %v734_v48 = vcombine.high %v4982_v38, %v4982_v38 }
  0xb5   : > { %v1525_v3 = vrot.slane %v1524_v44, 4  ;;  %v1531_v49 = vsel %vm1068_vm0, %v682_v13, -inf  ;;  %v1538_v11 = vsel %vm1068_vm0, %v684_v51, -inf  ;;  %v1545_v36 = vsel %vm1068_vm0, %v692_v60, -inf }
  0xb6   : > { %v735_v8 = vcombine.high %v4987_v47, %v4987_v47  ;;  %v1519_v52 = vmax.f32 %v1517_v40, %v1518_v0  ;;  %v1532_v54 = vrot.slane %v1531_v49, 4  ;;  %v1539_v46 = vrot.slane %v1538_v11, 4 }
  0xb7   : > { %v1526_v55 = vmax.f32 %v1524_v44, %v1525_v3  ;;  %v1552_v37 = vsel %vm1068_vm0, %v700_v12, -inf  ;;  %v1546_v62 = vrot.slane %v1545_v36, 4  ;;  %v1559_v10 = vsel %vm1068_vm0, %v699_v26, -inf }
  0xb8   : > { %v1520_v58 = vrot.slane %v1519_v52, 2  ;;  %v1533_v24 = vmax.f32 %v1531_v49, %v1532_v54  ;;  %v1553_v32 = vrot.slane %v1552_v37, 4  ;;  %v1540_v45 = vmax.f32 %v1538_v11, %v1539_v46 }
  0xb9   : > { %v1527_v20 = vrot.slane %v1526_v55, 2  ;;  %v1566_v33 = vsel %vm1068_vm0, %v701_v59, -inf  ;;  %v1547_v2 = vmax.f32 %v1545_v36, %v1546_v62  ;;  %v1560_v61 = vrot.slane %v1559_v10, 4 }
  0xba   : > { %v1521_v5 = vmax.f32 %v1519_v52, %v1520_v58  ;;  %v1534_v7 = vrot.slane %v1533_v24, 2  ;;  %v1554_v34 = vmax.f32 %v1552_v37, %v1553_v32  ;;  %v1541_v42 = vrot.slane %v1540_v45, 2 }
  0xbb   : > { %v1528_v9 = vmax.f32 %v1526_v55, %v1527_v20  ;;  %v1567_v41 = vrot.slane %v1566_v33, 4  ;;  %v2258_v13 = vld [vmem:[#allocation2 + $0x40] sm:$0xff]  ;;  %v1548_v60 = vrot.slane %v1547_v2, 2  ;;  %v1561_v40 = vmax.f32 %v1559_v10, %v1560_v61 }
  0xbc   : > { %v2274_v50 = vld [vmem:[#allocation2 + $0x41] sm:$0xff]  ;;  %v1522_v25 = vrot.slane %v1521_v5, 1  ;;  %v1535_v17 = vmax.f32 %v1533_v24, %v1534_v7  ;;  %v1555_v18 = vrot.slane %v1554_v34, 2  ;;  %v2266_v21 = vpack.c.bf16 %v2258_v13, %v2258_v13 }
  0xbd   : > { %v2290_v53 = vld [vmem:[#allocation2 + $0x42] sm:$0xff]  ;;  %v5003_v51 = vpack.c.bf16 %v2274_v50, %v2274_v50  ;;  %v1529_v27 = vrot.slane %v1528_v9, 1  ;;  %v1542_v31 = vmax.f32 %v1540_v45, %v1541_v42  ;;  %v1549_v56 = vmax.f32 %v1547_v2, %v1548_v60 }
  0xbe   : > { %v5005_v26 = vpack.c.bf16 %v2290_v53, %v2290_v53  ;;  %v5007_v12 = vmax.f32 %v1521_v5, %v1522_v25  ;;  %v1536_v19 = vrot.slane %v1535_v17, 1  ;;  %2414 = vrot.lane.b32.xlu1 %v2266_v21, %s4398_s28  ;;  %2484 = vrot.lane.b32.xlu0 %v2266_v21, %s4401_s16  ;;  %v1556_v57 = vmax.f32 %v1554_v34, %v1555_v18 }
  0xbf   : > { %v5011_v59 = vmax.f32 %v1528_v9, %v1529_v27  ;;  %v1573_v43 = vsel %vm1068_vm0, %v4972_v23, -inf  ;;  %v1543_v44 = vrot.slane %v1542_v31, 1  ;;  %v1550_v3 = vrot.slane %v1549_v56, 1 }
  0xc0   : > { %v5015_v0 = vmax.f32 %v1535_v17, %v1536_v19  ;;  %v1568_v49 = vmax.f32 %v1566_v33, %v1567_v41  ;;  %v1557_v52 = vrot.slane %v1556_v57, 1  ;;  %v1562_v54 = vrot.slane %v1561_v40, 2 }
  0xc1   : > { %v1574_v11 = vrot.slane %v1573_v43, 4  ;;  %v1580_v55 = vsel %vm1068_vm0, %v717_v30, -inf  ;;  %v5021_v46 = vmax.f32 %v1542_v31, %v1543_v44  ;;  %v5023_v36 = vmax.f32 %v1549_v56, %v1550_v3 }
  0xc2   : > { %v1569_v37 = vrot.slane %v1568_v49, 2  ;;  %v1581_v58 = vrot.slane %v1580_v55, 4  ;;  %2434 = vrot.lane.b32.xlu1 %v4689_v16, %s4399_s29  ;;  %2504 = vrot.lane.b32.xlu0 %v2328_v35, %s4402_s17  ;;  %v5031_v24 = vmax.f32 %v1556_v57, %v1557_v52  ;;  %v1563_v23 = vmax.f32 %v1561_v40, %v1562_v54 }
  0xc3   : > { %v1575_v62 = vmax.f32 %v1573_v43, %v1574_v11  ;;  %v1587_v30 = vsel %vm1068_vm0, %v4977_v29, -inf  ;;  %v1594_v16 = vsel %vm1068_vm0, %v718_v22, -inf  ;;  %v1601_v63 = vsel %vm1068_vm0, %v4982_v38, -inf }
  0xc4   : > { %v1570_v32 = vmax.f32 %v1568_v49, %v1569_v37  ;;  %v1582_v20 = vmax.f32 %v1580_v55, %v1581_v58  ;;  %v1588_v45 = vrot.slane %v1587_v30, 4  ;;  %v1564_v10 = vrot.slane %v1563_v23, 1  ;;  %v352_v58 = vld [vmem:[%s4557_s25 + $0xa0] sm:$0xff] }
  0xc5   : > { %v1576_v33 = vrot.slane %v1575_v62, 2  ;;  %v1595_v5 = vrot.slane %v1594_v16, 4  ;;  %v1602_v34 = vrot.slane %v1601_v63, 4  ;;  %v1608_v29 = vsel %vm1068_vm0, %v734_v48, -inf }
  0xc6   : > { %v1571_v35 = vrot.slane %v1570_v32, 1  ;;  %v1583_v7 = vrot.slane %v1582_v20, 2  ;;  %v1589_v2 = vmax.f32 %v1587_v30, %v1588_v45  ;;  %2438 = vrot.lane.b32.xlu1 %v5003_v51, %s4399_s29  ;;  %v5043_v9 = vmax.f32 %v1563_v23, %v1564_v10  ;;  %2508 = vrot.lane.b32.xlu0 %v5003_v51, %s4402_s17 }
  0xc7   : > { %v1577_v42 = vmax.f32 %v1575_v62, %v1576_v33  ;;  %v1596_v61 = vmax.f32 %v1594_v16, %v1595_v5  ;;  %v1603_v50 = vmax.f32 %v1601_v63, %v1602_v34  ;;  %v1609_v17 = vrot.slane %v1608_v29, 4  ;;  %v353_v63 = vld [vmem:[%s4557_s25 + $0xa8] sm:$0xff] }
  0xc8   : > { %v5051_v22 = vmax.f32 %v1570_v32, %v1571_v35  ;;  %v1584_v41 = vmax.f32 %v1582_v20, %v1583_v7  ;;  %v1590_v13 = vrot.slane %v1589_v2, 2  ;;  %v1615_v60 = vsel %vm1068_vm0, %v4987_v47, -inf }
  0xc9   : > { %v1578_v53 = vrot.slane %v1577_v42, 1  ;;  %v1597_v25 = vrot.slane %v1596_v61, 2  ;;  %v1604_v27 = vrot.slane %v1603_v50, 2  ;;  %v1616_v38 = vrot.slane %v1615_v60, 4 }
  0xca   : > { %v1585_v18 = vrot.slane %v1584_v41, 1  ;;  %v1591_v21 = vmax.f32 %v1589_v2, %v1590_v13  ;;  %2458 = vrot.lane.b32.xlu1 %v4825_v39, %s4400_s14  ;;  %v1610_v31 = vmax.f32 %v1608_v29, %v1609_v17  ;;  %v1622_v56 = vsel %vm1068_vm0, %v735_v8, -inf  ;;  %2528 = vrot.lane.b32.xlu0 %v4825_v39, %s6037_s21 }
  0xcb   : > { %v1579_v48 = vmax.f32 %v1577_v42, %v1578_v53  ;;  %v1598_v19 = vmax.f32 %v1596_v61, %v1597_v25  ;;  %v1605_v43 = vmax.f32 %v1603_v50, %v1604_v27  ;;  %v1617_v44 = vmax.f32 %v1615_v60, %v1616_v38 }
  0xcc   : > { %v1586_v57 = vmax.f32 %v1584_v41, %v1585_v18  ;;  %v1592_v40 = vrot.slane %v1591_v21, 1  ;;  %v1611_v49 = vrot.slane %v1610_v31, 2  ;;  %v1623_v52 = vrot.slane %v1622_v56, 4  ;;  %v355_v41 = vld [vmem:[%s4557_s25 + $0xb8] sm:$0xff] }
  0xcd   : > { %v1599_v3 = vrot.slane %v1598_v19, 1  ;;  %v1997_v54 = vmax.f32 %v5007_v12, %v1579_v48  ;;  %v1606_v55 = vrot.slane %v1605_v43, 1  ;;  %v1618_v37 = vrot.slane %v1617_v44, 2 }
  0xce   : > { %v1593_v11 = vmax.f32 %v1591_v21, %v1592_v40  ;;  %v1998_v47 = vmax.f32 %v5011_v59, %v1586_v57  ;;  %2462 = vrot.lane.b32.xlu1 %v5005_v26, %s4400_s14  ;;  %v1612_v8 = vmax.f32 %v1610_v31, %v1611_v49  ;;  %v1624_v23 = vmax.f32 %v1622_v56, %v1623_v52 }
  0xcf   : > { %v1600_v39 = vmax.f32 %v1598_v19, %v1599_v3  ;;  %2368 = vrot.lane.b32.xlu0 %v5003_v51, %s4396_s26  ;;  %v1607_v62 = vmax.f32 %v1605_v43, %v1606_v55  ;;  %v1619_v30 = vmax.f32 %v1617_v44, %v1618_v37  ;;  %v736_v16 = vcombine.high %v352_v58, %v352_v58 }
  0xd0   : > { %v1999_v12 = vmax.f32 %v5015_v0, %v1593_v11  ;;  %v2162_v32 = vsel %vm2127_vm2, %v1998_v47, %v1997_v54  ;;  %v1613_v20 = vrot.slane %v1612_v8, 1  ;;  %v1625_v59 = vrot.slane %v1624_v23, 2 }
  0xd1   : > { %v2000_v45 = vmax.f32 %v5021_v46, %v1600_v39  ;;  %v1620_v10 = vrot.slane %v1619_v30, 1  ;;  %v2001_v33 = vmax.f32 %v5023_v36, %v1607_v62  ;;  %v743_v51 = vrot.slane %v352_v58, %v4560_v6  ;;  %v354_v46 = vld [vmem:[%s4557_s25 + $0xb0] sm:$0xff] }
  0xd2   : > { %v2163_v5 = vsel %vm2129_vm3, %v1999_v12, %v2162_v32  ;;  %2482 = vrot.lane.b32.xlu1 %v4885_v15, %s4401_s16  ;;  %v1614_v0 = vmax.f32 %v1612_v8, %v1613_v20  ;;  %v1626_v35 = vmax.f32 %v1624_v23, %v1625_v59  ;;  %v750_v34 = vrot.slane %v736_v16, %v4560_v6 }
  0xd3   : > { %v2164_v7 = vsel %vm2131_vm4, %v2000_v45, %v2163_v5  ;;  %2532 = vrot.lane.b32.xlu0 %v5005_v26, %s6037_s21  ;;  %v1621_v2 = vmax.f32 %v1619_v30, %v1620_v10  ;;  %v751_v42 = vcombine.high %v743_v51, %v743_v51  ;;  %v753_v13 = vcombine.high %v353_v63, %v353_v63 }
  0xd4   : > { %v2165_v36 = vsel %vm2133_vm5, %v2001_v33, %v2164_v7  ;;  %v1627_v61 = vrot.slane %v1626_v35, 1  ;;  %v2002_v29 = vmax.f32 %v5031_v24, %v1614_v0  ;;  %v760_v15 = vrot.slane %v353_v63, %v4560_v6 }
  0xd5   : > { %v2003_v50 = vmax.f32 %v5043_v9, %v1621_v2  ;;  %v752_v53 = vcombine.high %v750_v34, %v750_v34  ;;  %v770_v25 = vcombine.high %v354_v46, %v354_v46  ;;  %v5090_v17 = vrot.slane %v354_v46, %v4560_v6 }
  0xd6   : > { %v1628_v60 = vmax.f32 %v1626_v35, %v1627_v61  ;;  %v2166_v18 = vsel %vm2135_vm6, %v2002_v29, %v2165_v36  ;;  %v767_v21 = vrot.slane %v753_v13, %v4560_v6  ;;  %v768_v27 = vcombine.high %v760_v15, %v760_v15 }
  0xd7   : > { %v2167_v38 = vsel %vm2137_vm7, %v2003_v50, %v2166_v18  ;;  %v5096_v24 = vrot.slane %v770_v25, %v4560_v6  ;;  %v785_v48 = vcombine.high %v5090_v17, %v5090_v17  ;;  %v787_v9 = vcombine.high %v355_v41, %v355_v41 }
  0xd8   : > { %v2004_v19 = vmax.f32 %v5051_v22, %v1628_v60  ;;  %v769_v31 = vcombine.high %v767_v21, %v767_v21  ;;  %v5102_v56 = vrot.slane %v355_v41, %v4560_v6  ;;  %v1629_v57 = vsel %vm1068_vm0, %v743_v51, -inf }
  0xd9   : > { %v786_v40 = vcombine.high %v5096_v24, %v5096_v24  ;;  %v5108_v43 = vrot.slane %v787_v9, %v4560_v6  ;;  %v1630_v44 = vrot.slane %v1629_v57, 4  ;;  %v1636_v3 = vsel %vm1068_vm0, %v751_v42, -inf }
  0xda   : > { %v2168_v49 = vsel %vm2139_vm8, %v2004_v19, %v2167_v38  ;;  %v802_v22 = vcombine.high %v5102_v56, %v5102_v56  ;;  %v1637_v52 = vrot.slane %v1636_v3, 4  ;;  %v1643_v54 = vsel %vm1068_vm0, %v750_v34, -inf }
  0xdb   : > { %2203 = vst.msk [vmem:[#allocation2 + $0x51] sm:$0xff] %vm2042_vm1, %v2168_v49  ;;  %v803_v11 = vcombine.high %v5108_v43, %v5108_v43  ;;  %v1631_v55 = vmax.f32 %v1629_v57, %v1630_v44  ;;  %v1644_v37 = vrot.slane %v1643_v54, 4  ;;  %v1650_v47 = vsel %vm1068_vm0, %v752_v53, -inf }
  0xdc   : > { %v1638_v58 = vmax.f32 %v1636_v3, %v1637_v52  ;;  %v1651_v39 = vrot.slane %v1650_v47, 4  ;;  %v1657_v8 = vsel %vm1068_vm0, %v760_v15, -inf  ;;  %v1664_v23 = vsel %vm1068_vm0, %v768_v27, -inf }
  0xdd   : > { %v1632_v62 = vrot.slane %v1631_v55, 2  ;;  %v1645_v30 = vmax.f32 %v1643_v54, %v1644_v37  ;;  %v1658_v12 = vrot.slane %v1657_v8, 4  ;;  %v1665_v32 = vrot.slane %v1664_v23, 4 }
  0xde   : > { %v1639_v20 = vrot.slane %v1638_v58, 2  ;;  %v1652_v59 = vmax.f32 %v1650_v47, %v1651_v39  ;;  %v1671_v45 = vsel %vm1068_vm0, %v767_v21, -inf  ;;  %v1678_v16 = vsel %vm1068_vm0, %v769_v31, -inf }
  0xdf   : > { %v1633_v10 = vmax.f32 %v1631_v55, %v1632_v62  ;;  %v1646_v33 = vrot.slane %v1645_v30, 2  ;;  %v1659_v5 = vmax.f32 %v1657_v8, %v1658_v12  ;;  %v1666_v63 = vmax.f32 %v1664_v23, %v1665_v32 }
  0xe0   : > { %v1640_v51 = vmax.f32 %v1638_v58, %v1639_v20  ;;  %v1653_v0 = vrot.slane %v1652_v59, 2  ;;  %v1672_v35 = vrot.slane %v1671_v45, 4  ;;  %v1679_v7 = vrot.slane %v1678_v16, 4 }
  0xe1   : > { %v1634_v46 = vrot.slane %v1633_v10, 1  ;;  %v1647_v2 = vmax.f32 %v1645_v30, %v1646_v33  ;;  %v1660_v36 = vrot.slane %v1659_v5, 2  ;;  %v1667_v34 = vrot.slane %v1666_v63, 2 }
  0xe2   : > { %v2307_v42 = vld [vmem:[#allocation2 + $0x50] sm:$0xff]  ;;  %v1641_v29 = vrot.slane %v1640_v51, 1  ;;  %v1654_v41 = vmax.f32 %v1652_v59, %v1653_v0  ;;  %v1673_v13 = vmax.f32 %v1671_v45, %v1672_v35  ;;  %v1680_v15 = vmax.f32 %v1678_v16, %v1679_v7 }
  0xe3   : > { %v2323_v61 = vld [vmem:[#allocation2 + $0x51] sm:$0xff]  ;;  %v5123_v50 = vpack.c.bf16 %v2307_v42, %v2307_v42  ;;  %v5127_v25 = vmax.f32 %v1633_v10, %v1634_v46  ;;  %v1648_v60 = vrot.slane %v1647_v2, 1  ;;  %v1661_v27 = vmax.f32 %v1659_v5, %v1660_v36 }
  0xe4   : > { %v5125_v53 = vpack.c.bf16 %v2323_v61, %v2323_v61  ;;  %v5129_v18 = vmax.f32 %v1640_v51, %v1641_v29  ;;  %v1655_v21 = vrot.slane %v1654_v41, 1  ;;  %v1668_v38 = vmax.f32 %v1666_v63, %v1667_v34 }
  0xe5   : > { %2486 = vrot.lane.b32.xlu1 %v5123_v50, %s4401_s16  ;;  %v5133_v9 = vmax.f32 %v1647_v2, %v1648_v60  ;;  %v1674_v19 = vrot.slane %v1673_v13, 2  ;;  %v1681_v31 = vrot.slane %v1680_v15, 2  ;;  %v1685_v57 = vsel %vm1068_vm0, %v5090_v17, -inf }
  0xe6   : > { %v5137_v44 = vmax.f32 %v1654_v41, %v1655_v21  ;;  %v1662_v3 = vrot.slane %v1661_v27, 1  ;;  %v1669_v49 = vrot.slane %v1668_v38, 1  ;;  %v1686_v52 = vrot.slane %v1685_v57, 4 }
  0xe7   : > { %v1675_v54 = vmax.f32 %v1673_v13, %v1674_v19  ;;  %v1682_v55 = vmax.f32 %v1680_v15, %v1681_v31  ;;  %v1692_v37 = vsel %vm1068_vm0, %v785_v48, -inf  ;;  %v1699_v47 = vsel %vm1068_vm0, %v5096_v24, -inf }
  0xe8   : > { %v5145_v58 = vmax.f32 %v1661_v27, %v1662_v3  ;;  %v5147_v39 = vmax.f32 %v1668_v38, %v1669_v49  ;;  %v1687_v8 = vmax.f32 %v1685_v57, %v1686_v52  ;;  %v1693_v23 = vrot.slane %v1692_v37, 4  ;;  %v2339_v38 = vld [vmem:[#allocation2 + $0x52] sm:$0xff] }
  0xe9   : > { %2506 = vrot.lane.b32.xlu1 %v4881_v28, %s4402_s17  ;;  %v1676_v62 = vrot.slane %v1675_v54, 1  ;;  %v1683_v30 = vrot.slane %v1682_v55, 1  ;;  %v1700_v12 = vrot.slane %v1699_v47, 4  ;;  %v1706_v17 = vsel %vm1068_vm0, %v786_v40, -inf }
  0xea   : > { %v1688_v48 = vrot.slane %v1687_v8, 2  ;;  %v1694_v32 = vmax.f32 %v1692_v37, %v1693_v23  ;;  %v1707_v20 = vrot.slane %v1706_v17, 4  ;;  %v1713_v59 = vsel %vm1068_vm0, %v5102_v56, -inf }
  0xeb   : > { %v5157_v45 = vmax.f32 %v1675_v54, %v1676_v62  ;;  %v5159_v16 = vmax.f32 %v1682_v55, %v1683_v30  ;;  %v1701_v10 = vmax.f32 %v1699_v47, %v1700_v12  ;;  %v1714_v28 = vrot.slane %v1713_v59, 4  ;;  %v356_v54 = vld [vmem:[%s4557_s25 + $0xc0] sm:$0xff] }
  0xec   : > { %v1689_v33 = vmax.f32 %v1687_v8, %v1688_v48  ;;  %v1695_v5 = vrot.slane %v1694_v32, 2  ;;  %v1708_v63 = vmax.f32 %v1706_v17, %v1707_v20  ;;  %v1720_v24 = vsel %vm1068_vm0, %v802_v22, -inf  ;;  %v357_v48 = vld [vmem:[%s4557_s25 + $0xc8] sm:$0xff] }
  0xed   : > { %2510 = vrot.lane.b32.xlu1 %v5125_v53, %s4402_s17  ;;  %v1702_v40 = vrot.slane %v1701_v10, 2  ;;  %v1715_v51 = vmax.f32 %v1713_v59, %v1714_v28  ;;  %v1721_v0 = vrot.slane %v1720_v24, 4  ;;  %v1727_v35 = vsel %vm1068_vm0, %v5108_v43, -inf }
  0xee   : > { %v1690_v7 = vrot.slane %v1689_v33, 1  ;;  %v1696_v46 = vmax.f32 %v1694_v32, %v1695_v5  ;;  %v1709_v2 = vrot.slane %v1708_v63, 2  ;;  %v1728_v36 = vrot.slane %v1727_v35, 4  ;;  %v358_v5 = vld [vmem:[%s4557_s25 + $0xd0] sm:$0xff] }
  0xef   : > { %v1703_v34 = vmax.f32 %v1701_v10, %v1702_v40  ;;  %v1716_v42 = vrot.slane %v1715_v51, 2  ;;  %v1722_v61 = vmax.f32 %v1720_v24, %v1721_v0  ;;  %v1734_v56 = vsel %vm1068_vm0, %v803_v11, -inf }
  0xf0   : > { %v1691_v22 = vmax.f32 %v1689_v33, %v1690_v7  ;;  %v1697_v29 = vrot.slane %v1696_v46, 1  ;;  %v1710_v41 = vmax.f32 %v1708_v63, %v1709_v2  ;;  %v1729_v13 = vmax.f32 %v1727_v35, %v1728_v36 }
  0xf1   : > { %2530 = vrot.lane.b32.xlu1 %v4883_v14, %s6037_s21  ;;  %v1704_v15 = vrot.slane %v1703_v34, 1  ;;  %v1717_v60 = vmax.f32 %v1715_v51, %v1716_v42  ;;  %v1723_v21 = vrot.slane %v1722_v61, 2  ;;  %v1735_v27 = vrot.slane %v1734_v56, 4  ;;  %v359_v51 = vld [vmem:[%s4557_s25 + $0xd8] sm:$0xff] }
  0xf2   : > { %v1698_v19 = vmax.f32 %v1696_v46, %v1697_v29  ;;  %v1711_v31 = vrot.slane %v1710_v41, 1  ;;  %v1730_v57 = vrot.slane %v1729_v13, 2  ;;  %v2005_v43 = vmax.f32 %v5127_v25, %v1691_v22 }
  0xf3   : > { %v1705_v3 = vmax.f32 %v1703_v34, %v1704_v15  ;;  %v1718_v11 = vrot.slane %v1717_v60, 1  ;;  %v1724_v49 = vmax.f32 %v1722_v61, %v1723_v21  ;;  %v1736_v52 = vmax.f32 %v1734_v56, %v1735_v27  ;;  %v4312_v27 = vld [vmem:[%s6028_s1] sm:$0xff]  }
  0xf4   : > { %v1712_v55 = vmax.f32 %v1710_v41, %v1711_v31  ;;  %v1731_v37 = vmax.f32 %v1729_v13, %v1730_v57  ;;  %v2006_v14 = vmax.f32 %v5129_v18, %v1698_v19  ;;  %v5178_v47 = vpack.c.bf16 %v2339_v38, %v2339_v38  ;;  %4165 = vmatprep.subr.bf16.mxu0 %v4312_v27 }
  0xf5   : > { %2370 = vrot.lane.b32.xlu1 %v5125_v53, %s4396_s26  ;;  %v1719_v8 = vmax.f32 %v1717_v60, %v1718_v11  ;;  %v1725_v23 = vrot.slane %v1724_v49, 1  ;;  %v1737_v62 = vrot.slane %v1736_v52, 2  ;;  %v2007_v25 = vmax.f32 %v5133_v9, %v1705_v3  ;;  %4166 = vmatpush3.bf16.msra.mxu0 %v4312_v27 }
  0xf6   : > { %v1732_v30 = vrot.slane %v1731_v37, 1  ;;  %v2008_v12 = vmax.f32 %v5137_v44, %v1712_v55  ;;  %v2169_v17 = vsel %vm2127_vm2, %v2006_v14, %v2005_v43  ;;  %v804_v32 = vcombine.high %v356_v54, %v356_v54 }
  0xf7   : > { %v1726_v18 = vmax.f32 %v1724_v49, %v1725_v23  ;;  %v1738_v20 = vmax.f32 %v1736_v52, %v1737_v62  ;;  %v2009_v59 = vmax.f32 %v5145_v58, %v1719_v8  ;;  %v2170_v10 = vsel %vm2129_vm3, %v2007_v25, %v2169_v17  ;;  %v4314_v25 = vld [vmem:[%s6028_s1 + $0x10] sm:$0xff]  }
  0xf8   : > { %v1733_v28 = vmax.f32 %v1731_v37, %v1732_v30  ;;  %v2171_v33 = vsel %vm2131_vm4, %v2008_v12, %v2170_v10  ;;  %v811_v9 = vrot.slane %v356_v54, %v4560_v6  ;;  %v818_v63 = vrot.slane %v804_v32, %v4560_v6 }
  0xf9   : > { %v1739_v44 = vrot.slane %v1738_v20, 1  ;;  %v2010_v24 = vmax.f32 %v5147_v39, %v1726_v18  ;;  %v2172_v40 = vsel %vm2133_vm5, %v2009_v59, %v2171_v33  ;;  %2534 = vrot.lane.b32.xlu1 %v5178_v47, %s6037_s21  ;;  %v821_v58 = vcombine.high %v357_v48, %v357_v48 }
  0xfa   : > { %v2011_v0 = vmax.f32 %v5157_v45, %v1733_v28  ;;  %v819_v35 = vcombine.high %v811_v9, %v811_v9  ;;  %v828_v7 = vrot.slane %v357_v48, %v4560_v6  ;;  %v838_v34 = vcombine.high %v358_v5, %v358_v5 }
  0xfb   : > { %v1740_v46 = vmax.f32 %v1738_v20, %v1739_v44  ;;  %v2173_v2 = vsel %vm2135_vm6, %v2010_v24, %v2172_v40  ;;  %v835_v36 = vrot.slane %v821_v58, %v4560_v6  ;;  %v820_v42 = vcombine.high %v818_v63, %v818_v63  ;;  %v4315_v40 = vld [vmem:[%s6028_s1 + $0x18] sm:$0xff]  }
  0xfc   : > { %v2174_v39 = vsel %vm2137_vm7, %v2011_v0, %v2173_v2  ;;  %v5203_v61 = vrot.slane %v358_v5, %v4560_v6  ;;  %v855_v56 = vcombine.high %v359_v51, %v359_v51  ;;  %v836_v29 = vcombine.high %v828_v7, %v828_v7 }
  0xfd   : > { %v2012_v22 = vmax.f32 %v5159_v16, %v1740_v46  ;;  %v5207_v45 = vrot.slane %v838_v34, %v4560_v6  ;;  %v5210_v41 = vrot.slane %v359_v51, %v4560_v6  ;;  %v837_v13 = vcombine.high %v835_v36, %v835_v36  ;;  %v4313_v16 = vld [vmem:[%s6028_s1 + $0x8] sm:$0xff]  }
  0xfe   : > { %v853_v15 = vcombine.high %v5203_v61, %v5203_v61  ;;  %v1741_v60 = vsel %vm1068_vm0, %v811_v9, -inf  ;;  %v1748_v21 = vsel %vm1068_vm0, %v819_v35, -inf  ;;  %v5226_v31 = vrot.slane %v855_v56, %v4560_v6  ;;  %4167 = vmatprep.subr.bf16.mxu0 %v4313_v16 }
  0xff   : > { %v2175_v38 = vsel %vm2139_vm8, %v2012_v22, %v2174_v39  ;;  %v854_v19 = vcombine.high %v5207_v45, %v5207_v45  ;;  %v1742_v57 = vrot.slane %v1741_v60, 4  ;;  %v870_v43 = vcombine.high %v5210_v41, %v5210_v41  ;;  %4168 = vmatpush3.bf16.msra.mxu0 %v4313_v16 }
 0x100   : > { %2204 = vst.msk [vmem:[#allocation2 + $0x61] sm:$0xff] %vm2042_vm1, %v2175_v38  ;;  %v1749_v3 = vrot.slane %v1748_v21, 4  ;;  %v1755_v11 = vsel %vm1068_vm0, %v818_v63, -inf  ;;  %v1762_v49 = vsel %vm1068_vm0, %v820_v42, -inf  ;;  %v1769_v37 = vsel %vm1068_vm0, %v828_v7, -inf  ;;  %4169 = vmatprep.subr.bf16.mxu0 %v4314_v25 }
 0x101   : > { %v1743_v52 = vmax.f32 %v1741_v60, %v1742_v57  ;;  %v1756_v54 = vrot.slane %v1755_v11, 4  ;;  %v1763_v55 = vrot.slane %v1762_v49, 4  ;;  %v1770_v8 = vrot.slane %v1769_v37, 4 }
 0x102   : > { %v1750_v14 = vmax.f32 %v1748_v21, %v1749_v3  ;;  %v1776_v23 = vsel %vm1068_vm0, %v836_v29, -inf  ;;  %v1783_v62 = vsel %vm1068_vm0, %v835_v36, -inf  ;;  %v1790_v59 = vsel %vm1068_vm0, %v837_v13, -inf  ;;  %v5247_v29 = vpop.permute.xlu0 %2360 }
 0x103   : > { %v1744_v30 = vrot.slane %v1743_v52, 2  ;;  %v1757_v12 = vmax.f32 %v1755_v11, %v1756_v54  ;;  %v1764_v17 = vmax.f32 %v1762_v49, %v1763_v55  ;;  %v1777_v48 = vrot.slane %v1776_v23, 4  ;;  %4170 = vmatpush3.bf16.msra.mxu0 %v4314_v25 }
 0x104   : > { %v1751_v32 = vrot.slane %v1750_v14, 2  ;;  %v1771_v18 = vmax.f32 %v1769_v37, %v1770_v8  ;;  %v1784_v20 = vrot.slane %v1783_v62, 4  ;;  %v1791_v24 = vrot.slane %v1790_v59, 4  ;;  %4171 = vmatprep.subr.bf16.mxu0 %v4315_v40 }
 0x105   : > { %v1745_v10 = vmax.f32 %v1743_v52, %v1744_v30  ;;  %v1758_v28 = vrot.slane %v1757_v12, 2  ;;  %v1765_v33 = vrot.slane %v1764_v17, 2  ;;  %v1778_v5 = vmax.f32 %v1776_v23, %v1777_v48 }
 0x106   : > { %v1752_v9 = vmax.f32 %v1750_v14, %v1751_v32  ;;  %v1772_v63 = vrot.slane %v1771_v18, 2  ;;  %v1785_v44 = vmax.f32 %v1783_v62, %v1784_v20  ;;  %v871_v39 = vcombine.high %v5226_v31, %v5226_v31 }
 0x107   : > { %v2229_v51 = vld [vmem:[#allocation2 + $0x61] sm:$0xff]  ;;  %v1746_v58 = vrot.slane %v1745_v10, 1  ;;  %v1759_v0 = vmax.f32 %v1757_v12, %v1758_v28  ;;  %v1766_v35 = vmax.f32 %v1764_v17, %v1765_v33  ;;  %v1779_v7 = vrot.slane %v1778_v5, 2  ;;  %4172 = vmatpush3.bf16.msra.mxu0 %v4315_v40 }
 0x108   : > { %v5243_v46 = vpack.c.bf16 %v2229_v51, %v2229_v51  ;;  %v1753_v2 = vrot.slane %v1752_v9, 1  ;;  %v1773_v36 = vmax.f32 %v1771_v18, %v1772_v63  ;;  %v1786_v34 = vrot.slane %v1785_v44, 2 }
 0x109   : > { %v1760_v42 = vrot.slane %v1759_v0, 1  ;;  %v1767_v56 = vrot.slane %v1766_v35, 1  ;;  %v1780_v22 = vmax.f32 %v1778_v5, %v1779_v7  ;;  %v5251_v13 = vmax.f32 %v1745_v10, %v1746_v58 }
 0x10a   : > { %2372 = vrot.lane.b32.xlu0 %v5243_v46, %s4396_s26  ;;  %v1774_v60 = vrot.slane %v1773_v36, 1  ;;  %v1787_v21 = vmax.f32 %v1785_v44, %v1786_v34  ;;  %v1792_v27 = vmax.f32 %v1790_v59, %v1791_v24  ;;  %v5253_v16 = vmax.f32 %v1752_v9, %v1753_v2 }
 0x10b   : > { %v5255_v38 = vmax.f32 %v1759_v0, %v1760_v42  ;;  %v1781_v57 = vrot.slane %v1780_v22, 1  ;;  %v1797_v3 = vsel %vm1068_vm0, %v5203_v61, -inf  ;;  %v5259_v11 = vmax.f32 %v1766_v35, %v1767_v56 }
 0x10c   : > { %v1788_v49 = vrot.slane %v1787_v21, 1  ;;  %v1793_v52 = vrot.slane %v1792_v27, 2  ;;  %v1798_v54 = vrot.slane %v1797_v3, 4  ;;  %v5261_v55 = vmax.f32 %v1773_v36, %v1774_v60  ;;  %v5293_v36 = vpop.permute.xlu1 %2364 }
 0x10d   : > { %v1804_v37 = vsel %vm1068_vm0, %v853_v15, -inf  ;;  %v1811_v14 = vsel %vm1068_vm0, %v5207_v45, -inf  ;;  %v1818_v8 = vsel %vm1068_vm0, %v854_v19, -inf  ;;  %v5275_v23 = vmax.f32 %v1780_v22, %v1781_v57  ;;  %v5285_v19 = vpop.permute.xlu0 %2384 }
 0x10e   : > { %2392 = vrot.lane.b32.xlu0 %v5005_v26, %s4397_s27  ;;  %v5277_v62 = vmax.f32 %v1792_v27, %v1793_v52  ;;  %v1799_v25 = vmax.f32 %v1797_v3, %v1798_v54  ;;  %v1805_v61 = vrot.slane %v1804_v37, 4  ;;  %v1812_v30 = vrot.slane %v1811_v14, 4  ;;  %v2245_v3 = vld [vmem:[#allocation2 + $0x62] sm:$0xff] }
 0x10f   : > { %v1819_v15 = vrot.slane %v1818_v8, 4  ;;  %v1825_v12 = vsel %vm1068_vm0, %v5210_v41, -inf  ;;  %v1832_v45 = vsel %vm1068_vm0, %v870_v43, -inf  ;;  %v5287_v17 = vmax.f32 %v1787_v21, %v1788_v49 }
 0x110   : > { %v1800_v26 = vrot.slane %v1799_v25, 2  ;;  %v1806_v48 = vmax.f32 %v1804_v37, %v1805_v61  ;;  %v1826_v32 = vrot.slane %v1825_v12, 4  ;;  %v1813_v18 = vmax.f32 %v1811_v14, %v1812_v30 }
 0x111   : > { %v1820_v20 = vmax.f32 %v1818_v8, %v1819_v15  ;;  %v1833_v59 = vrot.slane %v1832_v45, 4  ;;  %v1839_v10 = vsel %vm1068_vm0, %v5226_v31, -inf  ;;  %v1795_v28 = vrot.slane %v5277_v62, 1  ;;  %v5295_v31 = vpop.permute.xlu0 %2362 }
 0x112   : > { %v1801_v33 = vmax.f32 %v1799_v25, %v1800_v26  ;;  %v1807_v5 = vrot.slane %v1806_v48, 2  ;;  %v1827_v41 = vmax.f32 %v1825_v12, %v1826_v32  ;;  %v1814_v9 = vrot.slane %v1813_v18, 2 }
 0x113   : > { %v1821_v43 = vrot.slane %v1820_v20, 2  ;;  %v1834_v63 = vmax.f32 %v1832_v45, %v1833_v59  ;;  %v1840_v44 = vrot.slane %v1839_v10, 4  ;;  %v1846_v58 = vsel %vm1068_vm0, %v871_v39, -inf  ;;  %v360_v45 = vld [vmem:[%s4557_s25 + $0xe0] sm:$0xff] }
 0x114   : > { %v1802_v24 = vrot.slane %v1801_v33, 1  ;;  %v1808_v40 = vmax.f32 %v1806_v48, %v1807_v5  ;;  %v1828_v51 = vrot.slane %v1827_v41, 2  ;;  %v1815_v0 = vmax.f32 %v1813_v18, %v1814_v9 }
 0x115   : > { %v1822_v35 = vmax.f32 %v1820_v20, %v1821_v43  ;;  %v1835_v7 = vrot.slane %v1834_v63, 2  ;;  %v1841_v2 = vmax.f32 %v1839_v10, %v1840_v44  ;;  %v1847_v22 = vrot.slane %v1846_v58, 4  ;;  %v361_v20 = vld [vmem:[%s4557_s25 + $0xe8] sm:$0xff]  ;;  %v5307_v59 = vpop.permute.xlu0 %2388  ;;  %v362_v44 = vld [vmem:[%s4557_s25 + $0xf0] sm:$0xff] }
 0x116   : > { %v1803_v34 = vmax.f32 %v1801_v33, %v1802_v24  ;;  %v1809_v42 = vrot.slane %v1808_v40, 1  ;;  %v1829_v56 = vmax.f32 %v1827_v41, %v1828_v51  ;;  %v1816_v60 = vrot.slane %v1815_v0, 1 }
 0x117   : > { %v1823_v21 = vrot.slane %v1822_v35, 1  ;;  %v1836_v27 = vmax.f32 %v1834_v63, %v1835_v7  ;;  %v1842_v57 = vrot.slane %v1841_v2, 2  ;;  %v1848_v52 = vmax.f32 %v1846_v58, %v1847_v22 }
 0x118   : > { %v1810_v49 = vmax.f32 %v1808_v40, %v1809_v42  ;;  %v1830_v39 = vrot.slane %v1829_v56, 1  ;;  %v2013_v54 = vmax.f32 %v5251_v13, %v1803_v34  ;;  %v1817_v37 = vmax.f32 %v1815_v0, %v1816_v60  ;;  %v5305_v13 = vpop.permute.xlu1 %2366  ;;  %v363_v40 = vld [vmem:[%s4557_s25 + $0xf8] sm:$0xff]  ;;  %s4408_s25 = smov 80  }
 0x119   : > { %v1824_v14 = vmax.f32 %v1822_v35, %v1823_v21  ;;  %v1837_v8 = vrot.slane %v1836_v27, 1  ;;  %v1843_v25 = vmax.f32 %v1841_v2, %v1842_v57  ;;  %v1849_v30 = vrot.slane %v1848_v52, 2  ;;  %v2260_v35 = vld [vmem:[#allocation2 + $0x60] sm:$0xff] }
 0x11a   : > { %v1831_v61 = vmax.f32 %v1829_v56, %v1830_v39  ;;  %v2014_v15 = vmax.f32 %v5253_v16, %v1810_v49  ;;  %v5299_v12 = vpack.c.bf16 %v2245_v3, %v2245_v3  ;;  %v2015_v32 = vmax.f32 %v5255_v38, %v1817_v37  ;;  %v5331_v56 = vpop.permute.xlu0 %2408 }
 0x11b   : > { %v1838_v26 = vmax.f32 %v1836_v27, %v1837_v8  ;;  %v1844_v48 = vrot.slane %v1843_v25, 1  ;;  %v2016_v18 = vmax.f32 %v5259_v11, %v1824_v14  ;;  %v1796_v10 = vmax.f32 %v5277_v62, %v1795_v28 }
 0x11c   : > { %v1850_v33 = vmax.f32 %v1848_v52, %v1849_v30  ;;  %v2017_v16 = vmax.f32 %v5261_v55, %v1831_v61  ;;  %v2176_v5 = vsel %vm2127_vm2, %v2014_v15, %v2013_v54  ;;  %2396 = vrot.lane.b32.xlu0 %v5299_v12, %s4397_s27  ;;  %v872_v9 = vcombine.high %v360_v45, %v360_v45  ;;  %v5329_v42 = vpop.permute.xlu1 %2386 }
 0x11d   : > { %v1845_v38 = vmax.f32 %v1843_v25, %v1844_v48  ;;  %v2018_v41 = vmax.f32 %v5275_v23, %v1838_v26  ;;  %v2177_v11 = vsel %vm2129_vm3, %v2015_v32, %v2176_v5  ;;  %v879_v62 = vrot.slane %v360_v45, %v4560_v6 }
 0x11e   : > { %v1851_v43 = vrot.slane %v1850_v33, 1  ;;  %v2178_v63 = vsel %vm2131_vm4, %v2016_v18, %v2177_v11  ;;  %v889_v28 = vcombine.high %v361_v20, %v361_v20  ;;  %v886_v51 = vrot.slane %v872_v9, %v4560_v6 }
 0x11f   : > { %v2019_v55 = vmax.f32 %v5287_v17, %v1845_v38  ;;  %v2179_v24 = vsel %vm2133_vm5, %v2017_v16, %v2178_v63  ;;  %v896_v58 = vrot.slane %v361_v20, %v4560_v6  ;;  %v887_v7 = vcombine.high %v879_v62, %v879_v62 }
 0x120   : > { %v1852_v23 = vmax.f32 %v1850_v33, %v1851_v43  ;;  %v2180_v0 = vsel %vm2135_vm6, %v2018_v41, %v2179_v24  ;;  %2416 = vrot.lane.b32.xlu0 %v5123_v50, %s4398_s28  ;;  %v903_v2 = vrot.slane %v889_v28, %v4560_v6  ;;  %v906_v17 = vcombine.high %v362_v44, %v362_v44  ;;  %v5355_v20 = vpop.permute.xlu1 %2390 }
 0x121   : > { %v2181_v34 = vsel %vm2137_vm7, %v2019_v55, %v2180_v0  ;;  %v888_v60 = vcombine.high %v886_v51, %v886_v51  ;;  %v923_v21 = vcombine.high %v363_v40, %v363_v40  ;;  %v5333_v27 = vpack.c.bf16 %v2260_v35, %v2260_v35 }
 0x122   : > { %v2020_v22 = vmax.f32 %v1796_v10, %v1852_v23  ;;  %v904_v57 = vcombine.high %v896_v58, %v896_v58  ;;  %v1853_v3 = vsel %vm1068_vm0, %v879_v62, -inf  ;;  %v1860_v50 = vsel %vm1068_vm0, %v887_v7, -inf  ;;  %v5357_v10 = vpop.permute.xlu0 %2412 }
 0x123   : > { %v905_v39 = vcombine.high %v903_v2, %v903_v2  ;;  %v5339_v52 = vrot.slane %v362_v44, %v4560_v6  ;;  %v1854_v54 = vrot.slane %v1853_v3, 4  ;;  %v5343_v37 = vrot.slane %v906_v17, %v4560_v6 }
 0x124   : > { %v2182_v49 = vsel %vm2139_vm8, %v2020_v22, %v2181_v34  ;;  %v5346_v14 = vrot.slane %v363_v40, %v4560_v6  ;;  %v1861_v8 = vrot.slane %v1860_v50, 4  ;;  %v1867_v25 = vsel %vm1068_vm0, %v886_v51, -inf }
 0x125   : > { %2205 = vst.msk [vmem:[#allocation2 + $0x71] sm:$0xff] %vm2042_vm1, %v2182_v49  ;;  %v5350_v61 = vrot.slane %v923_v21, %v4560_v6  ;;  %v1855_v30 = vmax.f32 %v1853_v3, %v1854_v54  ;;  %v1868_v15 = vrot.slane %v1867_v25, 4  ;;  %v1874_v45 = vsel %vm1068_vm0, %v888_v60, -inf  ;;  %v5369_v21 = vpop.permute.xlu1 %2410 }
 0x126   : > { %v1862_v26 = vmax.f32 %v1860_v50, %v1861_v8  ;;  %v1875_v48 = vrot.slane %v1874_v45, 4  ;;  %v1881_v32 = vsel %vm1068_vm0, %v896_v58, -inf  ;;  %v1888_v18 = vsel %vm1068_vm0, %v904_v57, -inf  ;;  %v5371_v57 = vpop.permute.xlu0 %2432 }
 0x127   : > { %v1856_v33 = vrot.slane %v1855_v30, 2  ;;  %v1869_v16 = vmax.f32 %v1867_v25, %v1868_v15  ;;  %v1882_v5 = vrot.slane %v1881_v32, 4  ;;  %v1889_v38 = vrot.slane %v1888_v18, 4 }
 0x128   : > { %v1863_v6 = vrot.slane %v1862_v26, 2  ;;  %v1876_v41 = vmax.f32 %v1874_v45, %v1875_v48  ;;  %v1895_v11 = vsel %vm1068_vm0, %v903_v2, -inf  ;;  %v1902_v9 = vsel %vm1068_vm0, %v905_v39, -inf }
 0x129   : > { %v1857_v43 = vmax.f32 %v1855_v30, %v1856_v33  ;;  %v1870_v63 = vrot.slane %v1869_v16, 2  ;;  %v1883_v44 = vmax.f32 %v1881_v32, %v1882_v5  ;;  %v1890_v62 = vmax.f32 %v1888_v18, %v1889_v38 }
 0x12a   : > { %v1864_v28 = vmax.f32 %v1862_v26, %v1863_v6  ;;  %v1877_v55 = vrot.slane %v1876_v41, 2  ;;  %v1896_v24 = vrot.slane %v1895_v11, 4  ;;  %v1903_v40 = vrot.slane %v1902_v9, 4 }
 0x12b   : > { %v1858_v23 = vrot.slane %v1857_v43, 1  ;;  %v1871_v0 = vmax.f32 %v1869_v16, %v1870_v63  ;;  %v1884_v35 = vrot.slane %v1883_v44, 2  ;;  %v1891_v7 = vrot.slane %v1890_v62, 2 }
 0x12c   : > { %v2230_v51 = vld [vmem:[#allocation2 + $0x71] sm:$0xff]  ;;  %v921_v22 = vcombine.high %v5339_v52, %v5339_v52  ;;  %v922_v60 = vcombine.high %v5343_v37, %v5343_v37  ;;  %v1865_v3 = vrot.slane %v1864_v28, 1  ;;  %v1878_v49 = vmax.f32 %v1876_v41, %v1877_v55 }
 0x12d   : > { %v2261_v58 = vld [vmem:[#allocation2 + $0x70] sm:$0xff]  ;;  %v5361_v34 = vpack.c.bf16 %v2230_v51, %v2230_v51  ;;  %v1872_v50 = vrot.slane %v1871_v0, 1  ;;  %v1885_v39 = vmax.f32 %v1883_v44, %v1884_v35  ;;  %v938_v54 = vcombine.high %v5346_v14, %v5346_v14  ;;  %v5403_v44 = vpop.permute.xlu0 %2436 }
 0x12e   : > { %v2246_v17 = vld [vmem:[#allocation2 + $0x72] sm:$0xff]  ;;  %v5363_v2 = vpack.c.bf16 %v2261_v58, %v2261_v58  ;;  %v5379_v8 = vmax.f32 %v1890_v62, %v1891_v7  ;;  %v1897_v25 = vmax.f32 %v1895_v11, %v1896_v24  ;;  %v1909_v30 = vsel %vm1068_vm0, %v5339_v52, -inf }
 0x12f   : > { %2374 = vrot.lane.b32.xlu1 %v5361_v34, %s4396_s26  ;;  %v5383_v15 = vpack.c.bf16 %v2246_v17, %v2246_v17  ;;  %v939_v45 = vcombine.high %v5350_v61, %v5350_v61  ;;  %v5387_v26 = vmax.f32 %v1857_v43, %v1858_v23  ;;  %v1904_v48 = vmax.f32 %v1902_v9, %v1903_v40 }
 0x130   : > { %2420 = vrot.lane.b32.xlu0 %v5363_v2, %s4398_s28  ;;  %v1879_v32 = vrot.slane %v1878_v49, 1  ;;  %v1898_v18 = vrot.slane %v1897_v25, 2  ;;  %v1910_v33 = vrot.slane %v1909_v30, 4  ;;  %v1916_v16 = vsel %vm1068_vm0, %v921_v22, -inf  ;;  %v5401_v63 = vpop.permute.xlu1 %2414 }
 0x131   : > { %v5390_v5 = vmax.f32 %v1864_v28, %v1865_v3  ;;  %v5392_v38 = vmax.f32 %v1871_v0, %v1872_v50  ;;  %v1886_v6 = vrot.slane %v1885_v39, 1  ;;  %v1917_v41 = vrot.slane %v1916_v16, 4 }
 0x132   : > { %v1893_v52 = vrot.slane %v5379_v8, 1  ;;  %v1905_v11 = vrot.slane %v1904_v48, 2  ;;  %v1911_v9 = vmax.f32 %v1909_v30, %v1910_v33  ;;  %v1923_v43 = vsel %vm1068_vm0, %v5343_v37, -inf }
 0x133   : > { %2394 = vrot.lane.b32.xlu1 %v5178_v47, %s4397_s27  ;;  %v5405_v62 = vmax.f32 %v1897_v25, %v1898_v18  ;;  %v1918_v28 = vmax.f32 %v1916_v16, %v1917_v41  ;;  %v1924_v55 = vrot.slane %v1923_v43, 4  ;;  %v1930_v24 = vsel %vm1068_vm0, %v922_v60, -inf  ;;  %v5426_v18 = vpop.permute.xlu0 %2456 }
 0x134   : > { %2440 = vrot.lane.b32.xlu0 %v5125_v53, %s4399_s29  ;;  %v5408_v40 = vmax.f32 %v1878_v49, %v1879_v32  ;;  %v1912_v53 = vrot.slane %v1911_v9, 2  ;;  %v1931_v51 = vrot.slane %v1930_v24, 4  ;;  %v1937_v58 = vsel %vm1068_vm0, %v5346_v14, -inf }
 0x135   : > { %v5412_v23 = vmax.f32 %v1885_v39, %v1886_v6  ;;  %v1919_v37 = vrot.slane %v1918_v28, 2  ;;  %v1925_v0 = vmax.f32 %v1923_v43, %v1924_v55  ;;  %v1938_v35 = vrot.slane %v1937_v58, 4 }
 0x136   : > { %v5416_v7 = vmax.f32 %v1904_v48, %v1905_v11  ;;  %v1913_v17 = vmax.f32 %v1911_v9, %v1912_v53  ;;  %v1932_v22 = vmax.f32 %v1930_v24, %v1931_v51  ;;  %v1944_v60 = vsel %vm1068_vm0, %v938_v54, -inf  ;;  %v5424_v48 = vpop.permute.xlu1 %2434 }
 0x137   : > { %2398 = vrot.lane.b32.xlu1 %v5383_v15, %s4397_s27  ;;  %v1900_v3 = vrot.slane %v5405_v62, 1  ;;  %v1920_v14 = vmax.f32 %v1918_v28, %v1919_v37  ;;  %v1926_v50 = vrot.slane %v1925_v0, 2  ;;  %v1939_v49 = vmax.f32 %v1937_v58, %v1938_v35 }
 0x138   : > { %2444 = vrot.lane.b32.xlu0 %v5361_v34, %s4399_s29  ;;  %v1914_v39 = vrot.slane %v1913_v17, 1  ;;  %v1933_v25 = vrot.slane %v1932_v22, 2  ;;  %v1945_v30 = vrot.slane %v1944_v60, 4  ;;  %v1951_v32 = vsel %vm1068_vm0, %v5350_v61, -inf }
 0x139   : > { %v1921_v33 = vrot.slane %v1920_v14, 1  ;;  %v1927_v54 = vmax.f32 %v1925_v0, %v1926_v50  ;;  %v1940_v16 = vrot.slane %v1939_v49, 2  ;;  %v1952_v6 = vrot.slane %v1951_v32, 4 }
 0x13a   : > { %v1915_v41 = vmax.f32 %v1913_v17, %v1914_v39  ;;  %v1934_v11 = vmax.f32 %v1932_v22, %v1933_v25  ;;  %v1946_v9 = vmax.f32 %v1944_v60, %v1945_v30  ;;  %v1958_v43 = vsel %vm1068_vm0, %v939_v45, -inf }
 0x13b   : > { %2418 = vrot.lane.b32.xlu1 %v5333_v27, %s4398_s28  ;;  %v1922_v61 = vmax.f32 %v1920_v14, %v1921_v33  ;;  %v1928_v28 = vrot.slane %v1927_v54, 1  ;;  %v1941_v55 = vmax.f32 %v1939_v49, %v1940_v16  ;;  %v1953_v24 = vmax.f32 %v1951_v32, %v1952_v6  ;;  %v5440_v14 = vpop.permute.xlu0 %2460 }
 0x13c   : > { %2464 = vrot.lane.b32.xlu0 %v5178_v47, %s4400_s14  ;;  %v1935_v53 = vrot.slane %v1934_v11, 1  ;;  %v1947_v51 = vrot.slane %v1946_v9, 2  ;;  %v1959_v58 = vrot.slane %v1958_v43, 4  ;;  %v2021_v37 = vmax.f32 %v5387_v26, %v1915_v41  ;;  %v5438_v47 = vpop.permute.xlu1 %2438 }
 0x13d   : > { %v1929_v0 = vmax.f32 %v1927_v54, %v1928_v28  ;;  %v1942_v35 = vrot.slane %v1941_v55, 1  ;;  %v1954_v50 = vrot.slane %v1953_v24, 2  ;;  %v2022_v17 = vmax.f32 %v5390_v5, %v1922_v61 }
 0x13e   : > { %v1894_v22 = vmax.f32 %v5379_v8, %v1893_v52  ;;  %v1936_v45 = vmax.f32 %v1934_v11, %v1935_v53  ;;  %v1948_v60 = vmax.f32 %v1946_v9, %v1947_v51  ;;  %v1960_v39 = vmax.f32 %v1958_v43, %v1959_v58 }
 0x13f   : > { %v1943_v49 = vmax.f32 %v1941_v55, %v1942_v35  ;;  %v1955_v25 = vmax.f32 %v1953_v24, %v1954_v50  ;;  %v2023_v26 = vmax.f32 %v5392_v38, %v1929_v0  ;;  %v2183_v30 = vsel %vm2127_vm2, %v2022_v17, %v2021_v37  ;;  %v2481_v61 = vpop.permute.xlu0 %2480 }
 0x140   : > { %2468 = vrot.lane.b32.xlu0 %v5383_v15, %s4400_s14  ;;  %v1907_v5 = vrot.slane %v5416_v7, 1  ;;  %v1949_v32 = vrot.slane %v1948_v60, 1  ;;  %v1961_v8 = vrot.slane %v1960_v39, 2  ;;  %v2024_v52 = vmax.f32 %v5408_v40, %v1936_v45 }
 0x141   : > { %v1901_v33 = vmax.f32 %v5405_v62, %v1900_v3  ;;  %v1956_v54 = vrot.slane %v1955_v25, 1  ;;  %v2025_v16 = vmax.f32 %v5412_v23, %v1943_v49  ;;  %v2184_v6 = vsel %vm2129_vm3, %v2023_v26, %v2183_v30  ;;  %v2459_v3 = vpop.permute.xlu1 %2458 }
 0x142   : > { %v1950_v41 = vmax.f32 %v1948_v60, %v1949_v32  ;;  %v1962_v11 = vmax.f32 %v1960_v39, %v1961_v8  ;;  %v2185_v9 = vsel %vm2131_vm4, %v2024_v52, %v2184_v6  ;;  %v1908_v62 = vmax.f32 %v5416_v7, %v1907_v5  ;;  %v4316_v7 = vld [vmem:[%s6028_s1 + $0x20] ss:$0 sps:$4 sm:$0xff]   ;;  %v2208_v39 = vld [vmem:[#allocation2 + $0x10] sm:$0xff] }
 0x143   : > { %v1957_v38 = vmax.f32 %v1955_v25, %v1956_v54  ;;  %v2186_v43 = vsel %vm2133_vm5, %v2025_v16, %v2185_v9  ;;  %v5479_v0 = vpop.permute.xlu0 %2484  ;;  %4223 = vmatprep.subr.msk.bf16.mxu0 %vm2747_vm10, %v4316_v7  ;;  %v2749_v17 = vsel %vm2747_vm10, %v4316_v7, 0  ;;  %v2207_v60 = vld [vmem:[#allocation2] sm:$0xff]  ;;  %v2216_v26 = vpack.c.bf16 %v2208_v39, %v2208_v39  ;;  %v2327_v39 = vld [vmem:[#allocation2 + $0x91] sm:$0xff] }
 0x144   : > { %2488 = vrot.lane.b32.xlu0 %v5333_v27, %s4401_s16  ;;  %v1963_v40 = vrot.slane %v1962_v11, 1  ;;  %v2026_v23 = vmax.f32 %v1894_v22, %v1950_v41  ;;  %4174 = vmatpush3.bf16.msra.mxu0 %v2749_v17  ;;  %v2215_v25 = vpack.c.bf16 %v2207_v60, %v2207_v60  ;;  %v2209_v54 = vld [vmem:[#allocation2 + $0x20] sm:$0xff]  ;;  %v2210_v41 = vld [vmem:[#allocation2 + $0x30] sm:$0xff]  ;;  %vm2670_vm0 = vcmask 523264  }
 0x145   : > { %v2027_v28 = vmax.f32 %v1901_v33, %v1957_v38  ;;  %v5477_v37 = vpop.permute.xlu1 %2462  ;;  %v2549_v52 = vsel %vm2042_vm1, %v2216_v26, %v5295_v31  ;;  %v2217_v38 = vpack.c.bf16 %v2209_v54, %v2209_v54  ;;  %vm2734_vm2 = vcmask 588800  }
 0x146   : > { %v1964_v55 = vmax.f32 %v1962_v11, %v1963_v40  ;;  %v2187_v24 = vsel %vm2135_vm6, %v2026_v23, %v2186_v43  ;;  %v2546_v8 = vsel %vm2042_vm1, %v2215_v25, %v5247_v29  ;;  %vm3100_vm3 = vcmask 123904  }
 0x147   : > { %v2188_v53 = vsel %vm2137_vm7, %v2027_v28, %v2187_v24  ;;  %v2505_v50 = vpop.permute.xlu0 %2504  ;;  %v2570_v6 = vsel %vm2568_vm9, %v2546_v8, %v5285_v19  ;;  %v2552_v24 = vsel %vm2042_vm1, %v2217_v38, %v5293_v36  ;;  %3101 = vst.msk [vmem:[#allocation3 + $0x8] sm:$0x3] %vm3100_vm3, %v4394_v1  ;;  %3103 = vst.msk [vmem:[#allocation3 + $0x18] sm:$0x3] %vm3100_vm3, %v4394_v1  ;;  %vm3514_vm4 = vcmask 654336  }
 0x148   : > { %v2028_v51 = vmax.f32 %v1908_v62, %v1964_v55  ;;  %v2587_v31 = vsel %vm2585_vm11, %v2570_v6, %v5331_v56  ;;  %v2218_v62 = vpack.c.bf16 %v2210_v41, %v2210_v41  ;;  %3105 = vst.msk [vmem:[#allocation3 + $0x28] sm:$0x3] %vm3100_vm3, %v4394_v1  ;;  %3107 = vst.msk [vmem:[#allocation3 + $0x38] sm:$0x3] %vm3100_vm3, %v4394_v1  ;;  %vm3531_vm5 = vcmask 785408  }
 0x149   : > { %v2483_v35 = vpop.permute.xlu1 %2482  ;;  %v2604_v43 = vsel %vm2602_vm12, %v2587_v31, %v5371_v57  ;;  %3109 = vst.msk [vmem:[#allocation3 + $0x48] sm:$0x3] %vm3100_vm3, %v4394_v1  ;;  %3111 = vst.msk [vmem:[#allocation3 + $0x58] sm:$0x3] %vm3100_vm3, %v4394_v1  ;;  %vm3548_vm6 = vcmask 916480  }
 0x14a   : > { %v2189_v58 = vsel %vm2139_vm8, %v2028_v51, %v2188_v53  ;;  %v2574_v53 = vsel %vm2568_vm9, %v2552_v24, %v5307_v59  ;;  %3113 = vst.msk [vmem:[#allocation3 + $0x68] sm:$0x3] %vm3100_vm3, %v4394_v1  ;;  %3115 = vst.msk [vmem:[#allocation3 + $0x78] sm:$0x3] %vm3100_vm3, %v4394_v1 }
 0x14b   : > { %2206 = vst.msk [vmem:[#allocation2 + $0x81] sm:$0xff] %vm2042_vm1, %v2189_v58  ;;  %v5489_v5 = vpop.permute.xlu0 %2508  ;;  %v2311_v58 = vld [vmem:[#allocation2 + $0x90] sm:$0xff]  ;;  %v2591_v7 = vsel %vm2585_vm11, %v2574_v53, %v5357_v10 }
 0x14c   : > { %v2319_v10 = vpack.c.bf16 %v2311_v58, %v2311_v58  ;;  %3117 = vst.msk [vmem:[#allocation3 + $0x88] sm:$0x3] %vm3100_vm3, %v4394_v1  ;;  %3119 = vst.msk [vmem:[#allocation3 + $0x98] sm:$0x3] %vm3100_vm3, %v4394_v1 }
 0x14f   : > { %v2529_v16 = vpop.permute.xlu0 %2528 }
 0x152   : > { %v2262_v22 = vld [vmem:[#allocation2 + $0x80] sm:$0xff] }
 0x153   : > { %v2270_v45 = vpack.c.bf16 %v2262_v22, %v2262_v22  ;;  %v2278_v49 = vld [vmem:[#allocation2 + $0x81] sm:$0xff]  ;;  %v5524_v28 = vpop.permute.xlu0 %2368 }
 0x154   : > { %v2286_v32 = vpack.c.bf16 %v2278_v49, %v2278_v49  ;;  %v2294_v29 = vld [vmem:[#allocation2 + $0x82] sm:$0xff]  ;;  %v2343_v49 = vld [vmem:[#allocation2 + $0x92] sm:$0xff] }
 0x155   : > { %2422 = vrot.lane.b32.xlu1 %v2270_v45, %s4398_s28  ;;  %2492 = vrot.lane.b32.xlu0 %v2270_v45, %s4401_s16  ;;  %v2302_v56 = vpack.c.bf16 %v2294_v29, %v2294_v29  ;;  %s6041_s28 = smov 64   ;;  %v2351_v25 = vpack.c.bf16 %v2343_v49, %v2343_v49 }
 0x157   : > { %v5487_v30 = vpop.permute.xlu1 %2486  ;;  %v2533_v17 = vpop.permute.xlu0 %2532 }
 0x159   : > { %2442 = vrot.lane.b32.xlu1 %v5243_v46, %s4399_s29  ;;  %2512 = vrot.lane.b32.xlu0 %v5243_v46, %s4402_s17  ;;  %v2572_v46 = vsel %vm2568_vm9, %v2549_v52, %v5329_v42  ;;  %v2621_v42 = vsel %vm2619_vm13, %v2604_v43, %v5426_v18 }
 0x15a   : > { %v2589_v11 = vsel %vm2585_vm11, %v2572_v46, %v5369_v21  ;;  %v2638_v21 = vsel %vm2636_vm14, %v2621_v42, %v2481_v61  ;;  %v2211_v42 = vld [vmem:[#allocation2 + $0x40] sm:$0xff] }
 0x15b   : > { %v2507_v33 = vpop.permute.xlu1 %2506  ;;  %v2606_v19 = vsel %vm2602_vm12, %v2589_v11, %v5424_v48  ;;  %v2655_v48 = vsel %vm2653_vm15, %v2638_v21, %v2505_v50  ;;  %v2219_v21 = vpack.c.bf16 %v2211_v42, %v2211_v42 }
 0x15c   : > { %v2623_v40 = vsel %vm2619_vm13, %v2606_v19, %v2459_v3  ;;  %v2672_v3 = vsel %vm2670_vm0, %v2655_v48, %v2529_v16 }
 0x15d   : > { %2446 = vrot.lane.b32.xlu1 %v2286_v32, %s4399_s29  ;;  %2516 = vrot.lane.b32.xlu0 %v2286_v32, %s4402_s17  ;;  %v2640_v57 = vsel %vm2636_vm14, %v2623_v40, %v2483_v35  ;;  %v2212_v40 = vld [vmem:[#allocation2 + $0x50] sm:$0xff] }
 0x15e   : > { %v2657_v23 = vsel %vm2653_vm15, %v2640_v57, %v2507_v33  ;;  %v2220_v57 = vpack.c.bf16 %v2212_v40, %v2212_v40 }
 0x15f   : > { %v2511_v9 = vpop.permute.xlu1 %2510 }
 0x161   : > { %2466 = vrot.lane.b32.xlu1 %v5299_v12, %s4400_s14  ;;  %2536 = vrot.lane.b32.xlu0 %v5299_v12, %s6041_s28  ;;  %v2555_v12 = vsel %vm2042_vm1, %v2218_v62, %v5305_v13  ;;  %v2608_v13 = vsel %vm2602_vm12, %v2591_v7, %v5403_v44 }
 0x162   : > { %v2576_v51 = vsel %vm2568_vm9, %v2555_v12, %v5355_v20  ;;  %v2625_v59 = vsel %vm2619_vm13, %v2608_v13, %v5440_v14 }
 0x163   : > { %v2531_v18 = vpop.permute.xlu1 %2530  ;;  %v2593_v36 = vsel %vm2585_vm11, %v2576_v51, %v5401_v63  ;;  %v2642_v63 = vsel %vm2636_vm14, %v2625_v59, %v5479_v0  ;;  %v2335_v0 = vpack.c.bf16 %v2327_v39, %v2327_v39 }
 0x164   : > { %v2674_v55 = vsel %vm2670_vm0, %v2657_v23, %v2531_v18  ;;  %v2610_v50 = vsel %vm2602_vm12, %v2593_v36, %v5438_v47  ;;  %v2659_v47 = vsel %vm2653_vm15, %v2642_v63, %v5489_v5  ;;  %v2558_v18 = vsel %vm2042_vm1, %v2219_v21, %v5524_v28 }
 0x165   : > { %v4091_v61 = vcombine.low %v2672_v3, %v2674_v55  ;;  %2470 = vrot.lane.b32.xlu1 %v2302_v56, %s4400_s14  ;;  %2540 = vrot.lane.b32.xlu0 %v2302_v56, %s6041_s28  ;;  %v2627_v20 = vsel %vm2619_vm13, %v2610_v50, %v5477_v37  ;;  %v2676_v45 = vsel %vm2670_vm0, %v2659_v47, %v2533_v17  ;;  %s4410_s14 = smov [#allocation4]  }
 0x166   : > { %v2644_v44 = vsel %vm2636_vm14, %v2627_v20, %v5487_v30 }
 0x167   : > { %v2371_v35 = vpop.permute.xlu1 %2370  ;;  %4175 = vmatprep.mubr.msk.bf16.mxu0 %vm2734_vm2, %v4091_v61  ;;  %v2661_v22 = vsel %vm2653_vm15, %v2644_v44, %v2511_v9 }
 0x168   : > { %v2561_v3 = vsel %vm2042_vm1, %v2220_v57, %v2371_v35 }
 0x169   : > { %2490 = vrot.lane.b32.xlu1 %v5363_v2, %s4401_s16 }
 0x16b   : > { %v2535_v14 = vpop.permute.xlu1 %2534 }
 0x16c   : > { %v2678_v37 = vsel %vm2670_vm0, %v2661_v22, %v2535_v14 }
 0x16d   : > { %v4092_v60 = vcombine.low %v2676_v45, %v2678_v37  ;;  %2494 = vrot.lane.b32.xlu1 %v2319_v10, %s4401_s16 }
 0x16f   : > { %4176 = vmatmul.mubr.msk.bf16.vlgmr.msra.gmra.mrb[0].mxu0 %vm2734_vm2, %v4092_v60 }
 0x171   : > { %2514 = vrot.lane.b32.xlu1 %v5361_v34, %s4402_s17 }
 0x175   : > { %2518 = vrot.lane.b32.xlu1 %v2335_v0, %s4402_s17  ;;  %s4334_s17 = sshll.u32 %s4410_s14, 4  ;;  %s4335_s17 = int_to_ptr.vmem [resolvable:$false] %s4334_s17 }
 0x176   : > { %s4336_s22 = scalar_lea.vmem %s4335_s17, 2048 }
 0x179   : > { %2538 = vrot.lane.b32.xlu1 %v5383_v15, %s6041_s28 }
 0x17c   : > { %v2373_v26 = vpop.permute.xlu0 %2372 }
 0x17d   : > { %2542 = vrot.lane.b32.xlu1 %v2351_v25, %s6041_s28  ;;  %v2564_v12 = vsel %vm2042_vm1, %v5333_v27, %v2373_v26 }
 0x180   : > { %v2393_v30 = vpop.permute.xlu0 %2392 }
 0x181   : > { %v2578_v55 = vsel %vm2568_vm9, %v2558_v18, %v2393_v30 }
 0x18e   : > { %v2397_v5 = vpop.permute.xlu0 %2396 }
 0x18f   : > { %v2582_v50 = vsel %vm2568_vm9, %v2564_v12, %v2397_v5 }
 0x192   : > { %v2417_v32 = vpop.permute.xlu0 %2416 }
 0x193   : > { %v2595_v61 = vsel %vm2585_vm11, %v2578_v55, %v2417_v32 }
 0x1a1   : > { %v2375_v8 = vpop.permute.xlu1 %2374 }
 0x1a2   : > { %v2421_v52 = vpop.permute.xlu0 %2420  ;;  %v2567_v28 = vsel %vm2042_vm1, %v5363_v2, %v2375_v8  ;;  %vm4405_vm1 = vmmov 0  }
 0x1a3   : > { %v2599_v17 = vsel %vm2585_vm11, %v2582_v50, %v2421_v52 }
 0x1a5   : > { %v2395_v33 = vpop.permute.xlu1 %2394 }
 0x1a6   : > { %v2441_v54 = vpop.permute.xlu0 %2440  ;;  %v2580_v24 = vsel %vm2568_vm9, %v2561_v3, %v2395_v33 }
 0x1a7   : > { %v2612_v7 = vsel %vm2602_vm12, %v2595_v61, %v2441_v54 }
 0x1a9   : > { %v2399_v16 = vpop.permute.xlu1 %2398 }
 0x1aa   : > { %v2445_v34 = vpop.permute.xlu0 %2444  ;;  %v2584_v27 = vsel %vm2568_vm9, %v2567_v28, %v2399_v16 }
 0x1ab   : > { %v2616_v47 = vsel %vm2602_vm12, %v2599_v17, %v2445_v34 }
 0x1ad   : > { %v2419_v6 = vpop.permute.xlu1 %2418 }
 0x1ae   : > { %v2465_v41 = vpop.permute.xlu0 %2464  ;;  %v2597_v53 = vsel %vm2585_vm11, %v2580_v24, %v2419_v6 }
 0x1af   : > { %v2629_v35 = vsel %vm2619_vm13, %v2612_v7, %v2465_v41 }
 0x1b2   : > { %v2469_v29 = vpop.permute.xlu0 %2468 }
 0x1b3   : > { %v2633_v37 = vsel %vm2619_vm13, %v2616_v47, %v2469_v29 }
 0x1b6   : > { %v2489_v15 = vpop.permute.xlu0 %2488 }
 0x1b7   : > { %v2646_v59 = vsel %vm2636_vm14, %v2629_v35, %v2489_v15 }
 0x1c7   : > { %v2423_v46 = vpop.permute.xlu1 %2422  ;;  %v2493_v38 = vpop.permute.xlu0 %2492 }
 0x1c8   : > { %v2601_v10 = vsel %vm2585_vm11, %v2584_v27, %v2423_v46  ;;  %v2650_v49 = vsel %vm2636_vm14, %v2633_v37, %v2493_v38  ;;  %v2041_v38 = vld [vmem:[%s6031_s4 + $0x8] sm:$0xff] }
 0x1cb   : > { %v2443_v31 = vpop.permute.xlu1 %2442  ;;  %v2513_v62 = vpop.permute.xlu0 %2512 }
 0x1cc   : > { %v2614_v36 = vsel %vm2602_vm12, %v2597_v53, %v2443_v31  ;;  %v2663_v63 = vsel %vm2653_vm15, %v2646_v59, %v2513_v62 }
 0x1cf   : > { %v2447_v11 = vpop.permute.xlu1 %2446  ;;  %v2517_v48 = vpop.permute.xlu0 %2516 }
 0x1d0   : > { %v2618_v22 = vsel %vm2602_vm12, %v2601_v10, %v2447_v11  ;;  %v2667_v26 = vsel %vm2653_vm15, %v2650_v49, %v2517_v48 }
 0x1d3   : > { %v2467_v9 = vpop.permute.xlu1 %2466  ;;  %v2537_v51 = vpop.permute.xlu0 %2536 }
 0x1d4   : > { %v2631_v13 = vsel %vm2619_vm13, %v2614_v36, %v2467_v9  ;;  %v2680_v14 = vsel %vm2670_vm0, %v2663_v63, %v2537_v51  ;;  %v2040_v9 = vld [vmem:[%s6031_s4] sm:$0xff]  ;;  %v5630_v36 = vsub.s32 0, %v4551_v4 }
 0x1d7   : > { %v2471_v43 = vpop.permute.xlu1 %2470  ;;  %v2541_v39 = vpop.permute.xlu0 %2540 }
 0x1d8   : > { %v2635_v60 = vsel %vm2619_vm13, %v2618_v22, %v2471_v43  ;;  %v2684_v32 = vsel %vm2670_vm0, %v2667_v26, %v2541_v39  ;;  %v4212_v43 = vpack.c.bf16 %v2041_v38, %v2040_v9  ;;  %v3233_v38 = vld [vmem:[#allocation3 + $0x90] sm:$0xff] }
 0x1db   : > { %v2491_v19 = vpop.permute.xlu1 %2490 }
 0x1dc   : > { %v2648_v20 = vsel %vm2636_vm14, %v2631_v13, %v2491_v19  ;;  %v4404_v19 = vmov 0.0|0.0  }
 0x1dd   : > { %4211 = vmatprep.subr.bf16.mxu0 %v4404_v19 }
 0x1de   : > { %4213 = vmatpush3.bf16.msra.mxu0 %v4212_v43 }
 0x1df   : > { %v2495_v56 = vpop.permute.xlu1 %2494  ;;  %4214 = vmatprep.subr.bf16.mxu0 %v4404_v19 }
 0x1e0   : > { %v2652_v25 = vsel %vm2636_vm14, %v2635_v60, %v2495_v56 }
 0x1e3   : > { %v2515_v23 = vpop.permute.xlu1 %2514 }
 0x1e4   : > { %v2665_v2 = vsel %vm2653_vm15, %v2648_v20, %v2515_v23 }
 0x1e7   : > { %v2519_v58 = vpop.permute.xlu1 %2518 }
 0x1e8   : > { %v2669_v30 = vsel %vm2653_vm15, %v2652_v25, %v2519_v58 }
 0x1eb   : > { %v2539_v44 = vpop.permute.xlu1 %2538 }
 0x1ec   : > { %v2682_v45 = vsel %vm2670_vm0, %v2665_v2, %v2539_v44 }
 0x1ed   : > { %v4093_v0 = vcombine.low %v2680_v14, %v2682_v45 }
 0x1ef   : > { %v2543_v5 = vpop.permute.xlu1 %2542  ;;  %4179 = vmatprep.mubr.msk.bf16.mxu0 %vm2734_vm2, %v4093_v0 }
 0x1f0   : > { %v2686_v8 = vsel %vm2670_vm0, %v2669_v30, %v2543_v5 }
 0x1f1   : > { %v4094_v52 = vcombine.low %v2684_v32, %v2686_v8 }
 0x1f3   : > { %4180 = vmatmul.mubr.msk.bf16.gmra.mrb[4].mxu0 %vm2734_vm2, %v4094_v52 }
 0x1f4   : > { %4187 = vmatprep.mubr.msk.f32.mxu0 %vm4405_vm1, %v4394_v1 }
 0x242   : > { %v4177_v33 = vpop.f32.mrb[0].mxu0 }
 0x243   : > { %v2785_v54 = vpop.f32.mrb[1].mxu0  ;;  %v2819_v29 = vsel %vm2568_vm9, %v4177_v33, 0.0 }
 0x244   : > { %v4178_v16 = vpop.f32.mrb[2].mxu0  ;;  %v2816_v6 = vsel %vm2568_vm9, %v2785_v54, 0.0 }
 0x245   : > { %v2788_v34 = vpop.f32.mrb[3].mxu0  ;;  %v2821_v11 = vsel %vm2568_vm9, %v4178_v16, 0.0 }
 0x246   : > { %v2817_v41 = vsel %vm2568_vm9, %v2788_v34, 0.0 }
 0x247   : > { %v2818_v46 = vadd.f32 %v2817_v41, %v2816_v6 }
 0x249   : > { %v2820_v31 = vadd.f32 %v2819_v29, %v2818_v46 }
 0x24b   : > { %v2822_v15 = vadd.f32 %v2821_v11, %v2820_v31 }
 0x2c6   : > { %v4181_v62 = vpop.f32.mrb[4].mxu0 }
 0x2c7   : > { %v2801_v42 = vpop.f32.mrb[5].mxu0  ;;  %v2827_v18 = vsel %vm2568_vm9, %v4181_v62, 0.0 }
 0x2c8   : > { %v2823_v40 = vsel %vm2568_vm9, %v2801_v42, 0.0  ;;  %v4182_v56 = vpop.f32.mrb[6].mxu0 }
 0x2c9   : > { %v2824_v21 = vadd.f32 %v2823_v40, %v2822_v15  ;;  %v2804_v57 = vpop.f32.mrb[7].mxu0  ;;  %v2829_v55 = vsel %vm2568_vm9, %v4182_v56, 0.0 }
 0x2ca   : > { %v2825_v48 = vsel %vm2568_vm9, %v2804_v57, 0.0 }
 0x2cb   : > { %v2826_v23 = vadd.f32 %v2825_v48, %v2824_v21 }
 0x2cd   : > { %v2828_v3 = vadd.f32 %v2827_v18, %v2826_v23  ;;  %v4317_v18 = vld [vmem:[%s6032_s5] sm:$0xff]  }
 0x2cf   : > { %v2830_v24 = vadd.f32 %v2829_v55, %v2828_v3  ;;  %v4407_v3 = vmov 0  }
 0x2d0   : > { %3675 = vmatprep.subr.bf16.mxu1 %v4407_v3 }
 0x2d1   : > { %v2831_v12 = vrot.slane %v2830_v24, 4  ;;  %3676 = vmatpush1.bf16.msra.mxu1 %v4317_v18 }
 0x2d2   : > { %3677 = vmatprep.subr.bf16.mxu1 %v4407_v3 }
 0x2d3   : > { %v2832_v61 = vadd.f32 %v2831_v12, %v2830_v24  ;;  %v4318_v24 = vld [vmem:[%s6032_s5 + $0x8] sm:$0xff]  }
 0x2d5   : > { %v2833_v53 = vrot.slane %v2832_v61, 2  ;;  %3678 = vmatpush1.bf16.msra.mxu1 %v4318_v24  ;;  %v4324_v24 = vld [vmem:[%s6032_s5 + $0x38] sm:$0xff]  }
 0x2d6   : > { %3679 = vmatprep.subr.bf16.mxu1 %v4407_v3 }
 0x2d7   : > { %v2834_v51 = vadd.f32 %v2833_v53, %v2832_v61  ;;  %v4106_v61 = vld [vmem:[%s6029_s2] ss:$0 sm:$0xff] }
 0x2d9   : > { %v2835_v58 = vrot.slane %v2834_v51, 1 }
 0x2db   : > { %v2836_v7 = vadd.f32 %v2835_v58, %v2834_v51 }
 0x2dd   : > { %4188 = vmatmul.mubr.msk.f32.vlgmr.msra.gmra.mrb[8].mxu0 %vm2568_vm9, %v2836_v7 }
 0x2de   : > { %4216 = vmatpush3.bf16.msra.mxu0 %v4212_v43  ;;  %4194 = vmatprep.mubr.msk.f32.mxu0 %vm4405_vm1, %v4394_v1  ;;  %v3241_v43 = vpack.c.bf16 %v3233_v38, %v3233_v38 }
 0x2df   : > { %4217 = vmatprep.subr.bf16.mxu0 %v4404_v19 }
 0x2e0   : > { %3416 = vrot.lane.b32.xlu1 %v3241_v43, %s4406_s24 }
 0x3b0   : > { %v2906_v28 = vpop.f32.mrb[8].mxu0 }
 0x3b1   : > { %v2911_v35 = vmul.f32 0.0078125, %v2906_v28  ;;  %v4189_v13 = vpop.f32.mrb[9].mxu0 }
 0x3b3   : > { %v2915_v50 = vrot.slane %v2911_v35, %v5630_v36 }
 0x3b5   : > { %v5633_v27 = vsub.f32 %v2785_v54, %v2915_v50  ;;  %v5635_v59 = vsub.f32 %v2788_v34, %v2915_v50  ;;  %v5637_v20 = vsub.f32 %v4177_v33, %v2915_v50  ;;  %v5639_v17 = vsub.f32 %v4178_v16, %v2915_v50 }
 0x3b6   : > { %v5641_v10 = vsub.f32 %v2801_v42, %v2915_v50  ;;  %v5643_v63 = vsub.f32 %v2804_v57, %v2915_v50  ;;  %v5645_v2 = vsub.f32 %v4181_v62, %v2915_v50  ;;  %v5647_v4 = vsub.f32 %v4182_v56, %v2915_v50  ;;  %v3145_v62 = vld [vmem:[#allocation3 + $0x1] sm:$0xff] }
 0x3b7   : > { %v2924_v44 = vmul.f32 %v5633_v27, %v5633_v27  ;;  %v2925_v47 = vmul.f32 %v5635_v59, %v5635_v59  ;;  %v2926_v22 = vmul.f32 %v5637_v20, %v5637_v20  ;;  %v2927_v14 = vmul.f32 %v5639_v17, %v5639_v17  ;;  %v3161_v42 = vld [vmem:[#allocation3 + $0x2] sm:$0xff] }
 0x3b8   : > { %v2928_v39 = vmul.f32 %v5641_v10, %v5641_v10  ;;  %v2929_v25 = vmul.f32 %v5643_v63, %v5643_v63  ;;  %v2930_v5 = vmul.f32 %v5645_v2, %v5645_v2  ;;  %v2931_v52 = vmul.f32 %v5647_v4, %v5647_v4 }
 0x3b9   : > { %v2932_v45 = vsel %vm2568_vm9, %v2924_v44, 0.0  ;;  %v2933_v37 = vsel %vm2568_vm9, %v2925_v47, 0.0  ;;  %v2935_v0 = vsel %vm2568_vm9, %v2926_v22, 0.0  ;;  %v2937_v26 = vsel %vm2568_vm9, %v2927_v14, 0.0  ;;  %v4107_v44 = vld [vmem:[%s6030_s3] ss:$0 sm:$0xff] }
 0x3ba   : > { %v2934_v60 = vadd.f32 %v2933_v37, %v2932_v45  ;;  %v2939_v32 = vsel %vm2568_vm9, %v2928_v39, 0.0  ;;  %v2941_v33 = vsel %vm2568_vm9, %v2929_v25, 0.0  ;;  %v2943_v16 = vsel %vm2568_vm9, %v2930_v5, 0.0  ;;  %v4319_v5 = vld [vmem:[%s6032_s5 + $0x10] sm:$0xff]  }
 0x3bb   : > { %v2945_v6 = vsel %vm2568_vm9, %v2931_v52, 0.0  ;;  %v3153_v40 = vpack.c.bf16 %v3145_v62, %v3145_v62  ;;  %v3169_v56 = vpack.c.bf16 %v3161_v42, %v3161_v42  ;;  %3680 = vmatpush1.bf16.msra.mxu1 %v4319_v5  ;;  %v3249_v5 = vld [vmem:[#allocation3 + $0x91] sm:$0xff] }
 0x3bc   : > { %v2936_v49 = vadd.f32 %v2935_v0, %v2934_v60  ;;  %3681 = vmatprep.subr.bf16.mxu1 %v4407_v3 }
 0x3bd   : > { %3282 = vrot.lane.b32.xlu0 %v3153_v40, %s4397_s27 }
 0x3be   : > { %v2938_v30 = vadd.f32 %v2937_v26, %v2936_v49 }
 0x3c0   : > { %v2940_v8 = vadd.f32 %v2939_v32, %v2938_v30 }
 0x3c1   : > { %3306 = vrot.lane.b32.xlu0 %v3169_v56, %s4399_s29 }
 0x3c2   : > { %v2942_v54 = vadd.f32 %v2941_v33, %v2940_v8 }
 0x3c4   : > { %v2944_v34 = vadd.f32 %v2943_v16, %v2942_v54  ;;  %v4320_v54 = vld [vmem:[%s6032_s5 + $0x18] sm:$0xff]   ;;  %v4321_v16 = vld [vmem:[%s6032_s5 + $0x20] sm:$0xff]  }
 0x3c5   : > { %3682 = vmatpush1.bf16.msra.mxu1 %v4320_v54  ;;  %v5853_v54 = vpop.permute.xlu1 %3416 }
 0x3c6   : > { %v2946_v41 = vadd.f32 %v2945_v6, %v2944_v34  ;;  %3683 = vmatprep.subr.bf16.mxu1 %v4407_v3 }
 0x3c8   : > { %v2947_v46 = vrot.slane %v2946_v41, 4 }
 0x3c9   : > { %3684 = vmatpush1.bf16.msra.mxu1 %v4321_v16 }
 0x3ca   : > { %v2948_v29 = vadd.f32 %v2947_v46, %v2946_v41  ;;  %3685 = vmatprep.subr.bf16.mxu1 %v4407_v3 }
 0x3cc   : > { %v2949_v31 = vrot.slane %v2948_v29, 2 }
 0x3ce   : > { %v2950_v11 = vadd.f32 %v2949_v31, %v2948_v29 }
 0x3d0   : > { %v2951_v15 = vrot.slane %v2950_v11, 1 }
 0x3d2   : > { %v2952_v9 = vadd.f32 %v2951_v15, %v2950_v11 }
 0x3d4   : > { %4195 = vmatmul.mubr.msk.f32.vlgmr.msra.gmra.mrb[10].mxu0 %vm2568_vm9, %v2952_v9 }
 0x3d5   : > { %4201 = vmatprep.mubr.msk.f32.mxu0 %vm4405_vm1, %v4394_v1 }
 0x4a7   : > { %v3022_v21 = vpop.f32.mrb[10].mxu0 }
 0x4a8   : > { %v3026_v57 = vmul.f32 0.0078125, %v3022_v21  ;;  %v4196_v48 = vpop.f32.mrb[11].mxu0 }
 0x4aa   : > { %v3027_v23 = vadd.f32 1e-05, %v3026_v57  ;;  %v4322_v57 = vld [vmem:[%s6032_s5 + $0x28] sm:$0xff]  }
 0x4ab   : > { %3686 = vmatpush1.bf16.msra.mxu1 %v4322_v57 }
 0x4ac   : > { %4326 = vrsqrt.f32 %v3027_v23  ;;  %v4323_v23 = vld [vmem:[%s6032_s5 + $0x30] sm:$0xff]   ;;  %3687 = vmatprep.subr.bf16.mxu1 %v4407_v3 }
 0x4af   : > { %3688 = vmatpush1.bf16.msra.mxu1 %v4323_v23 }
 0x4b0   : > { %3689 = vmatprep.subr.bf16.mxu1 %v4407_v3 }
 0x4b3   : > { %3690 = vmatpush1.bf16.msra.mxu1 %v4324_v24 }
 0x4b4   : > { %3691 = vmatprep.subr.bf16.mxu1 %v4407_v3 }
 0x4b6   : > { %v4327_v55 = vpop.eup %4326 }
 0x4b7   : > { %v3032_v12 = vrot.slane %v4327_v55, %v5630_v36 }
 0x4b9   : > { %v3033_v53 = vmul.f32 %v3032_v12, %v5633_v27  ;;  %v3034_v51 = vmul.f32 %v3032_v12, %v5635_v59  ;;  %v3035_v58 = vmul.f32 %v3032_v12, %v5637_v20  ;;  %v3036_v7 = vmul.f32 %v3032_v12, %v5639_v17 }
 0x4ba   : > { %v3037_v28 = vmul.f32 %v3032_v12, %v5641_v10  ;;  %v3038_v35 = vmul.f32 %v3032_v12, %v5643_v63  ;;  %v3039_v13 = vmul.f32 %v3032_v12, %v5645_v2  ;;  %v3040_v50 = vmul.f32 %v3032_v12, %v5647_v4 }
 0x4bb   : > { %v3047_v27 = vmul.f32 %v4106_v61, %v3033_v53  ;;  %v3050_v47 = vmul.f32 %v4106_v61, %v3036_v7  ;;  %v3048_v59 = vmul.f32 %v4106_v61, %v3034_v51  ;;  %v3049_v22 = vmul.f32 %v4106_v61, %v3035_v58 }
 0x4bc   : > { %v3051_v20 = vmul.f32 %v4106_v61, %v3037_v28  ;;  %v3052_v17 = vmul.f32 %v4106_v61, %v3038_v35  ;;  %v3053_v10 = vmul.f32 %v4106_v61, %v3039_v13  ;;  %v3054_v14 = vmul.f32 %v4106_v61, %v3040_v50  ;;  %v4325_v61 = vld [vmem:[%s6032_s5 + $0x40] sm:$0xff]  }
 0x4bd   : > { %v3062_v63 = vadd.f32 %v4107_v44, %v3048_v59  ;;  %v3063_v45 = vadd.f32 %v4107_v44, %v3049_v22  ;;  %v3061_v2 = vadd.f32 %v4107_v44, %v3047_v27  ;;  %v3064_v37 = vadd.f32 %v4107_v44, %v3050_v47  ;;  %3692 = vmatpush1.bf16.msra.mxu1 %v4325_v61 }
 0x4be   : > { %v3065_v4 = vadd.f32 %v4107_v44, %v3051_v20  ;;  %v3066_v60 = vadd.f32 %v4107_v44, %v3052_v17  ;;  %v3067_v39 = vadd.f32 %v4107_v44, %v3053_v10  ;;  %v3068_v0 = vadd.f32 %v4107_v44, %v3054_v14 }
 0x4bf   : > { %v3070_v49 = vmax.f32 %v3062_v63, 0.0  ;;  %v3071_v25 = vmax.f32 %v3063_v45, 0.0  ;;  %v3069_v26 = vmax.f32 %v3061_v2, 0.0  ;;  %v3072_v30 = vmax.f32 %v3064_v37, 0.0 }
 0x4c0   : > { %v3073_v32 = vmax.f32 %v3065_v4, 0.0  ;;  %v3074_v8 = vmax.f32 %v3066_v60, 0.0  ;;  %v3075_v52 = vmax.f32 %v3067_v39, 0.0  ;;  %v3076_v33 = vmax.f32 %v3068_v0, 0.0 }
 0x4c1   : > { %3122 = vst.msk [vmem:[#allocation3 + $0x21] sm:$0xff] %vm2568_vm9, %v3070_v49  ;;  %3123 = vst.msk [vmem:[#allocation3 + $0x31] sm:$0xff] %vm2568_vm9, %v3071_v25 }
 0x4c2   : > { %3121 = vst.msk [vmem:[#allocation3 + $0x11] sm:$0xff] %vm2568_vm9, %v3069_v26  ;;  %3124 = vst.msk [vmem:[#allocation3 + $0x41] sm:$0xff] %vm2568_vm9, %v3072_v30 }
 0x4c3   : > { %3125 = vst.msk [vmem:[#allocation3 + $0x51] sm:$0xff] %vm2568_vm9, %v3073_v32  ;;  %3126 = vst.msk [vmem:[#allocation3 + $0x61] sm:$0xff] %vm2568_vm9, %v3074_v8  ;;  %v3257_v8 = vpack.c.bf16 %v3249_v5, %v3249_v5 }
 0x4c4   : > { %3127 = vst.msk [vmem:[#allocation3 + $0x71] sm:$0xff] %vm2568_vm9, %v3075_v52  ;;  %3128 = vst.msk [vmem:[#allocation3 + $0x81] sm:$0xff] %vm2568_vm9, %v3076_v33  ;;  %v3283_v52 = vpop.permute.xlu0 %3282 }
 0x4c8   : > { %v3258_v34 = vld [vmem:[#allocation3 + $0x22] sm:$0xff]  ;;  %v3259_v6 = vld [vmem:[#allocation3 + $0x32] sm:$0xff]  ;;  %v3307_v33 = vpop.permute.xlu0 %3306 }
 0x4c9   : > { %v3177_v41 = vld [vmem:[#allocation3 + $0x10] sm:$0xff]  ;;  %v4139_v46 = vpack.c.bf16 %v3259_v6, %v3258_v34  ;;  %v5738_v9 = vld [vmem:[#allocation3 + $0x42] sm:$0xff]  ;;  %v3218_v12 = vpack.c.bf16 %v3258_v34, %v3258_v34  ;;  %v3172_v3 = vpack.c.bf16 %v3259_v6, %v3259_v6 }
 0x4ca   : > { %v5732_v29 = vpack.c.bf16 %v3177_v41, %v3177_v41  ;;  %v3146_v31 = vld [vmem:[#allocation3 + $0x11] sm:$0xff]  ;;  %v5743_v43 = vld [vmem:[#allocation3 + $0x62] sm:$0xff]  ;;  %v3220_v44 = vpack.c.bf16 %v5738_v9, %v5738_v9 }
 0x4cb   : > { %v3154_v11 = vpack.c.bf16 %v3146_v31, %v3146_v31  ;;  %4125 = vmatprep.mubr.msk.bf16.mxu1 %vm2568_vm9, %v4139_v46  ;;  %v3162_v15 = vld [vmem:[#allocation3 + $0x12] sm:$0xff]  ;;  %v3178_v56 = vld [vmem:[#allocation3 + $0x20] sm:$0xff]  ;;  %v3222_v45 = vpack.c.bf16 %v5743_v43, %v5743_v43 }
 0x4cc   : > { %3330 = vrot.lane.b32.xlu0 %v5732_v29, %s4401_s16  ;;  %v5741_v38 = vld [vmem:[#allocation3 + $0x52] sm:$0xff]  ;;  %v3170_v42 = vpack.c.bf16 %v3162_v15, %v3162_v15  ;;  %v5756_v48 = vpack.c.bf16 %v3178_v56, %v3178_v56  ;;  %v3194_v18 = vld [vmem:[#allocation3 + $0x21] sm:$0xff] }
 0x4cd   : > { %3284 = vrot.lane.b32.xlu1 %v3154_v11, %s4397_s27  ;;  %v4140_v62 = vpack.c.bf16 %v5741_v38, %v5738_v9  ;;  %v5747_v40 = vld [vmem:[#allocation3 + $0x72] sm:$0xff]  ;;  %v3202_v55 = vpack.c.bf16 %v3194_v18, %v3194_v18  ;;  %v3180_v28 = vld [vmem:[#allocation3 + $0x40] sm:$0xff]  ;;  %v3174_v20 = vpack.c.bf16 %v5741_v38, %v5741_v38 }
 0x4ce   : > { %v4141_v21 = vpack.c.bf16 %v5747_v40, %v5743_v43  ;;  %v3227_v53 = vld [vmem:[#allocation3 + $0x30] sm:$0xff]  ;;  %v5790_v35 = vpack.c.bf16 %v3180_v28, %v3180_v28  ;;  %v3196_v13 = vld [vmem:[#allocation3 + $0x41] sm:$0xff]  ;;  %v3176_v39 = vpack.c.bf16 %v5747_v40, %v5747_v40 }
 0x4cf   : > { %v5778_v51 = vpack.c.bf16 %v3227_v53, %v3227_v53  ;;  %v3243_v58 = vld [vmem:[#allocation3 + $0x31] sm:$0xff]  ;;  %v3204_v50 = vpack.c.bf16 %v3196_v13, %v3196_v13  ;;  %v3182_v17 = vld [vmem:[#allocation3 + $0x60] sm:$0xff] }
 0x4d0   : > { %3354 = vrot.lane.b32.xlu0 %v3154_v11, %s6041_s28  ;;  %v3251_v7 = vpack.c.bf16 %v3243_v58, %v3243_v58  ;;  %v3229_v27 = vld [vmem:[#allocation3 + $0x50] sm:$0xff]  ;;  %v5816_v10 = vpack.c.bf16 %v3182_v17, %v3182_v17  ;;  %v3198_v14 = vld [vmem:[#allocation3 + $0x61] sm:$0xff] }
 0x4d1   : > { %3308 = vrot.lane.b32.xlu1 %v3170_v42, %s4399_s29  ;;  %v5802_v47 = vpack.c.bf16 %v3229_v27, %v3229_v27  ;;  %v3245_v59 = vld [vmem:[#allocation3 + $0x51] sm:$0xff]  ;;  %v3206_v63 = vpack.c.bf16 %v3198_v14, %v3198_v14  ;;  %v3184_v0 = vld [vmem:[#allocation3 + $0x80] sm:$0xff] }
 0x4d2   : > { %v3253_v22 = vpack.c.bf16 %v3245_v59, %v3245_v59  ;;  %v3231_v2 = vld [vmem:[#allocation3 + $0x70] sm:$0xff]  ;;  %v3192_v49 = vpack.c.bf16 %v3184_v0, %v3184_v0  ;;  %v3200_v25 = vld [vmem:[#allocation3 + $0x81] sm:$0xff] }
 0x4d3   : > { %v5828_v37 = vpack.c.bf16 %v3231_v2, %v3231_v2  ;;  %v3247_v4 = vld [vmem:[#allocation3 + $0x71] sm:$0xff]  ;;  %v3208_v26 = vpack.c.bf16 %v3200_v25, %v3200_v25  ;;  %v5845_v30 = vld [vmem:[#allocation3 + $0x82] sm:$0xff] }
 0x4d4   : > { %3378 = vrot.lane.b32.xlu0 %v3170_v42, %s4408_s25  ;;  %v3255_v60 = vpack.c.bf16 %v3247_v4, %v3247_v4  ;;  %v3224_v32 = vpack.c.bf16 %v5845_v30, %v5845_v30  ;;  %v3129_v11 = vld [vmem:[#allocation3] sm:$0xff] }
 0x4d5   : > { %3332 = vrot.lane.b32.xlu1 %v5756_v48, %s4401_s16  ;;  %v3137_v56 = vpack.c.bf16 %v3129_v11, %v3129_v11 }
 0x4d7   : > { %v3444_v18 = vsel %vm2568_vm9, %v3137_v56, %v3283_v52 }
 0x4d8   : > { %3402 = vrot.lane.b32.xlu0 %v5756_v48, %s4406_s24 }
 0x4d9   : > { %3356 = vrot.lane.b32.xlu1 %v3202_v55, %s6041_s28 }
 0x4dc   : > { %3426 = vrot.lane.b32.xlu0 %v3202_v55, %s4409_s23 }
 0x4dd   : > { %3380 = vrot.lane.b32.xlu1 %v3218_v12, %s4408_s25 }
 0x4e0   : > { %3286 = vrot.lane.b32.xlu0 %v3202_v55, %s4397_s27 }
 0x4e1   : > { %3404 = vrot.lane.b32.xlu1 %v5778_v51, %s4406_s24 }
 0x4e4   : > { %3310 = vrot.lane.b32.xlu0 %v3218_v12, %s4399_s29  ;;  %v3467_v12 = vsel %vm2602_vm12, %v3444_v18, %v3307_v33 }
 0x4e5   : > { %3428 = vrot.lane.b32.xlu1 %v3251_v7, %s4409_s23 }
 0x4e8   : > { %3334 = vrot.lane.b32.xlu0 %v5778_v51, %s4401_s16 }
 0x4e9   : > { %3288 = vrot.lane.b32.xlu1 %v3251_v7, %s4397_s27 }
 0x4ec   : > { %3358 = vrot.lane.b32.xlu0 %v3251_v7, %s6041_s28 }
 0x4ed   : > { %3312 = vrot.lane.b32.xlu1 %v3172_v3, %s4399_s29 }
 0x4f0   : > { %3382 = vrot.lane.b32.xlu0 %v3172_v3, %s4408_s25 }
 0x4f1   : > { %3336 = vrot.lane.b32.xlu1 %v5790_v35, %s4401_s16 }
 0x4f4   : > { %3406 = vrot.lane.b32.xlu0 %v5790_v35, %s4406_s24 }
 0x4f5   : > { %3360 = vrot.lane.b32.xlu1 %v3204_v50, %s6041_s28 }
 0x4f8   : > { %3430 = vrot.lane.b32.xlu0 %v3204_v50, %s4409_s23 }
 0x4f9   : > { %3384 = vrot.lane.b32.xlu1 %v3220_v44, %s4408_s25 }
 0x4fc   : > { %3290 = vrot.lane.b32.xlu0 %v3204_v50, %s4397_s27 }
 0x4fd   : > { %3408 = vrot.lane.b32.xlu1 %v5802_v47, %s4406_s24 }
 0x500   : > { %3314 = vrot.lane.b32.xlu0 %v3220_v44, %s4399_s29 }
 0x501   : > { %3432 = vrot.lane.b32.xlu1 %v3253_v22, %s4409_s23 }
 0x504   : > { %3338 = vrot.lane.b32.xlu0 %v5802_v47, %s4401_s16 }
 0x505   : > { %3292 = vrot.lane.b32.xlu1 %v3253_v22, %s4397_s27 }
 0x508   : > { %3362 = vrot.lane.b32.xlu0 %v3253_v22, %s6041_s28 }
 0x509   : > { %3316 = vrot.lane.b32.xlu1 %v3174_v20, %s4399_s29 }
 0x50c   : > { %3386 = vrot.lane.b32.xlu0 %v3174_v20, %s4408_s25 }
 0x50d   : > { %3340 = vrot.lane.b32.xlu1 %v5816_v10, %s4401_s16 }
 0x510   : > { %3410 = vrot.lane.b32.xlu0 %v5816_v10, %s4406_s24 }
 0x511   : > { %3364 = vrot.lane.b32.xlu1 %v3206_v63, %s6041_s28 }
 0x514   : > { %3434 = vrot.lane.b32.xlu0 %v3206_v63, %s4409_s23 }
 0x515   : > { %3388 = vrot.lane.b32.xlu1 %v3222_v45, %s4408_s25 }
 0x518   : > { %3294 = vrot.lane.b32.xlu0 %v3206_v63, %s4397_s27 }
 0x519   : > { %3412 = vrot.lane.b32.xlu1 %v5828_v37, %s4406_s24 }
 0x51c   : > { %3318 = vrot.lane.b32.xlu0 %v3222_v45, %s4399_s29 }
 0x51d   : > { %3436 = vrot.lane.b32.xlu1 %v3255_v60, %s4409_s23 }
 0x520   : > { %3342 = vrot.lane.b32.xlu0 %v5828_v37, %s4401_s16 }
 0x521   : > { %3296 = vrot.lane.b32.xlu1 %v3255_v60, %s4397_s27 }
 0x524   : > { %3366 = vrot.lane.b32.xlu0 %v3255_v60, %s6041_s28 }
 0x525   : > { %3320 = vrot.lane.b32.xlu1 %v3176_v39, %s4399_s29 }
 0x528   : > { %3390 = vrot.lane.b32.xlu0 %v3176_v39, %s4408_s25 }
 0x529   : > { %3344 = vrot.lane.b32.xlu1 %v3192_v49, %s4401_s16 }
 0x52c   : > { %3414 = vrot.lane.b32.xlu0 %v3192_v49, %s4406_s24  ;;  %s323_s24 = sand.u32 1, %s4384_s10  }
 0x52d   : > { %3368 = vrot.lane.b32.xlu1 %v3208_v26, %s6041_s28 }
 0x530   : > { %3438 = vrot.lane.b32.xlu0 %v3208_v26, %s4409_s23 }
 0x531   : > { %3392 = vrot.lane.b32.xlu1 %v3224_v32, %s4408_s25  ;;  %s4088_s25 = sshll.u32 %s323_s24, 6 }
 0x532   : > { %s325_s27 = scalar_lea.vmem [#allocation4], %s4088_s25 }
 0x533   : > { %s4022_s29 = sshll.u32 %s325_s27, 4  ;;  %s5973_s29 = int_to_ptr.vmem [resolvable:$true] %s4022_s29 }
 0x534   : > { %s4330_s25 = scalar_lea.vmem %s5973_s29, 1024  ;;  %p4337_p0 = scmp.lt.s32.totalorder %s5973_s29, %s4335_s17 }
 0x535   : > { %3440 = vrot.lane.b32.xlu1 %v3257_v8, %s4409_s23  ;;  %s4143_s23 = sshll.u32 %s4483_s13, 10  ;;  %s5985_s13 = scalar_lea.sflag [#allocation5], %s323_s24 }
 0x536   : > { %s5971_s21 = scalar_lea.hbm %s6036_s9, %s4143_s23  ;;  %p4331_p11 = scmp.ne.s32.totalorder %s5973_s29, %s4330_s25 }
 0x537   : > { %p4338_p1 = scmp.lt.s32.totalorder %s4336_s22, %s4330_s25 }
 0x538   : > { %p4332_p12 = pnand %p4331_p11, %p4500_p5 }
 0x539   : > { %p4339_p2 = por %p4338_p1, %p4337_p0 }
 0x53a   : > { %p4333_p13 = pneg %p4332_p12 }
 0x53c   : > { %p4340_p3 = pnand %p4339_p2, %p4333_p13 }
 0x53e   : > { %v3331_v16 = vpop.permute.xlu0 %3330 }
 0x53f   : > { %v3285_v34 = vpop.permute.xlu1 %3284  ;;  %v3483_v58 = vsel %vm2636_vm14, %v3467_v12, %v3331_v16 }
 0x540   : > { %v3447_v55 = vsel %vm2568_vm9, %v5732_v29, %v3285_v34 }
 0x542   : > { %v3355_v6 = vpop.permute.xlu0 %3354 }
 0x543   : > { %v3309_v41 = vpop.permute.xlu1 %3308  ;;  %v3499_v3 = vsel %vm2670_vm0, %v3483_v58, %v3355_v6 }
 0x544   : > { %v3469_v61 = vsel %vm2602_vm12, %v3447_v55, %v3309_v41 }
 0x546   : > { %v3379_v46 = vpop.permute.xlu0 %3378 }
 0x547   : > { %v3333_v31 = vpop.permute.xlu1 %3332  ;;  %v3516_v13 = vsel %vm3514_vm4, %v3499_v3, %v3379_v46 }
 0x548   : > { %v3485_v7 = vsel %vm2636_vm14, %v3469_v61, %v3333_v31 }
 0x54a   : > { %v3403_v15 = vpop.permute.xlu0 %3402 }
 0x54b   : > { %v3357_v42 = vpop.permute.xlu1 %3356  ;;  %v3533_v44 = vsel %vm3531_vm5, %v3516_v13, %v3403_v15 }
 0x54c   : > { %v3501_v28 = vsel %vm2670_vm0, %v3485_v7, %v3357_v42 }
 0x54e   : > { %v3427_v57 = vpop.permute.xlu0 %3426 }
 0x54f   : > { %v3381_v23 = vpop.permute.xlu1 %3380  ;;  %v3550_v22 = vsel %vm3548_vm6, %v3533_v44, %v3427_v57 }
 0x550   : > { %v3518_v29 = vsel %vm3514_vm4, %v3501_v28, %v3381_v23 }
 0x552   : > { %v3287_v24 = vpop.permute.xlu0 %3286 }
 0x553   : > { %v3405_v53 = vpop.permute.xlu1 %3404  ;;  %v3450_v26 = vsel %vm2568_vm9, %v5756_v48, %v3287_v24 }
 0x554   : > { %v3535_v27 = vsel %vm3531_vm5, %v3518_v29, %v3405_v53 }
 0x556   : > { %v3311_v50 = vpop.permute.xlu0 %3310 }
 0x557   : > { %v3429_v59 = vpop.permute.xlu1 %3428  ;;  %v3471_v8 = vsel %vm2602_vm12, %v3450_v26, %v3311_v50 }
 0x558   : > { %v3552_v20 = vsel %vm3548_vm6, %v3535_v27, %v3429_v59 }
 0x559   : > { %v4108_v17 = vcombine.low %v3550_v22, %v3552_v20  ;;  %v3265_v20 = vld [vmem:[#allocation3 + $0x92] sm:$0xff] }
 0x55a   : > { %v3335_v14 = vpop.permute.xlu0 %3334 }
 0x55b   : > { %v3289_v63 = vpop.permute.xlu1 %3288  ;;  %3708 = vmatmul.mubr.bf16.vlgmr.msra.gmra.mrb[0].mxu1 %v4108_v17 }
 0x55c   : > { %4126 = vmatprep.mubr.msk.bf16.mxu1 %vm2568_vm9, %v4140_v62  ;;  %v3453_v5 = vsel %vm2568_vm9, %v5778_v51, %v3289_v63  ;;  %v3487_v62 = vsel %vm2636_vm14, %v3471_v8, %v3335_v14 }
 0x55e   : > { %v3359_v45 = vpop.permute.xlu0 %3358 }
 0x55f   : > { %v3313_v2 = vpop.permute.xlu1 %3312  ;;  %v3503_v33 = vsel %vm2670_vm0, %v3487_v62, %v3359_v45 }
 0x560   : > { %v3473_v9 = vsel %vm2602_vm12, %v3453_v5, %v3313_v2  ;;  %v4142_v2 = vpack.c.bf16 %v3265_v20, %v5845_v30 }
 0x562   : > { %v3383_v4 = vpop.permute.xlu0 %3382 }
 0x563   : > { %v3337_v60 = vpop.permute.xlu1 %3336  ;;  %v3520_v34 = vsel %vm3514_vm4, %v3503_v33, %v3383_v4 }
 0x564   : > { %v3489_v52 = vsel %vm2636_vm14, %v3473_v9, %v3337_v60 }
 0x566   : > { %v3407_v39 = vpop.permute.xlu0 %3406 }
 0x567   : > { %v3361_v0 = vpop.permute.xlu1 %3360  ;;  %v3537_v51 = vsel %vm3531_vm5, %v3520_v34, %v3407_v39 }
 0x568   : > { %v3505_v16 = vsel %vm2670_vm0, %v3489_v52, %v3361_v0 }
 0x56a   : > { %v3431_v49 = vpop.permute.xlu0 %3430 }
 0x56b   : > { %v3385_v25 = vpop.permute.xlu1 %3384  ;;  %v3554_v31 = vsel %vm3548_vm6, %v3537_v51, %v3431_v49 }
 0x56c   : > { %v3522_v48 = vsel %vm3514_vm4, %v3505_v16, %v3385_v25 }
 0x56e   : > { %v3291_v32 = vpop.permute.xlu0 %3290 }
 0x56f   : > { %v3409_v38 = vpop.permute.xlu1 %3408  ;;  %v3456_v58 = vsel %vm2568_vm9, %v5790_v35, %v3291_v32 }
 0x570   : > { %v3539_v41 = vsel %vm3531_vm5, %v3522_v48, %v3409_v38 }
 0x572   : > { %v3315_v6 = vpop.permute.xlu0 %3314 }
 0x573   : > { %v3433_v46 = vpop.permute.xlu1 %3432  ;;  %v3475_v28 = vsel %vm2602_vm12, %v3456_v58, %v3315_v6 }
 0x574   : > { %v3556_v11 = vsel %vm3548_vm6, %v3539_v41, %v3433_v46 }
 0x575   : > { %v4110_v15 = vcombine.low %v3554_v31, %v3556_v11  ;;  %v3097_v31 = vld [vmem:[%s6035_s8] sm:$0xff]  ;;  %v3098_v11 = vld [vmem:[%s6035_s8 + $0x8] sm:$0xff] }
 0x576   : > { %v3339_v42 = vpop.permute.xlu0 %3338 }
 0x577   : > { %v3293_v56 = vpop.permute.xlu1 %3292  ;;  %3716 = vmatmul.mubr.bf16.gmra.mrb[4].mxu1 %v4110_v15  ;;  %v4218_v15 = vpack.c.bf16 %v3098_v11, %v3097_v31 }
 0x578   : > { %4127 = vmatprep.mubr.msk.bf16.mxu1 %vm2568_vm9, %v4141_v21  ;;  %v3459_v7 = vsel %vm2568_vm9, %v5802_v47, %v3293_v56  ;;  %v3491_v21 = vsel %vm2636_vm14, %v3475_v28, %v3339_v42 }
 0x579   : > { %4219 = vmatpush3.bf16.msra.mxu0 %v4218_v15 }
 0x57a   : > { %v3363_v57 = vpop.permute.xlu0 %3362  ;;  %4220 = vmatprep.subr.bf16.mxu0 %v4404_v19 }
 0x57b   : > { %v3317_v23 = vpop.permute.xlu1 %3316  ;;  %v3507_v29 = vsel %vm2670_vm0, %v3491_v21, %v3363_v57 }
 0x57c   : > { %v3477_v43 = vsel %vm2602_vm12, %v3459_v7, %v3317_v23 }
 0x57e   : > { %v3387_v18 = vpop.permute.xlu0 %3386 }
 0x57f   : > { %v3341_v55 = vpop.permute.xlu1 %3340  ;;  %v3524_v44 = vsel %vm3514_vm4, %v3507_v29, %v3387_v18 }
 0x580   : > { %v3493_v13 = vsel %vm2636_vm14, %v3477_v43, %v3341_v55 }
 0x582   : > { %v3411_v24 = vpop.permute.xlu0 %3410 }
 0x583   : > { %v3365_v12 = vpop.permute.xlu1 %3364  ;;  %v3541_v47 = vsel %vm3531_vm5, %v3524_v44, %v3411_v24 }
 0x584   : > { %v3509_v50 = vsel %vm2670_vm0, %v3493_v13, %v3365_v12 }
 0x586   : > { %v3435_v61 = vpop.permute.xlu0 %3434 }
 0x587   : > { %v3389_v53 = vpop.permute.xlu1 %3388  ;;  %v3558_v17 = vsel %vm3548_vm6, %v3541_v47, %v3435_v61 }
 0x588   : > { %v3526_v35 = vsel %vm3514_vm4, %v3509_v50, %v3389_v53 }
 0x58a   : > { %v3295_v3 = vpop.permute.xlu0 %3294 }
 0x58b   : > { %v3413_v40 = vpop.permute.xlu1 %3412  ;;  %v3462_v8 = vsel %vm2568_vm9, %v5816_v10, %v3295_v3 }
 0x58c   : > { %v3543_v59 = vsel %vm3531_vm5, %v3526_v35, %v3413_v40 }
 0x58e   : > { %v3319_v27 = vpop.permute.xlu0 %3318 }
 0x58f   : > { %v3437_v22 = vpop.permute.xlu1 %3436  ;;  %v3479_v9 = vsel %vm2602_vm12, %v3462_v8, %v3319_v27 }
 0x590   : > { %v3560_v14 = vsel %vm3548_vm6, %v3543_v59, %v3437_v22 }
 0x591   : > { %v4112_v63 = vcombine.low %v3558_v17, %v3560_v14 }
 0x592   : > { %v3343_v45 = vpop.permute.xlu0 %3342 }
 0x593   : > { %v3297_v4 = vpop.permute.xlu1 %3296  ;;  %3724 = vmatmul.mubr.bf16.gmra.mrb[8].mxu1 %v4112_v63  ;;  %v3495_v52 = vsel %vm2636_vm14, %v3479_v9, %v3343_v45 }
 0x594   : > { %4128 = vmatprep.mubr.msk.bf16.mxu1 %vm2568_vm9, %v4142_v2  ;;  %v3465_v5 = vsel %vm2568_vm9, %v5828_v37, %v3297_v4 }
 0x596   : > { %v3367_v60 = vpop.permute.xlu0 %3366 }
 0x597   : > { %v3321_v39 = vpop.permute.xlu1 %3320  ;;  %v3511_v16 = vsel %vm2670_vm0, %v3495_v52, %v3367_v60 }
 0x598   : > { %v3481_v32 = vsel %vm2602_vm12, %v3465_v5, %v3321_v39 }
 0x59a   : > { %v3391_v0 = vpop.permute.xlu0 %3390 }
 0x59b   : > { %v3345_v49 = vpop.permute.xlu1 %3344  ;;  %v3528_v37 = vsel %vm3514_vm4, %v3511_v16, %v3391_v0 }
 0x59c   : > { %v3497_v30 = vsel %vm2636_vm14, %v3481_v32, %v3345_v49 }
 0x59e   : > { %v3415_v25 = vpop.permute.xlu0 %3414 }
 0x59f   : > { %v3369_v26 = vpop.permute.xlu1 %3368  ;;  %v3545_v48 = vsel %vm3531_vm5, %v3528_v37, %v3415_v25 }
 0x5a0   : > { %v3513_v38 = vsel %vm2670_vm0, %v3497_v30, %v3369_v26 }
 0x5a2   : > { %v3439_v34 = vpop.permute.xlu0 %3438 }
 0x5a3   : > { %v3393_v62 = vpop.permute.xlu1 %3392  ;;  %v3562_v51 = vsel %vm3548_vm6, %v3545_v48, %v3439_v34 }
 0x5a4   : > { %v3530_v33 = vsel %vm3514_vm4, %v3513_v38, %v3393_v62 }
 0x5a5   : > { %v3547_v10 = vsel %vm3531_vm5, %v3530_v33, %v5853_v54 }
 0x5a7   : > { %v3441_v6 = vpop.permute.xlu1 %3440 }
 0x5a8   : > { %v3564_v41 = vsel %vm3548_vm6, %v3547_v10, %v3441_v6 }
 0x5a9   : > { %v4114_v46 = vcombine.low %v3562_v51, %v3564_v41 }
 0x5ab   : > { %3732 = vmatmul.mubr.bf16.gmra.mrb[12].mxu1 %v4114_v46 }
 0x62e   : > { %v3709_v54 = vpop.f32.mrb[0].mxu1 }
 0x62f   : > { %v3711_v42 = vpop.f32.mrb[1].mxu1  ;;  %v3740_v57 = vsel %vm2568_vm9, %v3709_v54, 0.0 }
 0x630   : > { %v3712_v56 = vpop.f32.mrb[2].mxu1 }
 0x631   : > { %v3741_v23 = vsel %vm2568_vm9, %v3712_v56, 0.0  ;;  %v3714_v18 = vpop.f32.mrb[3].mxu1 }
 0x632   : > { %v3742_v55 = vadd.f32 %v3741_v23, %v3740_v57 }
 0x64a   : > { %v3717_v24 = vpop.f32.mrb[4].mxu1 }
 0x64b   : > { %v3743_v12 = vsel %vm2568_vm9, %v3717_v24, 0.0  ;;  %v3719_v61 = vpop.f32.mrb[5].mxu1 }
 0x64c   : > { %v3744_v53 = vadd.f32 %v3743_v12, %v3742_v55  ;;  %v3720_v58 = vpop.f32.mrb[6].mxu1 }
 0x64d   : > { %v3745_v7 = vsel %vm2568_vm9, %v3720_v58, 0.0  ;;  %v3722_v3 = vpop.f32.mrb[7].mxu1 }
 0x64e   : > { %v3746_v28 = vadd.f32 %v3745_v7, %v3744_v53 }
 0x666   : > { %v3725_v19 = vpop.f32.mrb[8].mxu1 }
 0x667   : > { %v3747_v43 = vsel %vm2568_vm9, %v3725_v19, 0.0  ;;  %v3727_v40 = vpop.f32.mrb[9].mxu1 }
 0x668   : > { %v3748_v21 = vadd.f32 %v3747_v43, %v3746_v28  ;;  %v3728_v13 = vpop.f32.mrb[10].mxu1 }
 0x669   : > { %v3749_v29 = vsel %vm2568_vm9, %v3728_v13, 0.0  ;;  %v3730_v50 = vpop.f32.mrb[11].mxu1 }
 0x66a   : > { %v3750_v44 = vadd.f32 %v3749_v29, %v3748_v21  ;;  %v4131_v50 = vld [vmem:[%s6033_s6] ss:$0 sm:$0xff] }
 0x67e   : > { %v3733_v35 = vpop.f32.mrb[12].mxu1 }
 0x67f   : > { %v3751_v27 = vsel %vm2568_vm9, %v3733_v35, 0.0  ;;  %v3735_v47 = vpop.f32.mrb[13].mxu1 }
 0x680   : > { %v3752_v59 = vadd.f32 %v3751_v27, %v3750_v44  ;;  %v3736_v22 = vpop.f32.mrb[14].mxu1 }
 0x681   : > { %v3753_v20 = vsel %vm2568_vm9, %v3736_v22, 0.0  ;;  %v3738_v17 = vpop.f32.mrb[15].mxu1 }
 0x682   : > { %v3754_v14 = vadd.f32 %v3753_v20, %v3752_v59 }
 0x684   : > { %v3755_v63 = vrot.slane %v3754_v14, 4 }
 0x686   : > { %v3756_v45 = vadd.f32 %v3755_v63, %v3754_v14  ;;  %v4132_v14 = vld [vmem:[%s6034_s7] ss:$0 sm:$0xff] }
 0x688   : > { %v3757_v2 = vrot.slane %v3756_v45, 2 }
 0x68a   : > { %v3758_v4 = vadd.f32 %v3757_v2, %v3756_v45 }
 0x68c   : > { %v3759_v60 = vrot.slane %v3758_v4, 1 }
 0x68e   : > { %v3760_v39 = vadd.f32 %v3759_v60, %v3758_v4 }
 0x690   : > { %4202 = vmatmul.mubr.msk.f32.vlgmr.msra.gmra.mrb[12].mxu0 %vm2568_vm9, %v3760_v39 }
 0x691   : > { %4222 = vmatpush3.bf16.msra.mxu0 %v4218_v15  ;;  %4208 = vmatprep.mubr.msk.f32.mxu0 %vm4405_vm1, %v4394_v1 }
 0x763   : > { %v3830_v0 = vpop.f32.mrb[12].mxu0 }
 0x764   : > { %v3834_v49 = vmul.f32 0.0078125, %v3830_v0  ;;  %v4203_v25 = vpop.f32.mrb[13].mxu0 }
 0x766   : > { %v3838_v26 = vrot.slane %v3834_v49, %v5630_v36 }
 0x768   : > { %v3839_v5 = vsub.f32 %v3709_v54, %v3838_v26  ;;  %v3840_v32 = vsub.f32 %v3712_v56, %v3838_v26  ;;  %v3841_v8 = vsub.f32 %v3717_v24, %v3838_v26  ;;  %v3842_v30 = vsub.f32 %v3720_v58, %v3838_v26 }
 0x769   : > { %v3843_v9 = vsub.f32 %v3725_v19, %v3838_v26  ;;  %v3844_v38 = vsub.f32 %v3728_v13, %v3838_v26  ;;  %v3845_v62 = vsub.f32 %v3733_v35, %v3838_v26  ;;  %v3846_v52 = vsub.f32 %v3736_v22, %v3838_v26 }
 0x76a   : > { %v3847_v33 = vmul.f32 %v3839_v5, %v3839_v5  ;;  %v3848_v16 = vmul.f32 %v3840_v32, %v3840_v32  ;;  %v3849_v34 = vmul.f32 %v3841_v8, %v3841_v8  ;;  %v3850_v37 = vmul.f32 %v3842_v30, %v3842_v30 }
 0x76b   : > { %v3851_v6 = vmul.f32 %v3843_v9, %v3843_v9  ;;  %v3852_v46 = vmul.f32 %v3844_v38, %v3844_v38  ;;  %v3853_v15 = vmul.f32 %v3845_v62, %v3845_v62  ;;  %v3854_v56 = vmul.f32 %v3846_v52, %v3846_v52 }
 0x76c   : > { %v3855_v48 = vsel %vm2568_vm9, %v3847_v33, 0.0  ;;  %v3856_v1 = vsel %vm2568_vm9, %v3848_v16, 0.0  ;;  %v3858_v51 = vsel %vm2568_vm9, %v3849_v34, 0.0  ;;  %v3860_v31 = vsel %vm2568_vm9, %v3850_v37, 0.0 }
 0x76d   : > { %v3857_v10 = vadd.f32 %v3856_v1, %v3855_v48  ;;  %v3862_v54 = vsel %vm2568_vm9, %v3851_v6, 0.0  ;;  %v3864_v57 = vsel %vm2568_vm9, %v3852_v46, 0.0  ;;  %v3866_v18 = vsel %vm2568_vm9, %v3853_v15, 0.0 }
 0x76e   : > { %v3868_v24 = vsel %vm2568_vm9, %v3854_v56, 0.0 }
 0x76f   : > { %v3859_v41 = vadd.f32 %v3858_v51, %v3857_v10 }
 0x771   : > { %v3861_v11 = vadd.f32 %v3860_v31, %v3859_v41 }
 0x773   : > { %v3863_v42 = vadd.f32 %v3862_v54, %v3861_v11 }
 0x775   : > { %v3865_v23 = vadd.f32 %v3864_v57, %v3863_v42 }
 0x777   : > { %v3867_v55 = vadd.f32 %v3866_v18, %v3865_v23 }
 0x779   : > { %v3869_v12 = vadd.f32 %v3868_v24, %v3867_v55 }
 0x77b   : > { %v3870_v61 = vrot.slane %v3869_v12, 4 }
 0x77d   : > { %v3871_v53 = vadd.f32 %v3870_v61, %v3869_v12 }
 0x77f   : > { %v3872_v58 = vrot.slane %v3871_v53, 2 }
 0x781   : > { %v3873_v7 = vadd.f32 %v3872_v58, %v3871_v53 }
 0x783   : > { %v3874_v3 = vrot.slane %v3873_v7, 1 }
 0x785   : > { %v3875_v28 = vadd.f32 %v3874_v3, %v3873_v7 }
 0x787   : > { %4209 = vmatmul.mubr.msk.f32.vlgmr.msra.gmra.mrb[14].mxu0 %vm2568_vm9, %v3875_v28 }
 0x85a   : > { %v3945_v19 = vpop.f32.mrb[14].mxu0 }
 0x85b   : > { %v3949_v43 = vmul.f32 0.0078125, %v3945_v19  ;;  %v4210_v40 = vpop.f32.mrb[15].mxu0 }
 0x85d   : > { %v3950_v21 = vadd.f32 1e-05, %v3949_v43 }
 0x85f   : > { %4328 = vrsqrt.f32 %v3950_v21 }
 0x869   : > { %v4329_v13 = vpop.eup %4328 }
 0x86a   : > { %v3955_v29 = vrot.slane %v4329_v13, %v5630_v36 }
 0x86c   : > { %v3956_v44 = vmul.f32 %v3955_v29, %v3839_v5  ;;  %v3957_v35 = vmul.f32 %v3955_v29, %v3840_v32  ;;  %v3958_v27 = vmul.f32 %v3955_v29, %v3841_v8  ;;  %v3959_v47 = vmul.f32 %v3955_v29, %v3842_v30 }
 0x86d   : > { %v3960_v59 = vmul.f32 %v3955_v29, %v3843_v9  ;;  %v3961_v22 = vmul.f32 %v3955_v29, %v3844_v38  ;;  %v3962_v20 = vmul.f32 %v3955_v29, %v3845_v62  ;;  %v3963_v17 = vmul.f32 %v3955_v29, %v3846_v52 }
 0x86e   : > { %v3970_v36 = vmul.f32 %v4131_v50, %v3956_v44  ;;  %v3971_v63 = vmul.f32 %v4131_v50, %v3957_v35  ;;  %v3972_v45 = vmul.f32 %v4131_v50, %v3958_v27  ;;  %v3973_v2 = vmul.f32 %v4131_v50, %v3959_v47 }
 0x86f   : > { %v3974_v4 = vmul.f32 %v4131_v50, %v3960_v59  ;;  %v3975_v60 = vmul.f32 %v4131_v50, %v3961_v22  ;;  %v3976_v39 = vmul.f32 %v4131_v50, %v3962_v20  ;;  %v3977_v0 = vmul.f32 %v4131_v50, %v3963_v17 }
 0x870   : > { %v3984_v49 = vadd.f32 %v4132_v14, %v3970_v36  ;;  %v3985_v25 = vadd.f32 %v4132_v14, %v3971_v63  ;;  %v3986_v26 = vadd.f32 %v4132_v14, %v3972_v45  ;;  %v3987_v5 = vadd.f32 %v4132_v14, %v3973_v2 }
 0x871   : > { %v3988_v32 = vadd.f32 %v4132_v14, %v3974_v4  ;;  %v3989_v8 = vadd.f32 %v4132_v14, %v3975_v60  ;;  %v3990_v30 = vadd.f32 %v4132_v14, %v3976_v39  ;;  %v3991_v9 = vadd.f32 %v4132_v14, %v3977_v0 }
 0x872   : > { %v3992_v38 = vmax.f32 %v3984_v49, 0.0  ;;  %v3993_v62 = vmax.f32 %v3985_v25, 0.0  ;;  %v3994_v52 = vmax.f32 %v3986_v26, 0.0  ;;  %v3995_v33 = vmax.f32 %v3987_v5, 0.0 }
 0x873   : > { %v3996_v16 = vmax.f32 %v3988_v32, 0.0  ;;  %v3997_v34 = vmax.f32 %v3989_v8, 0.0  ;;  %v3998_v37 = vmax.f32 %v3990_v30, 0.0  ;;  %v3999_v48 = vmax.f32 %v3991_v9, 0.0 }
 0x874   : > { %4000 = vst.msk [vmem:[%s325_s27] sm:$0xff] %vm2568_vm9, %v3992_v38  ;;  %4001 = vst.msk [vmem:[%s325_s27 + $0x8] sm:$0xff] %vm2568_vm9, %v3993_v62 }
 0x875   : > { %4002 = vst.msk [vmem:[%s325_s27 + $0x10] sm:$0xff] %vm2568_vm9, %v3994_v52  ;;  %4003 = vst.msk [vmem:[%s325_s27 + $0x18] sm:$0xff] %vm2568_vm9, %v3995_v33 }
 0x876   : > { %4004 = vst.msk [vmem:[%s325_s27 + $0x20] sm:$0xff] %vm2568_vm9, %v3996_v16  ;;  %4005 = vst.msk [vmem:[%s325_s27 + $0x28] sm:$0xff] %vm2568_vm9, %v3997_v34 }
 0x877   : > { %4006 = vst.msk [vmem:[%s325_s27 + $0x30] sm:$0xff] %vm2568_vm9, %v3998_v37  ;;  %4007 = vst.msk [vmem:[%s325_s27 + $0x38] sm:$0xff] %vm2568_vm9, %v3999_v48 }
 0x878   : > { %4343 = shalt.err (!%p4340_p3)
}
 0x879   : > { %s4344_s24 = scalar_lea.hbm %s5971_s21, 1024  ;;  %s4348_s16 = scalar_lea.hbm %s6036_s9, 2048 }
 0x87a   : > { %p4345_p4 = scmp.ne.s32.totalorder %s5971_s21, %s4344_s24  ;;  %p4349_p9 = scmp.lt.u32.totalorder %s5971_s21, %s6036_s9 }
 0x87b   : > { %p4350_p10 = scmp.lt.u32.totalorder %s4348_s16, %s4344_s24  ;;  %p4352_p12 = scmp.lt.u32.totalorder %s4344_s24, %s5971_s21 }
 0x87c   : > { %p4346_p7 = pnand %p4345_p4, %p4500_p5 }
 0x87d   : > { %p4351_p11 = por %p4350_p10, %p4349_p9 }
 0x87e   : > { %p4347_p8 = pneg %p4346_p7 }
 0x87f   : > { %p4353_p13 = por %p4352_p12, %p4351_p11 }
 0x881   : > { %p4354_p0 = pnand %p4353_p13, %p4347_p8 }
 0x883   : > { %4357 = shalt.err (!%p4354_p0)
}
 0x884   : > { %s4411_s25 = smov 128  }
 0x885   : > { %4224 = dma.vmem_to_hbm [thread:$0]  (%p4500_p5), %s5973_s29, 1024, %s5971_s21, %s5985_s13, %s4411_s25, %s4411_s25, %s4396_s26  }
 0x886 PF: > { %p4230_p1 = scmp.ge.s32.totalorder %s4392_s12, 2  ;;  %s4037_s17 = sand.u32 1, %s4380_s30  }
 0x887   : > { %s4038_s22 = scalar_lea.sflag [#allocation5], %s4037_s17 }
 0x888   : > { %p4227_p2 = pnand %p4230_p1, %p4504_p6 }
 0x88a   : > { %4375 = dma.done.wait (!%p4227_p2), %s4038_s22, 1024  }
 0x88b   : > { %4377 = vsyncadd (!%p4227_p2), %s4038_s22, 4294966272  ;;  %p19_p3 = scmp.ge.s32.totalorder %s4487_s15, 4   ;;  %s6042_s30 = smov %s4384_s10 }
 0x88c   : > { %s6043_s10 = smov %s4388_s11  ;;  %s6044_s11 = smov %s4498_s18 }
 0x88d   : > { %s6045_s12 = smov %s4487_s15  ;;  %21 = sbr.rel (!%p19_p3) target bundleno = 3 (0x3), region = 95 }
 0x894   :  { %4043 = vsyncpa [#allocation5], 1 }
 0x895   :  { %4045 = vsyncpa [#allocation5 + $0x1], 1 }

</bundles_post_ra>
